<compile_context>
chip_gen: v7x
topology: tpu7x:2x2x1
jax: 0.10.0
libtpu: 0.0.40
codegen_flags: <defaults>
</compile_context>

<pallas_src>
import numpy as np
import jax
import jax.numpy as jnp
from jax.experimental import pallas as pl
from jax.experimental.pallas import tpu as pltpu

HUMAN_SIZE = 54
NUM_ACTIONS = 10
INPUT_SIZE = HUMAN_SIZE + NUM_ACTIONS          # 64
RNN_SIZE = 64                                  # == INPUT_SIZE so shapes line up
NUM_LAYERS = 2
SOURCE_LEN = 8                                 # encoder_input seq length
TARGET_LEN = 4
BATCH = 8
RESIDUAL_VELOCITIES = True

H = RNN_SIZE
GP = 128                                       # per-gate lane pitch (64 -> 128 padded)
GATES_N = 3 * GP                               # 384: gate slots [r | z | n]
OUT_PAD = 128                                  # lane-dense frame/projection width


# ----------------------------- Pallas kernel --------------------------------
def _sigmoid(x):
    # Exact sigmoid via a single EUP tanh push (EUP slot is otherwise idle).
    return 0.5 * jnp.tanh(0.5 * x) + 0.5


def _gru_gates(gi, gh, h):
    """Combine split-gate pre-activations into the new hidden state.

    gi, gh: (B, 384) with gate slots at 128-lane pitch: [r | z | n].
    gi already contains the merged r/z biases + b_in; gh contains b_hn.
    PyTorch GRU: n = tanh(gi_n + r * gh_n); h' = (1-z)*n + z*h.
    """
    r = _sigmoid(gi[:, 0 * GP:0 * GP + H] + gh[:, 0 * GP:0 * GP + H])
    z = _sigmoid(gi[:, 1 * GP:1 * GP + H] + gh[:, 1 * GP:1 * GP + H])
    n = jnp.tanh(gi[:, 2 * GP:2 * GP + H] + r * gh[:, 2 * GP:2 * GP + H])
    return (1.0 - z) * n + z * h


def seq2seq_kernel(enc_x_ref, dec_x0_ref,
                   enc_wi_ref, enc_wh_ref, enc_bi_ref, enc_bh_ref,
                   dec_wi_hbm, dec_wh_hbm, dec_bi_hbm, dec_bh_hbm,
                   wout_hbm, bout_hbm,
                   out_ref, state_ref,
                   dec_wi_v, dec_wh_v, dec_bi_v, dec_bh_v, wout_v, bout_v,
                   dma_sem):
    B = dec_x0_ref.shape[0]
    L = state_ref.shape[0]
    S = enc_x_ref.shape[0]
    T = out_ref.shape[0]

    # ---- start decoder-weight DMAs now; they land while the encoder runs ----
    copies = [
        pltpu.make_async_copy(dec_wi_hbm, dec_wi_v, dma_sem.at[0]),
        pltpu.make_async_copy(dec_wh_hbm, dec_wh_v, dma_sem.at[1]),
        pltpu.make_async_copy(dec_bi_hbm, dec_bi_v, dma_sem.at[2]),
        pltpu.make_async_copy(dec_bh_hbm, dec_bh_v, dma_sem.at[3]),
        pltpu.make_async_copy(wout_hbm, wout_v, dma_sem.at[4]),
        pltpu.make_async_copy(bout_hbm, bout_v, dma_sem.at[5]),
    ]
    for c in copies:
        c.start()

    # Hidden state carried in vregs (no VMEM scratch round-trips).
    h = [jnp.zeros((B, H), jnp.float32) for _ in range(L)]

    # ---------------- encoder: layer-major over the source sequence ----------
    # Layer l at time t only needs (layer l, t-1) and (layer l-1, t), so
    # layer-major is a valid topological order.  The input-gate half of each
    # layer is one batched (S*B, 64) @ (64, 384) matmul hoisted out of the
    # recurrent loop; only h @ W_hh (K=64, N=384) stays per step.
    x_parts = [enc_x_ref[t] for t in range(S)]            # S x (B, 64)
    for l in range(L):                                    # static unroll
        x_all = jnp.concatenate(x_parts, axis=0)          # (S*B, 64)
        gi_all = jnp.dot(x_all, enc_wi_ref[l],
                         preferred_element_type=jnp.float32) + enc_bi_ref[l]
        hl = h[l]
        ys = []
        for t in range(S):                                # static unroll, S=8
            gh = jnp.dot(hl, enc_wh_ref[l],
                         preferred_element_type=jnp.float32) + enc_bh_ref[l]
            hl = _gru_gates(gi_all[t * B:(t + 1) * B, :], gh, hl)
            ys.append(hl)
        h[l] = hl
        x_parts = ys                                      # inputs for layer l+1

    # ---- decoder weights must have landed before the decoder starts ---------
    for c in copies:
        c.wait()

    # ---------------- decoder: autoregressive rollout (unrolled) -------------
    # Frame x carried at 128 lanes: [pose 0:54 | one-hot 54:64 | zeros 64:128].
    x = dec_x0_ref[...]                                   # (B, 128)
    for t in range(T):                                    # static unroll, T=4
        inp = x[:, :INPUT_SIZE]                           # (B, 64), offset-0 slice
        for l in range(L):
            gi = jnp.dot(inp, dec_wi_v[l],
                         preferred_element_type=jnp.float32) + dec_bi_v[l]
            gh = jnp.dot(h[l], dec_wh_v[l],
                         preferred_element_type=jnp.float32) + dec_bh_v[l]
            h[l] = _gru_gates(gi, gh, h[l])
            inp = h[l]
        # Projection padded to 128 lanes; cols 54:128 of wout/bout are zero.
        proj = jnp.dot(inp, wout_v[...],
                       preferred_element_type=jnp.float32) + bout_v[...]
        if RESIDUAL_VELOCITIES:
            # Residual add AND "keep one-hot tail" feedback in a single add:
            #   lanes 0:54   -> pred = proj + pose residual
            #   lanes 54:64  -> 0 + one-hot tail (unchanged)
            #   lanes 64:128 -> 0 + 0
            x = proj + x
            out_ref[t] = x                                # lane-dense 128-wide store
        else:
            out_ref[t] = proj
            tail_mask = (jax.lax.broadcasted_iota(jnp.int32, (1, OUT_PAD), 1)
                         >= HUMAN_SIZE).astype(jnp.float32)
            x = proj + x * tail_mask

    zpad = jnp.zeros((B, OUT_PAD - H), jnp.float32)
    for l in range(L):
        state_ref[l] = jnp.concatenate([h[l], zpad], axis=1)   # lane-dense store


def seq2seq_forward(encoder_input, decoder_input, packed):
    """encoder_input: (S, B, 64); decoder_input: (T, B, 64).

    Returns (output (T, B, HUMAN_SIZE), state (L, B, RNN_SIZE))."""
    S, B, I = encoder_input.shape
    # last seen frame, zero-padded to 128 lanes
    dec_x0 = jnp.pad(decoder_input[0], ((0, 0), (0, OUT_PAD - I)))

    vmem = pl.BlockSpec(memory_space=pltpu.MemorySpace.VMEM)
    hbm = pl.BlockSpec(memory_space=pl.ANY)
    in_specs = [vmem, vmem,                       # enc_x, dec_x0
                vmem, vmem, vmem, vmem,           # encoder weights/biases
                hbm, hbm, hbm, hbm, hbm, hbm]     # decoder weights: DMA'd in-kernel

    out_shape = (
        jax.ShapeDtypeStruct((TARGET_LEN, B, OUT_PAD), jnp.float32),
        jax.ShapeDtypeStruct((NUM_LAYERS, B, OUT_PAD), jnp.float32),
    )
    scratch = [
        pltpu.VMEM((NUM_LAYERS, INPUT_SIZE, GATES_N), jnp.float32),   # dec_wi
        pltpu.VMEM((NUM_LAYERS, H, GATES_N), jnp.float32),            # dec_wh
        pltpu.VMEM((NUM_LAYERS, 1, GATES_N), jnp.float32),            # dec_bi
        pltpu.VMEM((NUM_LAYERS, 1, GATES_N), jnp.float32),            # dec_bh
        pltpu.VMEM((RNN_SIZE, OUT_PAD), jnp.float32),                 # wout
        pltpu.VMEM((1, OUT_PAD), jnp.float32),                        # bout
        pltpu.SemaphoreType.DMA((6,)),
    ]

    out_pad, state_pad = pl.pallas_call(
        seq2seq_kernel,
        out_shape=out_shape,
        in_specs=in_specs,
        out_specs=(vmem, vmem),
        scratch_shapes=scratch,
    )(
        encoder_input, dec_x0,
        packed["enc_wi"], packed["enc_wh"], packed["enc_bi"], packed["enc_bh"],
        packed["dec_wi"], packed["dec_wh"], packed["dec_bi"], packed["dec_bh"],
        packed["wout"], packed["bout"],
    )
    return out_pad[:, :, :HUMAN_SIZE], state_pad[:, :, :RNN_SIZE]


# ----------------------------- parameter init / packing ---------------------
def init_logical_params(key):
    """PyTorch-layout GRU / Linear parameters."""
    k = 1.0 / np.sqrt(RNN_SIZE)
    n_keys = NUM_LAYERS * 4 * 2 + 2
    ks = iter(jax.random.split(key, n_keys))

    def u(shape):
        return jax.random.uniform(next(ks), shape, jnp.float32, minval=-k, maxval=k)

    def gru():
        return [dict(w_ih=u((3 * H, INPUT_SIZE)),      # (192, 64), gate order [r,z,n]
                     w_hh=u((3 * H, H)),
                     b_ih=u((3 * H,)),
                     b_hh=u((3 * H,)))
                for _ in range(NUM_LAYERS)]

    enc = gru()
    dec = gru()                                        # architecture == 'basic'
    wout = u((HUMAN_SIZE, RNN_SIZE))                   # Linear(rnn_size, HUMAN_SIZE)
    bout = u((HUMAN_SIZE,))
    return dict(enc=enc, dec=dec, wout=wout, bout=bout)


def pack_params(p):
    """Pack PyTorch-layout params into the split, lane-aligned kernel layout."""
    def pack_gru_split(layers):
        wi = np.zeros((NUM_LAYERS, INPUT_SIZE, GATES_N), np.float32)
        wh = np.zeros((NUM_LAYERS, H, GATES_N), np.float32)
        bi = np.zeros((NUM_LAYERS, 1, GATES_N), np.float32)
        bh = np.zeros((NUM_LAYERS, 1, GATES_N), np.float32)
        for l, lay in enumerate(layers):
            w_ih = np.asarray(lay["w_ih"])             # (3H, 64), gate order [r,z,n]
            w_hh = np.asarray(lay["w_hh"])             # (3H, 64)
            b_ih = np.asarray(lay["b_ih"])
            b_hh = np.asarray(lay["b_hh"])
            for g in range(3):
                wi[l, :, g * GP:g * GP + H] = w_ih[g * H:(g + 1) * H, :].T
                wh[l, :, g * GP:g * GP + H] = w_hh[g * H:(g + 1) * H, :].T
            # r/z biases merged into the input half (one add saved per cell);
            # n-gate biases must stay split: n = tanh(gi_n + b_in + r*(gh_n + b_hn)).
            bi[l, 0, 0 * GP:0 * GP + H] = b_ih[0:H] + b_hh[0:H]
            bi[l, 0, 1 * GP:1 * GP + H] = b_ih[H:2 * H] + b_hh[H:2 * H]
            bi[l, 0, 2 * GP:2 * GP + H] = b_ih[2 * H:3 * H]
            bh[l, 0, 2 * GP:2 * GP + H] = b_hh[2 * H:3 * H]
        return (jnp.asarray(wi), jnp.asarray(wh),
                jnp.asarray(bi), jnp.asarray(bh))

    e_wi, e_wh, e_bi, e_bh = pack_gru_split(p["enc"])
    d_wi, d_wh, d_bi, d_bh = pack_gru_split(p["dec"])
    # Output projection: transposed, zero-padded to 128 lanes (cols 54:128 = 0);
    # the zero tail is what makes the residual + one-hot feedback a single add.
    wout = np.zeros((RNN_SIZE, OUT_PAD), np.float32)
    wout[:, :HUMAN_SIZE] = np.asarray(p["wout"]).T
    bout = np.zeros((1, OUT_PAD), np.float32)
    bout[0, :HUMAN_SIZE] = np.asarray(p["bout"])
    return dict(enc_wi=e_wi, enc_wh=e_wh, enc_bi=e_bi, enc_bh=e_bh,
                dec_wi=d_wi, dec_wh=d_wh, dec_bi=d_bi, dec_bh=d_bh,
                wout=jnp.asarray(wout), bout=jnp.asarray(bout))


# ----------------------------- pure-JAX reference ---------------------------
def ref_forward(enc_x, dec_x, p):
    def cell(x, h, lay):
        gi = x @ lay["w_ih"].T + lay["b_ih"]
        gh = h @ lay["w_hh"].T + lay["b_hh"]
        r = jax.nn.sigmoid(gi[:, :H] + gh[:, :H])
        z = jax.nn.sigmoid(gi[:, H:2 * H] + gh[:, H:2 * H])
        n = jnp.tanh(gi[:, 2 * H:] + r * gh[:, 2 * H:])
        return (1 - z) * n + z * h

    B = enc_x.shape[1]
    h = [jnp.zeros((B, H), jnp.float32) for _ in range(NUM_LAYERS)]
    for t in range(enc_x.shape[0]):
        x = enc_x[t]
        for l in range(NUM_LAYERS):
            h[l] = cell(x, h[l], p["enc"][l])
            x = h[l]

    outs = []
    x = dec_x[0]
    for _ in range(TARGET_LEN):
        inp = x
        for l in range(NUM_LAYERS):
            h[l] = cell(inp, h[l], p["dec"][l])
            inp = h[l]
        pred = inp @ p["wout"].T + p["bout"]
        if RESIDUAL_VELOCITIES:
            pred = pred + x[:, :HUMAN_SIZE]
        outs.append(pred)
        x = jnp.concatenate([pred, x[:, HUMAN_SIZE:]], axis=1)
    return jnp.stack(outs), jnp.stack(h)


# ------------------------------------ main -----------------------------------
if __name__ == "__main__":
    key = jax.random.PRNGKey(0)
    k_enc, k_dec, k_par = jax.random.split(key, 3)

    encoder_input = jax.random.normal(k_enc, (SOURCE_LEN, BATCH, INPUT_SIZE), jnp.float32)
    decoder_input = jax.random.normal(k_dec, (TARGET_LEN, BATCH, INPUT_SIZE), jnp.float32)
    logical = init_logical_params(k_par)
    packed = pack_params(logical)

    output, state = seq2seq_forward(encoder_input, decoder_input, packed)
    output = jax.block_until_ready(output)
    state = jax.block_until_ready(state)

    ref_out, ref_state = ref_forward(encoder_input, decoder_input, logical)
    assert output.shape == (TARGET_LEN, BATCH, HUMAN_SIZE)
    assert state.shape == (NUM_LAYERS, BATCH, RNN_SIZE)
    np.testing.assert_allclose(np.asarray(output), np.asarray(ref_out), rtol=1e-4, atol=1e-4)
    np.testing.assert_allclose(np.asarray(state), np.asarray(ref_state), rtol=1e-4, atol=1e-4)

    print("KERNEL_OK")
</pallas_src>

<mosaic_0001>
module attributes {stable_mosaic.version = 11 : i64} {
  func.func @seq2seq_kernel(%arg0: memref<8x8x64xf32, #tpu.memory_space<vmem>>, %arg1: memref<8x128xf32, #tpu.memory_space<vmem>>, %arg2: memref<2x64x384xf32, #tpu.memory_space<vmem>>, %arg3: memref<2x64x384xf32, #tpu.memory_space<vmem>>, %arg4: memref<2x1x384xf32, #tpu.memory_space<vmem>>, %arg5: memref<2x1x384xf32, #tpu.memory_space<vmem>>, %arg6: memref<2x64x384xf32, #tpu.memory_space<any>>, %arg7: memref<2x64x384xf32, #tpu.memory_space<any>>, %arg8: memref<2x1x384xf32, #tpu.memory_space<any>>, %arg9: memref<2x1x384xf32, #tpu.memory_space<any>>, %arg10: memref<64x128xf32, #tpu.memory_space<any>>, %arg11: memref<1x128xf32, #tpu.memory_space<any>>, %arg12: memref<4x8x128xf32, #tpu.memory_space<vmem>>, %arg13: memref<2x8x128xf32, #tpu.memory_space<vmem>>, %arg14: memref<2x64x384xf32, #tpu.memory_space<vmem>>, %arg15: memref<2x64x384xf32, #tpu.memory_space<vmem>>, %arg16: memref<2x1x384xf32, #tpu.memory_space<vmem>>, %arg17: memref<2x1x384xf32, #tpu.memory_space<vmem>>, %arg18: memref<64x128xf32, #tpu.memory_space<vmem>>, %arg19: memref<1x128xf32, #tpu.memory_space<vmem>>, %arg20: memref<6x!tpu.dma_semaphore, #tpu.memory_space<semaphore_mem>>) attributes {dimension_semantics = [], scalar_prefetch = 0 : i64, scratch_operands = 7 : i64, tpu.core_type = #tpu.core_type<tc>} {
    %c0_i32 = arith.constant 0 : i32
    %0 = tpu.memref_slice %arg20[%c0_i32] : memref<6x!tpu.dma_semaphore, #tpu.memory_space<semaphore_mem>> -> memref<1x!tpu.dma_semaphore, #tpu.memory_space<semaphore_mem>>
    %1 = tpu.memref_squeeze %0 : memref<1x!tpu.dma_semaphore, #tpu.memory_space<semaphore_mem>> -> memref<!tpu.dma_semaphore, #tpu.memory_space<semaphore_mem>>
    tpu.enqueue_dma source(%arg6 : memref<2x64x384xf32, #tpu.memory_space<any>>) target(%arg14 : memref<2x64x384xf32, #tpu.memory_space<vmem>>) target_semaphore(%1 : memref<!tpu.dma_semaphore, #tpu.memory_space<semaphore_mem>>)
    %c1_i32 = arith.constant 1 : i32
    %2 = tpu.memref_slice %arg20[%c1_i32] : memref<6x!tpu.dma_semaphore, #tpu.memory_space<semaphore_mem>> -> memref<1x!tpu.dma_semaphore, #tpu.memory_space<semaphore_mem>>
    %3 = tpu.memref_squeeze %2 : memref<1x!tpu.dma_semaphore, #tpu.memory_space<semaphore_mem>> -> memref<!tpu.dma_semaphore, #tpu.memory_space<semaphore_mem>>
    tpu.enqueue_dma source(%arg7 : memref<2x64x384xf32, #tpu.memory_space<any>>) target(%arg15 : memref<2x64x384xf32, #tpu.memory_space<vmem>>) target_semaphore(%3 : memref<!tpu.dma_semaphore, #tpu.memory_space<semaphore_mem>>)
    %c2_i32 = arith.constant 2 : i32
    %4 = tpu.memref_slice %arg20[%c2_i32] : memref<6x!tpu.dma_semaphore, #tpu.memory_space<semaphore_mem>> -> memref<1x!tpu.dma_semaphore, #tpu.memory_space<semaphore_mem>>
    %5 = tpu.memref_squeeze %4 : memref<1x!tpu.dma_semaphore, #tpu.memory_space<semaphore_mem>> -> memref<!tpu.dma_semaphore, #tpu.memory_space<semaphore_mem>>
    tpu.enqueue_dma source(%arg8 : memref<2x1x384xf32, #tpu.memory_space<any>>) target(%arg16 : memref<2x1x384xf32, #tpu.memory_space<vmem>>) target_semaphore(%5 : memref<!tpu.dma_semaphore, #tpu.memory_space<semaphore_mem>>)
    %c3_i32 = arith.constant 3 : i32
    %6 = tpu.memref_slice %arg20[%c3_i32] : memref<6x!tpu.dma_semaphore, #tpu.memory_space<semaphore_mem>> -> memref<1x!tpu.dma_semaphore, #tpu.memory_space<semaphore_mem>>
    %7 = tpu.memref_squeeze %6 : memref<1x!tpu.dma_semaphore, #tpu.memory_space<semaphore_mem>> -> memref<!tpu.dma_semaphore, #tpu.memory_space<semaphore_mem>>
    tpu.enqueue_dma source(%arg9 : memref<2x1x384xf32, #tpu.memory_space<any>>) target(%arg17 : memref<2x1x384xf32, #tpu.memory_space<vmem>>) target_semaphore(%7 : memref<!tpu.dma_semaphore, #tpu.memory_space<semaphore_mem>>)
    %c4_i32 = arith.constant 4 : i32
    %8 = tpu.memref_slice %arg20[%c4_i32] : memref<6x!tpu.dma_semaphore, #tpu.memory_space<semaphore_mem>> -> memref<1x!tpu.dma_semaphore, #tpu.memory_space<semaphore_mem>>
    %9 = tpu.memref_squeeze %8 : memref<1x!tpu.dma_semaphore, #tpu.memory_space<semaphore_mem>> -> memref<!tpu.dma_semaphore, #tpu.memory_space<semaphore_mem>>
    tpu.enqueue_dma source(%arg10 : memref<64x128xf32, #tpu.memory_space<any>>) target(%arg18 : memref<64x128xf32, #tpu.memory_space<vmem>>) target_semaphore(%9 : memref<!tpu.dma_semaphore, #tpu.memory_space<semaphore_mem>>)
    %c5_i32 = arith.constant 5 : i32
    %10 = tpu.memref_slice %arg20[%c5_i32] : memref<6x!tpu.dma_semaphore, #tpu.memory_space<semaphore_mem>> -> memref<1x!tpu.dma_semaphore, #tpu.memory_space<semaphore_mem>>
    %11 = tpu.memref_squeeze %10 : memref<1x!tpu.dma_semaphore, #tpu.memory_space<semaphore_mem>> -> memref<!tpu.dma_semaphore, #tpu.memory_space<semaphore_mem>>
    tpu.enqueue_dma source(%arg11 : memref<1x128xf32, #tpu.memory_space<any>>) target(%arg19 : memref<1x128xf32, #tpu.memory_space<vmem>>) target_semaphore(%11 : memref<!tpu.dma_semaphore, #tpu.memory_space<semaphore_mem>>)
    %cst = arith.constant 0.000000e+00 : f32
    %12 = vector.broadcast %cst : f32 to vector<8x64xf32>
    %cst_0 = arith.constant 0.000000e+00 : f32
    %13 = vector.broadcast %cst_0 : f32 to vector<8x64xf32>
    %c0 = arith.constant 0 : index
    %c0_1 = arith.constant 0 : index
    %c0_2 = arith.constant 0 : index
    %14 = vector.load %arg0[%c0, %c0_1, %c0_2] : memref<8x8x64xf32, #tpu.memory_space<vmem>>, vector<1x8x64xf32>
    %15 = vector.shape_cast %14 : vector<1x8x64xf32> to vector<8x64xf32>
    %c1 = arith.constant 1 : index
    %c0_3 = arith.constant 0 : index
    %c0_4 = arith.constant 0 : index
    %16 = vector.load %arg0[%c1, %c0_3, %c0_4] : memref<8x8x64xf32, #tpu.memory_space<vmem>>, vector<1x8x64xf32>
    %17 = vector.shape_cast %16 : vector<1x8x64xf32> to vector<8x64xf32>
    %c2 = arith.constant 2 : index
    %c0_5 = arith.constant 0 : index
    %c0_6 = arith.constant 0 : index
    %18 = vector.load %arg0[%c2, %c0_5, %c0_6] : memref<8x8x64xf32, #tpu.memory_space<vmem>>, vector<1x8x64xf32>
    %19 = vector.shape_cast %18 : vector<1x8x64xf32> to vector<8x64xf32>
    %c3 = arith.constant 3 : index
    %c0_7 = arith.constant 0 : index
    %c0_8 = arith.constant 0 : index
    %20 = vector.load %arg0[%c3, %c0_7, %c0_8] : memref<8x8x64xf32, #tpu.memory_space<vmem>>, vector<1x8x64xf32>
    %21 = vector.shape_cast %20 : vector<1x8x64xf32> to vector<8x64xf32>
    %c4 = arith.constant 4 : index
    %c0_9 = arith.constant 0 : index
    %c0_10 = arith.constant 0 : index
    %22 = vector.load %arg0[%c4, %c0_9, %c0_10] : memref<8x8x64xf32, #tpu.memory_space<vmem>>, vector<1x8x64xf32>
    %23 = vector.shape_cast %22 : vector<1x8x64xf32> to vector<8x64xf32>
    %c5 = arith.constant 5 : index
    %c0_11 = arith.constant 0 : index
    %c0_12 = arith.constant 0 : index
    %24 = vector.load %arg0[%c5, %c0_11, %c0_12] : memref<8x8x64xf32, #tpu.memory_space<vmem>>, vector<1x8x64xf32>
    %25 = vector.shape_cast %24 : vector<1x8x64xf32> to vector<8x64xf32>
    %c6 = arith.constant 6 : index
    %c0_13 = arith.constant 0 : index
    %c0_14 = arith.constant 0 : index
    %26 = vector.load %arg0[%c6, %c0_13, %c0_14] : memref<8x8x64xf32, #tpu.memory_space<vmem>>, vector<1x8x64xf32>
    %27 = vector.shape_cast %26 : vector<1x8x64xf32> to vector<8x64xf32>
    %c7 = arith.constant 7 : index
    %c0_15 = arith.constant 0 : index
    %c0_16 = arith.constant 0 : index
    %28 = vector.load %arg0[%c7, %c0_15, %c0_16] : memref<8x8x64xf32, #tpu.memory_space<vmem>>, vector<1x8x64xf32>
    %29 = vector.shape_cast %28 : vector<1x8x64xf32> to vector<8x64xf32>
    %30 = tpu.concatenate %15, %17, %19, %21, %23, %25, %27, %29 in 0 : vector<8x64xf32>, vector<8x64xf32>, vector<8x64xf32>, vector<8x64xf32>, vector<8x64xf32>, vector<8x64xf32>, vector<8x64xf32>, vector<8x64xf32> -> vector<64x64xf32>
    %c0_17 = arith.constant 0 : index
    %c0_18 = arith.constant 0 : index
    %c0_19 = arith.constant 0 : index
    %31 = vector.load %arg2[%c0_17, %c0_18, %c0_19] : memref<2x64x384xf32, #tpu.memory_space<vmem>>, vector<1x64x384xf32>
    %32 = vector.shape_cast %31 : vector<1x64x384xf32> to vector<64x384xf32>
    %cst_20 = arith.constant dense<0.000000e+00> : vector<64x384xf32>
    %33 = tpu.matmul %30, %32, %cst_20 {dimension_numbers = #tpu.dot_dimension_numbers<[1], [0], [0], [1], [0, 0, 1, 1], [], []>} : vector<64x64xf32>, vector<64x384xf32>, vector<64x384xf32> -> vector<64x384xf32>
    %c0_21 = arith.constant 0 : index
    %c0_22 = arith.constant 0 : index
    %c0_23 = arith.constant 0 : index
    %34 = vector.load %arg4[%c0_21, %c0_22, %c0_23] : memref<2x1x384xf32, #tpu.memory_space<vmem>>, vector<1x1x384xf32>
    %35 = vector.shape_cast %34 : vector<1x1x384xf32> to vector<1x384xf32>
    %36 = vector.broadcast %35 : vector<1x384xf32> to vector<64x384xf32>
    %37 = arith.addf %33, %36 : vector<64x384xf32>
    %c0_24 = arith.constant 0 : index
    %c0_25 = arith.constant 0 : index
    %c0_26 = arith.constant 0 : index
    %38 = vector.load %arg3[%c0_24, %c0_25, %c0_26] : memref<2x64x384xf32, #tpu.memory_space<vmem>>, vector<1x64x384xf32>
    %39 = vector.shape_cast %38 : vector<1x64x384xf32> to vector<64x384xf32>
    %cst_27 = arith.constant dense<0.000000e+00> : vector<8x384xf32>
    %40 = tpu.matmul %12, %39, %cst_27 {dimension_numbers = #tpu.dot_dimension_numbers<[1], [0], [0], [1], [0, 0, 1, 1], [], []>} : vector<8x64xf32>, vector<64x384xf32>, vector<8x384xf32> -> vector<8x384xf32>
    %c0_28 = arith.constant 0 : index
    %c0_29 = arith.constant 0 : index
    %c0_30 = arith.constant 0 : index
    %41 = vector.load %arg5[%c0_28, %c0_29, %c0_30] : memref<2x1x384xf32, #tpu.memory_space<vmem>>, vector<1x1x384xf32>
    %42 = vector.shape_cast %41 : vector<1x1x384xf32> to vector<1x384xf32>
    %43 = vector.broadcast %42 : vector<1x384xf32> to vector<8x384xf32>
    %44 = arith.addf %40, %43 : vector<8x384xf32>
    %45 = vector.extract_strided_slice %37 {offsets = [0, 0], sizes = [8, 384], strides = [1, 1]} : vector<64x384xf32> to vector<8x384xf32>
    %46 = vector.extract_strided_slice %45 {offsets = [0, 0], sizes = [8, 64], strides = [1, 1]} : vector<8x384xf32> to vector<8x64xf32>
    %47 = vector.extract_strided_slice %44 {offsets = [0, 0], sizes = [8, 64], strides = [1, 1]} : vector<8x384xf32> to vector<8x64xf32>
    %48 = arith.addf %46, %47 : vector<8x64xf32>
    %cst_31 = arith.constant 5.000000e-01 : f32
    %49 = vector.broadcast %cst_31 : f32 to vector<8x64xf32>
    %50 = arith.mulf %49, %48 : vector<8x64xf32>
    %51 = math.tanh %50 : vector<8x64xf32>
    %cst_32 = arith.constant 5.000000e-01 : f32
    %52 = vector.broadcast %cst_32 : f32 to vector<8x64xf32>
    %53 = arith.mulf %52, %51 : vector<8x64xf32>
    %cst_33 = arith.constant 5.000000e-01 : f32
    %54 = vector.broadcast %cst_33 : f32 to vector<8x64xf32>
    %55 = arith.addf %53, %54 : vector<8x64xf32>
    %56 = vector.extract_strided_slice %45 {offsets = [0, 128], sizes = [8, 64], strides = [1, 1]} : vector<8x384xf32> to vector<8x64xf32>
    %57 = vector.extract_strided_slice %44 {offsets = [0, 128], sizes = [8, 64], strides = [1, 1]} : vector<8x384xf32> to vector<8x64xf32>
    %58 = arith.addf %56, %57 : vector<8x64xf32>
    %cst_34 = arith.constant 5.000000e-01 : f32
    %59 = vector.broadcast %cst_34 : f32 to vector<8x64xf32>
    %60 = arith.mulf %59, %58 : vector<8x64xf32>
    %61 = math.tanh %60 : vector<8x64xf32>
    %cst_35 = arith.constant 5.000000e-01 : f32
    %62 = vector.broadcast %cst_35 : f32 to vector<8x64xf32>
    %63 = arith.mulf %62, %61 : vector<8x64xf32>
    %cst_36 = arith.constant 5.000000e-01 : f32
    %64 = vector.broadcast %cst_36 : f32 to vector<8x64xf32>
    %65 = arith.addf %63, %64 : vector<8x64xf32>
    %66 = vector.extract_strided_slice %45 {offsets = [0, 256], sizes = [8, 64], strides = [1, 1]} : vector<8x384xf32> to vector<8x64xf32>
    %67 = vector.extract_strided_slice %44 {offsets = [0, 256], sizes = [8, 64], strides = [1, 1]} : vector<8x384xf32> to vector<8x64xf32>
    %68 = arith.mulf %55, %67 : vector<8x64xf32>
    %69 = arith.addf %66, %68 : vector<8x64xf32>
    %70 = math.tanh %69 : vector<8x64xf32>
    %cst_37 = arith.constant 1.000000e+00 : f32
    %71 = vector.broadcast %cst_37 : f32 to vector<8x64xf32>
    %72 = arith.subf %71, %65 : vector<8x64xf32>
    %73 = arith.mulf %72, %70 : vector<8x64xf32>
    %74 = arith.mulf %65, %12 : vector<8x64xf32>
    %75 = arith.addf %73, %74 : vector<8x64xf32>
    %c0_38 = arith.constant 0 : index
    %c0_39 = arith.constant 0 : index
    %c0_40 = arith.constant 0 : index
    %76 = vector.load %arg3[%c0_38, %c0_39, %c0_40] : memref<2x64x384xf32, #tpu.memory_space<vmem>>, vector<1x64x384xf32>
    %77 = vector.shape_cast %76 : vector<1x64x384xf32> to vector<64x384xf32>
    %cst_41 = arith.constant dense<0.000000e+00> : vector<8x384xf32>
    %78 = tpu.matmul %75, %77, %cst_41 {dimension_numbers = #tpu.dot_dimension_numbers<[1], [0], [0], [1], [0, 0, 1, 1], [], []>} : vector<8x64xf32>, vector<64x384xf32>, vector<8x384xf32> -> vector<8x384xf32>
    %c0_42 = arith.constant 0 : index
    %c0_43 = arith.constant 0 : index
    %c0_44 = arith.constant 0 : index
    %79 = vector.load %arg5[%c0_42, %c0_43, %c0_44] : memref<2x1x384xf32, #tpu.memory_space<vmem>>, vector<1x1x384xf32>
    %80 = vector.shape_cast %79 : vector<1x1x384xf32> to vector<1x384xf32>
    %81 = vector.broadcast %80 : vector<1x384xf32> to vector<8x384xf32>
    %82 = arith.addf %78, %81 : vector<8x384xf32>
    %83 = vector.extract_strided_slice %37 {offsets = [8, 0], sizes = [8, 384], strides = [1, 1]} : vector<64x384xf32> to vector<8x384xf32>
    %84 = vector.extract_strided_slice %83 {offsets = [0, 0], sizes = [8, 64], strides = [1, 1]} : vector<8x384xf32> to vector<8x64xf32>
    %85 = vector.extract_strided_slice %82 {offsets = [0, 0], sizes = [8, 64], strides = [1, 1]} : vector<8x384xf32> to vector<8x64xf32>
    %86 = arith.addf %84, %85 : vector<8x64xf32>
    %cst_45 = arith.constant 5.000000e-01 : f32
    %87 = vector.broadcast %cst_45 : f32 to vector<8x64xf32>
    %88 = arith.mulf %87, %86 : vector<8x64xf32>
    %89 = math.tanh %88 : vector<8x64xf32>
    %cst_46 = arith.constant 5.000000e-01 : f32
    %90 = vector.broadcast %cst_46 : f32 to vector<8x64xf32>
    %91 = arith.mulf %90, %89 : vector<8x64xf32>
    %cst_47 = arith.constant 5.000000e-01 : f32
    %92 = vector.broadcast %cst_47 : f32 to vector<8x64xf32>
    %93 = arith.addf %91, %92 : vector<8x64xf32>
    %94 = vector.extract_strided_slice %83 {offsets = [0, 128], sizes = [8, 64], strides = [1, 1]} : vector<8x384xf32> to vector<8x64xf32>
    %95 = vector.extract_strided_slice %82 {offsets = [0, 128], sizes = [8, 64], strides = [1, 1]} : vector<8x384xf32> to vector<8x64xf32>
    %96 = arith.addf %94, %95 : vector<8x64xf32>
    %cst_48 = arith.constant 5.000000e-01 : f32
    %97 = vector.broadcast %cst_48 : f32 to vector<8x64xf32>
    %98 = arith.mulf %97, %96 : vector<8x64xf32>
    %99 = math.tanh %98 : vector<8x64xf32>
    %cst_49 = arith.constant 5.000000e-01 : f32
    %100 = vector.broadcast %cst_49 : f32 to vector<8x64xf32>
    %101 = arith.mulf %100, %99 : vector<8x64xf32>
    %cst_50 = arith.constant 5.000000e-01 : f32
    %102 = vector.broadcast %cst_50 : f32 to vector<8x64xf32>
    %103 = arith.addf %101, %102 : vector<8x64xf32>
    %104 = vector.extract_strided_slice %83 {offsets = [0, 256], sizes = [8, 64], strides = [1, 1]} : vector<8x384xf32> to vector<8x64xf32>
    %105 = vector.extract_strided_slice %82 {offsets = [0, 256], sizes = [8, 64], strides = [1, 1]} : vector<8x384xf32> to vector<8x64xf32>
    %106 = arith.mulf %93, %105 : vector<8x64xf32>
    %107 = arith.addf %104, %106 : vector<8x64xf32>
    %108 = math.tanh %107 : vector<8x64xf32>
    %cst_51 = arith.constant 1.000000e+00 : f32
    %109 = vector.broadcast %cst_51 : f32 to vector<8x64xf32>
    %110 = arith.subf %109, %103 : vector<8x64xf32>
    %111 = arith.mulf %110, %108 : vector<8x64xf32>
    %112 = arith.mulf %103, %75 : vector<8x64xf32>
    %113 = arith.addf %111, %112 : vector<8x64xf32>
    %c0_52 = arith.constant 0 : index
    %c0_53 = arith.constant 0 : index
    %c0_54 = arith.constant 0 : index
    %114 = vector.load %arg3[%c0_52, %c0_53, %c0_54] : memref<2x64x384xf32, #tpu.memory_space<vmem>>, vector<1x64x384xf32>
    %115 = vector.shape_cast %114 : vector<1x64x384xf32> to vector<64x384xf32>
    %cst_55 = arith.constant dense<0.000000e+00> : vector<8x384xf32>
    %116 = tpu.matmul %113, %115, %cst_55 {dimension_numbers = #tpu.dot_dimension_numbers<[1], [0], [0], [1], [0, 0, 1, 1], [], []>} : vector<8x64xf32>, vector<64x384xf32>, vector<8x384xf32> -> vector<8x384xf32>
    %c0_56 = arith.constant 0 : index
    %c0_57 = arith.constant 0 : index
    %c0_58 = arith.constant 0 : index
    %117 = vector.load %arg5[%c0_56, %c0_57, %c0_58] : memref<2x1x384xf32, #tpu.memory_space<vmem>>, vector<1x1x384xf32>
    %118 = vector.shape_cast %117 : vector<1x1x384xf32> to vector<1x384xf32>
    %119 = vector.broadcast %118 : vector<1x384xf32> to vector<8x384xf32>
    %120 = arith.addf %116, %119 : vector<8x384xf32>
    %121 = vector.extract_strided_slice %37 {offsets = [16, 0], sizes = [8, 384], strides = [1, 1]} : vector<64x384xf32> to vector<8x384xf32>
    %122 = vector.extract_strided_slice %121 {offsets = [0, 0], sizes = [8, 64], strides = [1, 1]} : vector<8x384xf32> to vector<8x64xf32>
    %123 = vector.extract_strided_slice %120 {offsets = [0, 0], sizes = [8, 64], strides = [1, 1]} : vector<8x384xf32> to vector<8x64xf32>
    %124 = arith.addf %122, %123 : vector<8x64xf32>
    %cst_59 = arith.constant 5.000000e-01 : f32
    %125 = vector.broadcast %cst_59 : f32 to vector<8x64xf32>
    %126 = arith.mulf %125, %124 : vector<8x64xf32>
    %127 = math.tanh %126 : vector<8x64xf32>
    %cst_60 = arith.constant 5.000000e-01 : f32
    %128 = vector.broadcast %cst_60 : f32 to vector<8x64xf32>
    %129 = arith.mulf %128, %127 : vector<8x64xf32>
    %cst_61 = arith.constant 5.000000e-01 : f32
    %130 = vector.broadcast %cst_61 : f32 to vector<8x64xf32>
    %131 = arith.addf %129, %130 : vector<8x64xf32>
    %132 = vector.extract_strided_slice %121 {offsets = [0, 128], sizes = [8, 64], strides = [1, 1]} : vector<8x384xf32> to vector<8x64xf32>
    %133 = vector.extract_strided_slice %120 {offsets = [0, 128], sizes = [8, 64], strides = [1, 1]} : vector<8x384xf32> to vector<8x64xf32>
    %134 = arith.addf %132, %133 : vector<8x64xf32>
    %cst_62 = arith.constant 5.000000e-01 : f32
    %135 = vector.broadcast %cst_62 : f32 to vector<8x64xf32>
    %136 = arith.mulf %135, %134 : vector<8x64xf32>
    %137 = math.tanh %136 : vector<8x64xf32>
    %cst_63 = arith.constant 5.000000e-01 : f32
    %138 = vector.broadcast %cst_63 : f32 to vector<8x64xf32>
    %139 = arith.mulf %138, %137 : vector<8x64xf32>
    %cst_64 = arith.constant 5.000000e-01 : f32
    %140 = vector.broadcast %cst_64 : f32 to vector<8x64xf32>
    %141 = arith.addf %139, %140 : vector<8x64xf32>
    %142 = vector.extract_strided_slice %121 {offsets = [0, 256], sizes = [8, 64], strides = [1, 1]} : vector<8x384xf32> to vector<8x64xf32>
    %143 = vector.extract_strided_slice %120 {offsets = [0, 256], sizes = [8, 64], strides = [1, 1]} : vector<8x384xf32> to vector<8x64xf32>
    %144 = arith.mulf %131, %143 : vector<8x64xf32>
    %145 = arith.addf %142, %144 : vector<8x64xf32>
    %146 = math.tanh %145 : vector<8x64xf32>
    %cst_65 = arith.constant 1.000000e+00 : f32
    %147 = vector.broadcast %cst_65 : f32 to vector<8x64xf32>
    %148 = arith.subf %147, %141 : vector<8x64xf32>
    %149 = arith.mulf %148, %146 : vector<8x64xf32>
    %150 = arith.mulf %141, %113 : vector<8x64xf32>
    %151 = arith.addf %149, %150 : vector<8x64xf32>
    %c0_66 = arith.constant 0 : index
    %c0_67 = arith.constant 0 : index
    %c0_68 = arith.constant 0 : index
    %152 = vector.load %arg3[%c0_66, %c0_67, %c0_68] : memref<2x64x384xf32, #tpu.memory_space<vmem>>, vector<1x64x384xf32>
    %153 = vector.shape_cast %152 : vector<1x64x384xf32> to vector<64x384xf32>
    %cst_69 = arith.constant dense<0.000000e+00> : vector<8x384xf32>
    %154 = tpu.matmul %151, %153, %cst_69 {dimension_numbers = #tpu.dot_dimension_numbers<[1], [0], [0], [1], [0, 0, 1, 1], [], []>} : vector<8x64xf32>, vector<64x384xf32>, vector<8x384xf32> -> vector<8x384xf32>
    %c0_70 = arith.constant 0 : index
    %c0_71 = arith.constant 0 : index
    %c0_72 = arith.constant 0 : index
    %155 = vector.load %arg5[%c0_70, %c0_71, %c0_72] : memref<2x1x384xf32, #tpu.memory_space<vmem>>, vector<1x1x384xf32>
    %156 = vector.shape_cast %155 : vector<1x1x384xf32> to vector<1x384xf32>
    %157 = vector.broadcast %156 : vector<1x384xf32> to vector<8x384xf32>
    %158 = arith.addf %154, %157 : vector<8x384xf32>
    %159 = vector.extract_strided_slice %37 {offsets = [24, 0], sizes = [8, 384], strides = [1, 1]} : vector<64x384xf32> to vector<8x384xf32>
    %160 = vector.extract_strided_slice %159 {offsets = [0, 0], sizes = [8, 64], strides = [1, 1]} : vector<8x384xf32> to vector<8x64xf32>
    %161 = vector.extract_strided_slice %158 {offsets = [0, 0], sizes = [8, 64], strides = [1, 1]} : vector<8x384xf32> to vector<8x64xf32>
    %162 = arith.addf %160, %161 : vector<8x64xf32>
    %cst_73 = arith.constant 5.000000e-01 : f32
    %163 = vector.broadcast %cst_73 : f32 to vector<8x64xf32>
    %164 = arith.mulf %163, %162 : vector<8x64xf32>
    %165 = math.tanh %164 : vector<8x64xf32>
    %cst_74 = arith.constant 5.000000e-01 : f32
    %166 = vector.broadcast %cst_74 : f32 to vector<8x64xf32>
    %167 = arith.mulf %166, %165 : vector<8x64xf32>
    %cst_75 = arith.constant 5.000000e-01 : f32
    %168 = vector.broadcast %cst_75 : f32 to vector<8x64xf32>
    %169 = arith.addf %167, %168 : vector<8x64xf32>
    %170 = vector.extract_strided_slice %159 {offsets = [0, 128], sizes = [8, 64], strides = [1, 1]} : vector<8x384xf32> to vector<8x64xf32>
    %171 = vector.extract_strided_slice %158 {offsets = [0, 128], sizes = [8, 64], strides = [1, 1]} : vector<8x384xf32> to vector<8x64xf32>
    %172 = arith.addf %170, %171 : vector<8x64xf32>
    %cst_76 = arith.constant 5.000000e-01 : f32
    %173 = vector.broadcast %cst_76 : f32 to vector<8x64xf32>
    %174 = arith.mulf %173, %172 : vector<8x64xf32>
    %175 = math.tanh %174 : vector<8x64xf32>
    %cst_77 = arith.constant 5.000000e-01 : f32
    %176 = vector.broadcast %cst_77 : f32 to vector<8x64xf32>
    %177 = arith.mulf %176, %175 : vector<8x64xf32>
    %cst_78 = arith.constant 5.000000e-01 : f32
    %178 = vector.broadcast %cst_78 : f32 to vector<8x64xf32>
    %179 = arith.addf %177, %178 : vector<8x64xf32>
    %180 = vector.extract_strided_slice %159 {offsets = [0, 256], sizes = [8, 64], strides = [1, 1]} : vector<8x384xf32> to vector<8x64xf32>
    %181 = vector.extract_strided_slice %158 {offsets = [0, 256], sizes = [8, 64], strides = [1, 1]} : vector<8x384xf32> to vector<8x64xf32>
    %182 = arith.mulf %169, %181 : vector<8x64xf32>
    %183 = arith.addf %180, %182 : vector<8x64xf32>
    %184 = math.tanh %183 : vector<8x64xf32>
    %cst_79 = arith.constant 1.000000e+00 : f32
    %185 = vector.broadcast %cst_79 : f32 to vector<8x64xf32>
    %186 = arith.subf %185, %179 : vector<8x64xf32>
    %187 = arith.mulf %186, %184 : vector<8x64xf32>
    %188 = arith.mulf %179, %151 : vector<8x64xf32>
    %189 = arith.addf %187, %188 : vector<8x64xf32>
    %c0_80 = arith.constant 0 : index
    %c0_81 = arith.constant 0 : index
    %c0_82 = arith.constant 0 : index
    %190 = vector.load %arg3[%c0_80, %c0_81, %c0_82] : memref<2x64x384xf32, #tpu.memory_space<vmem>>, vector<1x64x384xf32>
    %191 = vector.shape_cast %190 : vector<1x64x384xf32> to vector<64x384xf32>
    %cst_83 = arith.constant dense<0.000000e+00> : vector<8x384xf32>
    %192 = tpu.matmul %189, %191, %cst_83 {dimension_numbers = #tpu.dot_dimension_numbers<[1], [0], [0], [1], [0, 0, 1, 1], [], []>} : vector<8x64xf32>, vector<64x384xf32>, vector<8x384xf32> -> vector<8x384xf32>
    %c0_84 = arith.constant 0 : index
    %c0_85 = arith.constant 0 : index
    %c0_86 = arith.constant 0 : index
    %193 = vector.load %arg5[%c0_84, %c0_85, %c0_86] : memref<2x1x384xf32, #tpu.memory_space<vmem>>, vector<1x1x384xf32>
    %194 = vector.shape_cast %193 : vector<1x1x384xf32> to vector<1x384xf32>
    %195 = vector.broadcast %194 : vector<1x384xf32> to vector<8x384xf32>
    %196 = arith.addf %192, %195 : vector<8x384xf32>
    %197 = vector.extract_strided_slice %37 {offsets = [32, 0], sizes = [8, 384], strides = [1, 1]} : vector<64x384xf32> to vector<8x384xf32>
    %198 = vector.extract_strided_slice %197 {offsets = [0, 0], sizes = [8, 64], strides = [1, 1]} : vector<8x384xf32> to vector<8x64xf32>
    %199 = vector.extract_strided_slice %196 {offsets = [0, 0], sizes = [8, 64], strides = [1, 1]} : vector<8x384xf32> to vector<8x64xf32>
    %200 = arith.addf %198, %199 : vector<8x64xf32>
    %cst_87 = arith.constant 5.000000e-01 : f32
    %201 = vector.broadcast %cst_87 : f32 to vector<8x64xf32>
    %202 = arith.mulf %201, %200 : vector<8x64xf32>
    %203 = math.tanh %202 : vector<8x64xf32>
    %cst_88 = arith.constant 5.000000e-01 : f32
    %204 = vector.broadcast %cst_88 : f32 to vector<8x64xf32>
    %205 = arith.mulf %204, %203 : vector<8x64xf32>
    %cst_89 = arith.constant 5.000000e-01 : f32
    %206 = vector.broadcast %cst_89 : f32 to vector<8x64xf32>
    %207 = arith.addf %205, %206 : vector<8x64xf32>
    %208 = vector.extract_strided_slice %197 {offsets = [0, 128], sizes = [8, 64], strides = [1, 1]} : vector<8x384xf32> to vector<8x64xf32>
    %209 = vector.extract_strided_slice %196 {offsets = [0, 128], sizes = [8, 64], strides = [1, 1]} : vector<8x384xf32> to vector<8x64xf32>
    %210 = arith.addf %208, %209 : vector<8x64xf32>
    %cst_90 = arith.constant 5.000000e-01 : f32
    %211 = vector.broadcast %cst_90 : f32 to vector<8x64xf32>
    %212 = arith.mulf %211, %210 : vector<8x64xf32>
    %213 = math.tanh %212 : vector<8x64xf32>
    %cst_91 = arith.constant 5.000000e-01 : f32
    %214 = vector.broadcast %cst_91 : f32 to vector<8x64xf32>
    %215 = arith.mulf %214, %213 : vector<8x64xf32>
    %cst_92 = arith.constant 5.000000e-01 : f32
    %216 = vector.broadcast %cst_92 : f32 to vector<8x64xf32>
    %217 = arith.addf %215, %216 : vector<8x64xf32>
    %218 = vector.extract_strided_slice %197 {offsets = [0, 256], sizes = [8, 64], strides = [1, 1]} : vector<8x384xf32> to vector<8x64xf32>
    %219 = vector.extract_strided_slice %196 {offsets = [0, 256], sizes = [8, 64], strides = [1, 1]} : vector<8x384xf32> to vector<8x64xf32>
    %220 = arith.mulf %207, %219 : vector<8x64xf32>
    %221 = arith.addf %218, %220 : vector<8x64xf32>
    %222 = math.tanh %221 : vector<8x64xf32>
    %cst_93 = arith.constant 1.000000e+00 : f32
    %223 = vector.broadcast %cst_93 : f32 to vector<8x64xf32>
    %224 = arith.subf %223, %217 : vector<8x64xf32>
    %225 = arith.mulf %224, %222 : vector<8x64xf32>
    %226 = arith.mulf %217, %189 : vector<8x64xf32>
    %227 = arith.addf %225, %226 : vector<8x64xf32>
    %c0_94 = arith.constant 0 : index
    %c0_95 = arith.constant 0 : index
    %c0_96 = arith.constant 0 : index
    %228 = vector.load %arg3[%c0_94, %c0_95, %c0_96] : memref<2x64x384xf32, #tpu.memory_space<vmem>>, vector<1x64x384xf32>
    %229 = vector.shape_cast %228 : vector<1x64x384xf32> to vector<64x384xf32>
    %cst_97 = arith.constant dense<0.000000e+00> : vector<8x384xf32>
    %230 = tpu.matmul %227, %229, %cst_97 {dimension_numbers = #tpu.dot_dimension_numbers<[1], [0], [0], [1], [0, 0, 1, 1], [], []>} : vector<8x64xf32>, vector<64x384xf32>, vector<8x384xf32> -> vector<8x384xf32>
    %c0_98 = arith.constant 0 : index
    %c0_99 = arith.constant 0 : index
    %c0_100 = arith.constant 0 : index
    %231 = vector.load %arg5[%c0_98, %c0_99, %c0_100] : memref<2x1x384xf32, #tpu.memory_space<vmem>>, vector<1x1x384xf32>
    %232 = vector.shape_cast %231 : vector<1x1x384xf32> to vector<1x384xf32>
    %233 = vector.broadcast %232 : vector<1x384xf32> to vector<8x384xf32>
    %234 = arith.addf %230, %233 : vector<8x384xf32>
    %235 = vector.extract_strided_slice %37 {offsets = [40, 0], sizes = [8, 384], strides = [1, 1]} : vector<64x384xf32> to vector<8x384xf32>
    %236 = vector.extract_strided_slice %235 {offsets = [0, 0], sizes = [8, 64], strides = [1, 1]} : vector<8x384xf32> to vector<8x64xf32>
    %237 = vector.extract_strided_slice %234 {offsets = [0, 0], sizes = [8, 64], strides = [1, 1]} : vector<8x384xf32> to vector<8x64xf32>
    %238 = arith.addf %236, %237 : vector<8x64xf32>
    %cst_101 = arith.constant 5.000000e-01 : f32
    %239 = vector.broadcast %cst_101 : f32 to vector<8x64xf32>
    %240 = arith.mulf %239, %238 : vector<8x64xf32>
    %241 = math.tanh %240 : vector<8x64xf32>
    %cst_102 = arith.constant 5.000000e-01 : f32
    %242 = vector.broadcast %cst_102 : f32 to vector<8x64xf32>
    %243 = arith.mulf %242, %241 : vector<8x64xf32>
    %cst_103 = arith.constant 5.000000e-01 : f32
    %244 = vector.broadcast %cst_103 : f32 to vector<8x64xf32>
    %245 = arith.addf %243, %244 : vector<8x64xf32>
    %246 = vector.extract_strided_slice %235 {offsets = [0, 128], sizes = [8, 64], strides = [1, 1]} : vector<8x384xf32> to vector<8x64xf32>
    %247 = vector.extract_strided_slice %234 {offsets = [0, 128], sizes = [8, 64], strides = [1, 1]} : vector<8x384xf32> to vector<8x64xf32>
    %248 = arith.addf %246, %247 : vector<8x64xf32>
    %cst_104 = arith.constant 5.000000e-01 : f32
    %249 = vector.broadcast %cst_104 : f32 to vector<8x64xf32>
    %250 = arith.mulf %249, %248 : vector<8x64xf32>
    %251 = math.tanh %250 : vector<8x64xf32>
    %cst_105 = arith.constant 5.000000e-01 : f32
    %252 = vector.broadcast %cst_105 : f32 to vector<8x64xf32>
    %253 = arith.mulf %252, %251 : vector<8x64xf32>
    %cst_106 = arith.constant 5.000000e-01 : f32
    %254 = vector.broadcast %cst_106 : f32 to vector<8x64xf32>
    %255 = arith.addf %253, %254 : vector<8x64xf32>
    %256 = vector.extract_strided_slice %235 {offsets = [0, 256], sizes = [8, 64], strides = [1, 1]} : vector<8x384xf32> to vector<8x64xf32>
    %257 = vector.extract_strided_slice %234 {offsets = [0, 256], sizes = [8, 64], strides = [1, 1]} : vector<8x384xf32> to vector<8x64xf32>
    %258 = arith.mulf %245, %257 : vector<8x64xf32>
    %259 = arith.addf %256, %258 : vector<8x64xf32>
    %260 = math.tanh %259 : vector<8x64xf32>
    %cst_107 = arith.constant 1.000000e+00 : f32
    %261 = vector.broadcast %cst_107 : f32 to vector<8x64xf32>
    %262 = arith.subf %261, %255 : vector<8x64xf32>
    %263 = arith.mulf %262, %260 : vector<8x64xf32>
    %264 = arith.mulf %255, %227 : vector<8x64xf32>
    %265 = arith.addf %263, %264 : vector<8x64xf32>
    %c0_108 = arith.constant 0 : index
    %c0_109 = arith.constant 0 : index
    %c0_110 = arith.constant 0 : index
    %266 = vector.load %arg3[%c0_108, %c0_109, %c0_110] : memref<2x64x384xf32, #tpu.memory_space<vmem>>, vector<1x64x384xf32>
    %267 = vector.shape_cast %266 : vector<1x64x384xf32> to vector<64x384xf32>
    %cst_111 = arith.constant dense<0.000000e+00> : vector<8x384xf32>
    %268 = tpu.matmul %265, %267, %cst_111 {dimension_numbers = #tpu.dot_dimension_numbers<[1], [0], [0], [1], [0, 0, 1, 1], [], []>} : vector<8x64xf32>, vector<64x384xf32>, vector<8x384xf32> -> vector<8x384xf32>
    %c0_112 = arith.constant 0 : index
    %c0_113 = arith.constant 0 : index
    %c0_114 = arith.constant 0 : index
    %269 = vector.load %arg5[%c0_112, %c0_113, %c0_114] : memref<2x1x384xf32, #tpu.memory_space<vmem>>, vector<1x1x384xf32>
    %270 = vector.shape_cast %269 : vector<1x1x384xf32> to vector<1x384xf32>
    %271 = vector.broadcast %270 : vector<1x384xf32> to vector<8x384xf32>
    %272 = arith.addf %268, %271 : vector<8x384xf32>
    %273 = vector.extract_strided_slice %37 {offsets = [48, 0], sizes = [8, 384], strides = [1, 1]} : vector<64x384xf32> to vector<8x384xf32>
    %274 = vector.extract_strided_slice %273 {offsets = [0, 0], sizes = [8, 64], strides = [1, 1]} : vector<8x384xf32> to vector<8x64xf32>
    %275 = vector.extract_strided_slice %272 {offsets = [0, 0], sizes = [8, 64], strides = [1, 1]} : vector<8x384xf32> to vector<8x64xf32>
    %276 = arith.addf %274, %275 : vector<8x64xf32>
    %cst_115 = arith.constant 5.000000e-01 : f32
    %277 = vector.broadcast %cst_115 : f32 to vector<8x64xf32>
    %278 = arith.mulf %277, %276 : vector<8x64xf32>
    %279 = math.tanh %278 : vector<8x64xf32>
    %cst_116 = arith.constant 5.000000e-01 : f32
    %280 = vector.broadcast %cst_116 : f32 to vector<8x64xf32>
    %281 = arith.mulf %280, %279 : vector<8x64xf32>
    %cst_117 = arith.constant 5.000000e-01 : f32
    %282 = vector.broadcast %cst_117 : f32 to vector<8x64xf32>
    %283 = arith.addf %281, %282 : vector<8x64xf32>
    %284 = vector.extract_strided_slice %273 {offsets = [0, 128], sizes = [8, 64], strides = [1, 1]} : vector<8x384xf32> to vector<8x64xf32>
    %285 = vector.extract_strided_slice %272 {offsets = [0, 128], sizes = [8, 64], strides = [1, 1]} : vector<8x384xf32> to vector<8x64xf32>
    %286 = arith.addf %284, %285 : vector<8x64xf32>
    %cst_118 = arith.constant 5.000000e-01 : f32
    %287 = vector.broadcast %cst_118 : f32 to vector<8x64xf32>
    %288 = arith.mulf %287, %286 : vector<8x64xf32>
    %289 = math.tanh %288 : vector<8x64xf32>
    %cst_119 = arith.constant 5.000000e-01 : f32
    %290 = vector.broadcast %cst_119 : f32 to vector<8x64xf32>
    %291 = arith.mulf %290, %289 : vector<8x64xf32>
    %cst_120 = arith.constant 5.000000e-01 : f32
    %292 = vector.broadcast %cst_120 : f32 to vector<8x64xf32>
    %293 = arith.addf %291, %292 : vector<8x64xf32>
    %294 = vector.extract_strided_slice %273 {offsets = [0, 256], sizes = [8, 64], strides = [1, 1]} : vector<8x384xf32> to vector<8x64xf32>
    %295 = vector.extract_strided_slice %272 {offsets = [0, 256], sizes = [8, 64], strides = [1, 1]} : vector<8x384xf32> to vector<8x64xf32>
    %296 = arith.mulf %283, %295 : vector<8x64xf32>
    %297 = arith.addf %294, %296 : vector<8x64xf32>
    %298 = math.tanh %297 : vector<8x64xf32>
    %cst_121 = arith.constant 1.000000e+00 : f32
    %299 = vector.broadcast %cst_121 : f32 to vector<8x64xf32>
    %300 = arith.subf %299, %293 : vector<8x64xf32>
    %301 = arith.mulf %300, %298 : vector<8x64xf32>
    %302 = arith.mulf %293, %265 : vector<8x64xf32>
    %303 = arith.addf %301, %302 : vector<8x64xf32>
    %c0_122 = arith.constant 0 : index
    %c0_123 = arith.constant 0 : index
    %c0_124 = arith.constant 0 : index
    %304 = vector.load %arg3[%c0_122, %c0_123, %c0_124] : memref<2x64x384xf32, #tpu.memory_space<vmem>>, vector<1x64x384xf32>
    %305 = vector.shape_cast %304 : vector<1x64x384xf32> to vector<64x384xf32>
    %cst_125 = arith.constant dense<0.000000e+00> : vector<8x384xf32>
    %306 = tpu.matmul %303, %305, %cst_125 {dimension_numbers = #tpu.dot_dimension_numbers<[1], [0], [0], [1], [0, 0, 1, 1], [], []>} : vector<8x64xf32>, vector<64x384xf32>, vector<8x384xf32> -> vector<8x384xf32>
    %c0_126 = arith.constant 0 : index
    %c0_127 = arith.constant 0 : index
    %c0_128 = arith.constant 0 : index
    %307 = vector.load %arg5[%c0_126, %c0_127, %c0_128] : memref<2x1x384xf32, #tpu.memory_space<vmem>>, vector<1x1x384xf32>
    %308 = vector.shape_cast %307 : vector<1x1x384xf32> to vector<1x384xf32>
    %309 = vector.broadcast %308 : vector<1x384xf32> to vector<8x384xf32>
    %310 = arith.addf %306, %309 : vector<8x384xf32>
    %311 = vector.extract_strided_slice %37 {offsets = [56, 0], sizes = [8, 384], strides = [1, 1]} : vector<64x384xf32> to vector<8x384xf32>
    %312 = vector.extract_strided_slice %311 {offsets = [0, 0], sizes = [8, 64], strides = [1, 1]} : vector<8x384xf32> to vector<8x64xf32>
    %313 = vector.extract_strided_slice %310 {offsets = [0, 0], sizes = [8, 64], strides = [1, 1]} : vector<8x384xf32> to vector<8x64xf32>
    %314 = arith.addf %312, %313 : vector<8x64xf32>
    %cst_129 = arith.constant 5.000000e-01 : f32
    %315 = vector.broadcast %cst_129 : f32 to vector<8x64xf32>
    %316 = arith.mulf %315, %314 : vector<8x64xf32>
    %317 = math.tanh %316 : vector<8x64xf32>
    %cst_130 = arith.constant 5.000000e-01 : f32
    %318 = vector.broadcast %cst_130 : f32 to vector<8x64xf32>
    %319 = arith.mulf %318, %317 : vector<8x64xf32>
    %cst_131 = arith.constant 5.000000e-01 : f32
    %320 = vector.broadcast %cst_131 : f32 to vector<8x64xf32>
    %321 = arith.addf %319, %320 : vector<8x64xf32>
    %322 = vector.extract_strided_slice %311 {offsets = [0, 128], sizes = [8, 64], strides = [1, 1]} : vector<8x384xf32> to vector<8x64xf32>
    %323 = vector.extract_strided_slice %310 {offsets = [0, 128], sizes = [8, 64], strides = [1, 1]} : vector<8x384xf32> to vector<8x64xf32>
    %324 = arith.addf %322, %323 : vector<8x64xf32>
    %cst_132 = arith.constant 5.000000e-01 : f32
    %325 = vector.broadcast %cst_132 : f32 to vector<8x64xf32>
    %326 = arith.mulf %325, %324 : vector<8x64xf32>
    %327 = math.tanh %326 : vector<8x64xf32>
    %cst_133 = arith.constant 5.000000e-01 : f32
    %328 = vector.broadcast %cst_133 : f32 to vector<8x64xf32>
    %329 = arith.mulf %328, %327 : vector<8x64xf32>
    %cst_134 = arith.constant 5.000000e-01 : f32
    %330 = vector.broadcast %cst_134 : f32 to vector<8x64xf32>
    %331 = arith.addf %329, %330 : vector<8x64xf32>
    %332 = vector.extract_strided_slice %311 {offsets = [0, 256], sizes = [8, 64], strides = [1, 1]} : vector<8x384xf32> to vector<8x64xf32>
    %333 = vector.extract_strided_slice %310 {offsets = [0, 256], sizes = [8, 64], strides = [1, 1]} : vector<8x384xf32> to vector<8x64xf32>
    %334 = arith.mulf %321, %333 : vector<8x64xf32>
    %335 = arith.addf %332, %334 : vector<8x64xf32>
    %336 = math.tanh %335 : vector<8x64xf32>
    %cst_135 = arith.constant 1.000000e+00 : f32
    %337 = vector.broadcast %cst_135 : f32 to vector<8x64xf32>
    %338 = arith.subf %337, %331 : vector<8x64xf32>
    %339 = arith.mulf %338, %336 : vector<8x64xf32>
    %340 = arith.mulf %331, %303 : vector<8x64xf32>
    %341 = arith.addf %339, %340 : vector<8x64xf32>
    %342 = tpu.concatenate %75, %113, %151, %189, %227, %265, %303, %341 in 0 : vector<8x64xf32>, vector<8x64xf32>, vector<8x64xf32>, vector<8x64xf32>, vector<8x64xf32>, vector<8x64xf32>, vector<8x64xf32>, vector<8x64xf32> -> vector<64x64xf32>
    %c1_136 = arith.constant 1 : index
    %c0_137 = arith.constant 0 : index
    %c0_138 = arith.constant 0 : index
    %343 = vector.load %arg2[%c1_136, %c0_137, %c0_138] : memref<2x64x384xf32, #tpu.memory_space<vmem>>, vector<1x64x384xf32>
    %344 = vector.shape_cast %343 : vector<1x64x384xf32> to vector<64x384xf32>
    %cst_139 = arith.constant dense<0.000000e+00> : vector<64x384xf32>
    %345 = tpu.matmul %342, %344, %cst_139 {dimension_numbers = #tpu.dot_dimension_numbers<[1], [0], [0], [1], [0, 0, 1, 1], [], []>} : vector<64x64xf32>, vector<64x384xf32>, vector<64x384xf32> -> vector<64x384xf32>
    %c1_140 = arith.constant 1 : index
    %c0_141 = arith.constant 0 : index
    %c0_142 = arith.constant 0 : index
    %346 = vector.load %arg4[%c1_140, %c0_141, %c0_142] : memref<2x1x384xf32, #tpu.memory_space<vmem>>, vector<1x1x384xf32>
    %347 = vector.shape_cast %346 : vector<1x1x384xf32> to vector<1x384xf32>
    %348 = vector.broadcast %347 : vector<1x384xf32> to vector<64x384xf32>
    %349 = arith.addf %345, %348 : vector<64x384xf32>
    %c1_143 = arith.constant 1 : index
    %c0_144 = arith.constant 0 : index
    %c0_145 = arith.constant 0 : index
    %350 = vector.load %arg3[%c1_143, %c0_144, %c0_145] : memref<2x64x384xf32, #tpu.memory_space<vmem>>, vector<1x64x384xf32>
    %351 = vector.shape_cast %350 : vector<1x64x384xf32> to vector<64x384xf32>
    %cst_146 = arith.constant dense<0.000000e+00> : vector<8x384xf32>
    %352 = tpu.matmul %13, %351, %cst_146 {dimension_numbers = #tpu.dot_dimension_numbers<[1], [0], [0], [1], [0, 0, 1, 1], [], []>} : vector<8x64xf32>, vector<64x384xf32>, vector<8x384xf32> -> vector<8x384xf32>
    %c1_147 = arith.constant 1 : index
    %c0_148 = arith.constant 0 : index
    %c0_149 = arith.constant 0 : index
    %353 = vector.load %arg5[%c1_147, %c0_148, %c0_149] : memref<2x1x384xf32, #tpu.memory_space<vmem>>, vector<1x1x384xf32>
    %354 = vector.shape_cast %353 : vector<1x1x384xf32> to vector<1x384xf32>
    %355 = vector.broadcast %354 : vector<1x384xf32> to vector<8x384xf32>
    %356 = arith.addf %352, %355 : vector<8x384xf32>
    %357 = vector.extract_strided_slice %349 {offsets = [0, 0], sizes = [8, 384], strides = [1, 1]} : vector<64x384xf32> to vector<8x384xf32>
    %358 = vector.extract_strided_slice %357 {offsets = [0, 0], sizes = [8, 64], strides = [1, 1]} : vector<8x384xf32> to vector<8x64xf32>
    %359 = vector.extract_strided_slice %356 {offsets = [0, 0], sizes = [8, 64], strides = [1, 1]} : vector<8x384xf32> to vector<8x64xf32>
    %360 = arith.addf %358, %359 : vector<8x64xf32>
    %cst_150 = arith.constant 5.000000e-01 : f32
    %361 = vector.broadcast %cst_150 : f32 to vector<8x64xf32>
    %362 = arith.mulf %361, %360 : vector<8x64xf32>
    %363 = math.tanh %362 : vector<8x64xf32>
    %cst_151 = arith.constant 5.000000e-01 : f32
    %364 = vector.broadcast %cst_151 : f32 to vector<8x64xf32>
    %365 = arith.mulf %364, %363 : vector<8x64xf32>
    %cst_152 = arith.constant 5.000000e-01 : f32
    %366 = vector.broadcast %cst_152 : f32 to vector<8x64xf32>
    %367 = arith.addf %365, %366 : vector<8x64xf32>
    %368 = vector.extract_strided_slice %357 {offsets = [0, 128], sizes = [8, 64], strides = [1, 1]} : vector<8x384xf32> to vector<8x64xf32>
    %369 = vector.extract_strided_slice %356 {offsets = [0, 128], sizes = [8, 64], strides = [1, 1]} : vector<8x384xf32> to vector<8x64xf32>
    %370 = arith.addf %368, %369 : vector<8x64xf32>
    %cst_153 = arith.constant 5.000000e-01 : f32
    %371 = vector.broadcast %cst_153 : f32 to vector<8x64xf32>
    %372 = arith.mulf %371, %370 : vector<8x64xf32>
    %373 = math.tanh %372 : vector<8x64xf32>
    %cst_154 = arith.constant 5.000000e-01 : f32
    %374 = vector.broadcast %cst_154 : f32 to vector<8x64xf32>
    %375 = arith.mulf %374, %373 : vector<8x64xf32>
    %cst_155 = arith.constant 5.000000e-01 : f32
    %376 = vector.broadcast %cst_155 : f32 to vector<8x64xf32>
    %377 = arith.addf %375, %376 : vector<8x64xf32>
    %378 = vector.extract_strided_slice %357 {offsets = [0, 256], sizes = [8, 64], strides = [1, 1]} : vector<8x384xf32> to vector<8x64xf32>
    %379 = vector.extract_strided_slice %356 {offsets = [0, 256], sizes = [8, 64], strides = [1, 1]} : vector<8x384xf32> to vector<8x64xf32>
    %380 = arith.mulf %367, %379 : vector<8x64xf32>
    %381 = arith.addf %378, %380 : vector<8x64xf32>
    %382 = math.tanh %381 : vector<8x64xf32>
    %cst_156 = arith.constant 1.000000e+00 : f32
    %383 = vector.broadcast %cst_156 : f32 to vector<8x64xf32>
    %384 = arith.subf %383, %377 : vector<8x64xf32>
    %385 = arith.mulf %384, %382 : vector<8x64xf32>
    %386 = arith.mulf %377, %13 : vector<8x64xf32>
    %387 = arith.addf %385, %386 : vector<8x64xf32>
    %c1_157 = arith.constant 1 : index
    %c0_158 = arith.constant 0 : index
    %c0_159 = arith.constant 0 : index
    %388 = vector.load %arg3[%c1_157, %c0_158, %c0_159] : memref<2x64x384xf32, #tpu.memory_space<vmem>>, vector<1x64x384xf32>
    %389 = vector.shape_cast %388 : vector<1x64x384xf32> to vector<64x384xf32>
    %cst_160 = arith.constant dense<0.000000e+00> : vector<8x384xf32>
    %390 = tpu.matmul %387, %389, %cst_160 {dimension_numbers = #tpu.dot_dimension_numbers<[1], [0], [0], [1], [0, 0, 1, 1], [], []>} : vector<8x64xf32>, vector<64x384xf32>, vector<8x384xf32> -> vector<8x384xf32>
    %c1_161 = arith.constant 1 : index
    %c0_162 = arith.constant 0 : index
    %c0_163 = arith.constant 0 : index
    %391 = vector.load %arg5[%c1_161, %c0_162, %c0_163] : memref<2x1x384xf32, #tpu.memory_space<vmem>>, vector<1x1x384xf32>
    %392 = vector.shape_cast %391 : vector<1x1x384xf32> to vector<1x384xf32>
    %393 = vector.broadcast %392 : vector<1x384xf32> to vector<8x384xf32>
    %394 = arith.addf %390, %393 : vector<8x384xf32>
    %395 = vector.extract_strided_slice %349 {offsets = [8, 0], sizes = [8, 384], strides = [1, 1]} : vector<64x384xf32> to vector<8x384xf32>
    %396 = vector.extract_strided_slice %395 {offsets = [0, 0], sizes = [8, 64], strides = [1, 1]} : vector<8x384xf32> to vector<8x64xf32>
    %397 = vector.extract_strided_slice %394 {offsets = [0, 0], sizes = [8, 64], strides = [1, 1]} : vector<8x384xf32> to vector<8x64xf32>
    %398 = arith.addf %396, %397 : vector<8x64xf32>
    %cst_164 = arith.constant 5.000000e-01 : f32
    %399 = vector.broadcast %cst_164 : f32 to vector<8x64xf32>
    %400 = arith.mulf %399, %398 : vector<8x64xf32>
    %401 = math.tanh %400 : vector<8x64xf32>
    %cst_165 = arith.constant 5.000000e-01 : f32
    %402 = vector.broadcast %cst_165 : f32 to vector<8x64xf32>
    %403 = arith.mulf %402, %401 : vector<8x64xf32>
    %cst_166 = arith.constant 5.000000e-01 : f32
    %404 = vector.broadcast %cst_166 : f32 to vector<8x64xf32>
    %405 = arith.addf %403, %404 : vector<8x64xf32>
    %406 = vector.extract_strided_slice %395 {offsets = [0, 128], sizes = [8, 64], strides = [1, 1]} : vector<8x384xf32> to vector<8x64xf32>
    %407 = vector.extract_strided_slice %394 {offsets = [0, 128], sizes = [8, 64], strides = [1, 1]} : vector<8x384xf32> to vector<8x64xf32>
    %408 = arith.addf %406, %407 : vector<8x64xf32>
    %cst_167 = arith.constant 5.000000e-01 : f32
    %409 = vector.broadcast %cst_167 : f32 to vector<8x64xf32>
    %410 = arith.mulf %409, %408 : vector<8x64xf32>
    %411 = math.tanh %410 : vector<8x64xf32>
    %cst_168 = arith.constant 5.000000e-01 : f32
    %412 = vector.broadcast %cst_168 : f32 to vector<8x64xf32>
    %413 = arith.mulf %412, %411 : vector<8x64xf32>
    %cst_169 = arith.constant 5.000000e-01 : f32
    %414 = vector.broadcast %cst_169 : f32 to vector<8x64xf32>
    %415 = arith.addf %413, %414 : vector<8x64xf32>
    %416 = vector.extract_strided_slice %395 {offsets = [0, 256], sizes = [8, 64], strides = [1, 1]} : vector<8x384xf32> to vector<8x64xf32>
    %417 = vector.extract_strided_slice %394 {offsets = [0, 256], sizes = [8, 64], strides = [1, 1]} : vector<8x384xf32> to vector<8x64xf32>
    %418 = arith.mulf %405, %417 : vector<8x64xf32>
    %419 = arith.addf %416, %418 : vector<8x64xf32>
    %420 = math.tanh %419 : vector<8x64xf32>
    %cst_170 = arith.constant 1.000000e+00 : f32
    %421 = vector.broadcast %cst_170 : f32 to vector<8x64xf32>
    %422 = arith.subf %421, %415 : vector<8x64xf32>
    %423 = arith.mulf %422, %420 : vector<8x64xf32>
    %424 = arith.mulf %415, %387 : vector<8x64xf32>
    %425 = arith.addf %423, %424 : vector<8x64xf32>
    %c1_171 = arith.constant 1 : index
    %c0_172 = arith.constant 0 : index
    %c0_173 = arith.constant 0 : index
    %426 = vector.load %arg3[%c1_171, %c0_172, %c0_173] : memref<2x64x384xf32, #tpu.memory_space<vmem>>, vector<1x64x384xf32>
    %427 = vector.shape_cast %426 : vector<1x64x384xf32> to vector<64x384xf32>
    %cst_174 = arith.constant dense<0.000000e+00> : vector<8x384xf32>
    %428 = tpu.matmul %425, %427, %cst_174 {dimension_numbers = #tpu.dot_dimension_numbers<[1], [0], [0], [1], [0, 0, 1, 1], [], []>} : vector<8x64xf32>, vector<64x384xf32>, vector<8x384xf32> -> vector<8x384xf32>
    %c1_175 = arith.constant 1 : index
    %c0_176 = arith.constant 0 : index
    %c0_177 = arith.constant 0 : index
    %429 = vector.load %arg5[%c1_175, %c0_176, %c0_177] : memref<2x1x384xf32, #tpu.memory_space<vmem>>, vector<1x1x384xf32>
    %430 = vector.shape_cast %429 : vector<1x1x384xf32> to vector<1x384xf32>
    %431 = vector.broadcast %430 : vector<1x384xf32> to vector<8x384xf32>
    %432 = arith.addf %428, %431 : vector<8x384xf32>
    %433 = vector.extract_strided_slice %349 {offsets = [16, 0], sizes = [8, 384], strides = [1, 1]} : vector<64x384xf32> to vector<8x384xf32>
    %434 = vector.extract_strided_slice %433 {offsets = [0, 0], sizes = [8, 64], strides = [1, 1]} : vector<8x384xf32> to vector<8x64xf32>
    %435 = vector.extract_strided_slice %432 {offsets = [0, 0], sizes = [8, 64], strides = [1, 1]} : vector<8x384xf32> to vector<8x64xf32>
    %436 = arith.addf %434, %435 : vector<8x64xf32>
    %cst_178 = arith.constant 5.000000e-01 : f32
    %437 = vector.broadcast %cst_178 : f32 to vector<8x64xf32>
    %438 = arith.mulf %437, %436 : vector<8x64xf32>
    %439 = math.tanh %438 : vector<8x64xf32>
    %cst_179 = arith.constant 5.000000e-01 : f32
    %440 = vector.broadcast %cst_179 : f32 to vector<8x64xf32>
    %441 = arith.mulf %440, %439 : vector<8x64xf32>
    %cst_180 = arith.constant 5.000000e-01 : f32
    %442 = vector.broadcast %cst_180 : f32 to vector<8x64xf32>
    %443 = arith.addf %441, %442 : vector<8x64xf32>
    %444 = vector.extract_strided_slice %433 {offsets = [0, 128], sizes = [8, 64], strides = [1, 1]} : vector<8x384xf32> to vector<8x64xf32>
    %445 = vector.extract_strided_slice %432 {offsets = [0, 128], sizes = [8, 64], strides = [1, 1]} : vector<8x384xf32> to vector<8x64xf32>
    %446 = arith.addf %444, %445 : vector<8x64xf32>
    %cst_181 = arith.constant 5.000000e-01 : f32
    %447 = vector.broadcast %cst_181 : f32 to vector<8x64xf32>
    %448 = arith.mulf %447, %446 : vector<8x64xf32>
    %449 = math.tanh %448 : vector<8x64xf32>
    %cst_182 = arith.constant 5.000000e-01 : f32
    %450 = vector.broadcast %cst_182 : f32 to vector<8x64xf32>
    %451 = arith.mulf %450, %449 : vector<8x64xf32>
    %cst_183 = arith.constant 5.000000e-01 : f32
    %452 = vector.broadcast %cst_183 : f32 to vector<8x64xf32>
    %453 = arith.addf %451, %452 : vector<8x64xf32>
    %454 = vector.extract_strided_slice %433 {offsets = [0, 256], sizes = [8, 64], strides = [1, 1]} : vector<8x384xf32> to vector<8x64xf32>
    %455 = vector.extract_strided_slice %432 {offsets = [0, 256], sizes = [8, 64], strides = [1, 1]} : vector<8x384xf32> to vector<8x64xf32>
    %456 = arith.mulf %443, %455 : vector<8x64xf32>
    %457 = arith.addf %454, %456 : vector<8x64xf32>
    %458 = math.tanh %457 : vector<8x64xf32>
    %cst_184 = arith.constant 1.000000e+00 : f32
    %459 = vector.broadcast %cst_184 : f32 to vector<8x64xf32>
    %460 = arith.subf %459, %453 : vector<8x64xf32>
    %461 = arith.mulf %460, %458 : vector<8x64xf32>
    %462 = arith.mulf %453, %425 : vector<8x64xf32>
    %463 = arith.addf %461, %462 : vector<8x64xf32>
    %c1_185 = arith.constant 1 : index
    %c0_186 = arith.constant 0 : index
    %c0_187 = arith.constant 0 : index
    %464 = vector.load %arg3[%c1_185, %c0_186, %c0_187] : memref<2x64x384xf32, #tpu.memory_space<vmem>>, vector<1x64x384xf32>
    %465 = vector.shape_cast %464 : vector<1x64x384xf32> to vector<64x384xf32>
    %cst_188 = arith.constant dense<0.000000e+00> : vector<8x384xf32>
    %466 = tpu.matmul %463, %465, %cst_188 {dimension_numbers = #tpu.dot_dimension_numbers<[1], [0], [0], [1], [0, 0, 1, 1], [], []>} : vector<8x64xf32>, vector<64x384xf32>, vector<8x384xf32> -> vector<8x384xf32>
    %c1_189 = arith.constant 1 : index
    %c0_190 = arith.constant 0 : index
    %c0_191 = arith.constant 0 : index
    %467 = vector.load %arg5[%c1_189, %c0_190, %c0_191] : memref<2x1x384xf32, #tpu.memory_space<vmem>>, vector<1x1x384xf32>
    %468 = vector.shape_cast %467 : vector<1x1x384xf32> to vector<1x384xf32>
    %469 = vector.broadcast %468 : vector<1x384xf32> to vector<8x384xf32>
    %470 = arith.addf %466, %469 : vector<8x384xf32>
    %471 = vector.extract_strided_slice %349 {offsets = [24, 0], sizes = [8, 384], strides = [1, 1]} : vector<64x384xf32> to vector<8x384xf32>
    %472 = vector.extract_strided_slice %471 {offsets = [0, 0], sizes = [8, 64], strides = [1, 1]} : vector<8x384xf32> to vector<8x64xf32>
    %473 = vector.extract_strided_slice %470 {offsets = [0, 0], sizes = [8, 64], strides = [1, 1]} : vector<8x384xf32> to vector<8x64xf32>
    %474 = arith.addf %472, %473 : vector<8x64xf32>
    %cst_192 = arith.constant 5.000000e-01 : f32
    %475 = vector.broadcast %cst_192 : f32 to vector<8x64xf32>
    %476 = arith.mulf %475, %474 : vector<8x64xf32>
    %477 = math.tanh %476 : vector<8x64xf32>
    %cst_193 = arith.constant 5.000000e-01 : f32
    %478 = vector.broadcast %cst_193 : f32 to vector<8x64xf32>
    %479 = arith.mulf %478, %477 : vector<8x64xf32>
    %cst_194 = arith.constant 5.000000e-01 : f32
    %480 = vector.broadcast %cst_194 : f32 to vector<8x64xf32>
    %481 = arith.addf %479, %480 : vector<8x64xf32>
    %482 = vector.extract_strided_slice %471 {offsets = [0, 128], sizes = [8, 64], strides = [1, 1]} : vector<8x384xf32> to vector<8x64xf32>
    %483 = vector.extract_strided_slice %470 {offsets = [0, 128], sizes = [8, 64], strides = [1, 1]} : vector<8x384xf32> to vector<8x64xf32>
    %484 = arith.addf %482, %483 : vector<8x64xf32>
    %cst_195 = arith.constant 5.000000e-01 : f32
    %485 = vector.broadcast %cst_195 : f32 to vector<8x64xf32>
    %486 = arith.mulf %485, %484 : vector<8x64xf32>
    %487 = math.tanh %486 : vector<8x64xf32>
    %cst_196 = arith.constant 5.000000e-01 : f32
    %488 = vector.broadcast %cst_196 : f32 to vector<8x64xf32>
    %489 = arith.mulf %488, %487 : vector<8x64xf32>
    %cst_197 = arith.constant 5.000000e-01 : f32
    %490 = vector.broadcast %cst_197 : f32 to vector<8x64xf32>
    %491 = arith.addf %489, %490 : vector<8x64xf32>
    %492 = vector.extract_strided_slice %471 {offsets = [0, 256], sizes = [8, 64], strides = [1, 1]} : vector<8x384xf32> to vector<8x64xf32>
    %493 = vector.extract_strided_slice %470 {offsets = [0, 256], sizes = [8, 64], strides = [1, 1]} : vector<8x384xf32> to vector<8x64xf32>
    %494 = arith.mulf %481, %493 : vector<8x64xf32>
    %495 = arith.addf %492, %494 : vector<8x64xf32>
    %496 = math.tanh %495 : vector<8x64xf32>
    %cst_198 = arith.constant 1.000000e+00 : f32
    %497 = vector.broadcast %cst_198 : f32 to vector<8x64xf32>
    %498 = arith.subf %497, %491 : vector<8x64xf32>
    %499 = arith.mulf %498, %496 : vector<8x64xf32>
    %500 = arith.mulf %491, %463 : vector<8x64xf32>
    %501 = arith.addf %499, %500 : vector<8x64xf32>
    %c1_199 = arith.constant 1 : index
    %c0_200 = arith.constant 0 : index
    %c0_201 = arith.constant 0 : index
    %502 = vector.load %arg3[%c1_199, %c0_200, %c0_201] : memref<2x64x384xf32, #tpu.memory_space<vmem>>, vector<1x64x384xf32>
    %503 = vector.shape_cast %502 : vector<1x64x384xf32> to vector<64x384xf32>
    %cst_202 = arith.constant dense<0.000000e+00> : vector<8x384xf32>
    %504 = tpu.matmul %501, %503, %cst_202 {dimension_numbers = #tpu.dot_dimension_numbers<[1], [0], [0], [1], [0, 0, 1, 1], [], []>} : vector<8x64xf32>, vector<64x384xf32>, vector<8x384xf32> -> vector<8x384xf32>
    %c1_203 = arith.constant 1 : index
    %c0_204 = arith.constant 0 : index
    %c0_205 = arith.constant 0 : index
    %505 = vector.load %arg5[%c1_203, %c0_204, %c0_205] : memref<2x1x384xf32, #tpu.memory_space<vmem>>, vector<1x1x384xf32>
    %506 = vector.shape_cast %505 : vector<1x1x384xf32> to vector<1x384xf32>
    %507 = vector.broadcast %506 : vector<1x384xf32> to vector<8x384xf32>
    %508 = arith.addf %504, %507 : vector<8x384xf32>
    %509 = vector.extract_strided_slice %349 {offsets = [32, 0], sizes = [8, 384], strides = [1, 1]} : vector<64x384xf32> to vector<8x384xf32>
    %510 = vector.extract_strided_slice %509 {offsets = [0, 0], sizes = [8, 64], strides = [1, 1]} : vector<8x384xf32> to vector<8x64xf32>
    %511 = vector.extract_strided_slice %508 {offsets = [0, 0], sizes = [8, 64], strides = [1, 1]} : vector<8x384xf32> to vector<8x64xf32>
    %512 = arith.addf %510, %511 : vector<8x64xf32>
    %cst_206 = arith.constant 5.000000e-01 : f32
    %513 = vector.broadcast %cst_206 : f32 to vector<8x64xf32>
    %514 = arith.mulf %513, %512 : vector<8x64xf32>
    %515 = math.tanh %514 : vector<8x64xf32>
    %cst_207 = arith.constant 5.000000e-01 : f32
    %516 = vector.broadcast %cst_207 : f32 to vector<8x64xf32>
    %517 = arith.mulf %516, %515 : vector<8x64xf32>
    %cst_208 = arith.constant 5.000000e-01 : f32
    %518 = vector.broadcast %cst_208 : f32 to vector<8x64xf32>
    %519 = arith.addf %517, %518 : vector<8x64xf32>
    %520 = vector.extract_strided_slice %509 {offsets = [0, 128], sizes = [8, 64], strides = [1, 1]} : vector<8x384xf32> to vector<8x64xf32>
    %521 = vector.extract_strided_slice %508 {offsets = [0, 128], sizes = [8, 64], strides = [1, 1]} : vector<8x384xf32> to vector<8x64xf32>
    %522 = arith.addf %520, %521 : vector<8x64xf32>
    %cst_209 = arith.constant 5.000000e-01 : f32
    %523 = vector.broadcast %cst_209 : f32 to vector<8x64xf32>
    %524 = arith.mulf %523, %522 : vector<8x64xf32>
    %525 = math.tanh %524 : vector<8x64xf32>
    %cst_210 = arith.constant 5.000000e-01 : f32
    %526 = vector.broadcast %cst_210 : f32 to vector<8x64xf32>
    %527 = arith.mulf %526, %525 : vector<8x64xf32>
    %cst_211 = arith.constant 5.000000e-01 : f32
    %528 = vector.broadcast %cst_211 : f32 to vector<8x64xf32>
    %529 = arith.addf %527, %528 : vector<8x64xf32>
    %530 = vector.extract_strided_slice %509 {offsets = [0, 256], sizes = [8, 64], strides = [1, 1]} : vector<8x384xf32> to vector<8x64xf32>
    %531 = vector.extract_strided_slice %508 {offsets = [0, 256], sizes = [8, 64], strides = [1, 1]} : vector<8x384xf32> to vector<8x64xf32>
    %532 = arith.mulf %519, %531 : vector<8x64xf32>
    %533 = arith.addf %530, %532 : vector<8x64xf32>
    %534 = math.tanh %533 : vector<8x64xf32>
    %cst_212 = arith.constant 1.000000e+00 : f32
    %535 = vector.broadcast %cst_212 : f32 to vector<8x64xf32>
    %536 = arith.subf %535, %529 : vector<8x64xf32>
    %537 = arith.mulf %536, %534 : vector<8x64xf32>
    %538 = arith.mulf %529, %501 : vector<8x64xf32>
    %539 = arith.addf %537, %538 : vector<8x64xf32>
    %c1_213 = arith.constant 1 : index
    %c0_214 = arith.constant 0 : index
    %c0_215 = arith.constant 0 : index
    %540 = vector.load %arg3[%c1_213, %c0_214, %c0_215] : memref<2x64x384xf32, #tpu.memory_space<vmem>>, vector<1x64x384xf32>
    %541 = vector.shape_cast %540 : vector<1x64x384xf32> to vector<64x384xf32>
    %cst_216 = arith.constant dense<0.000000e+00> : vector<8x384xf32>
    %542 = tpu.matmul %539, %541, %cst_216 {dimension_numbers = #tpu.dot_dimension_numbers<[1], [0], [0], [1], [0, 0, 1, 1], [], []>} : vector<8x64xf32>, vector<64x384xf32>, vector<8x384xf32> -> vector<8x384xf32>
    %c1_217 = arith.constant 1 : index
    %c0_218 = arith.constant 0 : index
    %c0_219 = arith.constant 0 : index
    %543 = vector.load %arg5[%c1_217, %c0_218, %c0_219] : memref<2x1x384xf32, #tpu.memory_space<vmem>>, vector<1x1x384xf32>
    %544 = vector.shape_cast %543 : vector<1x1x384xf32> to vector<1x384xf32>
    %545 = vector.broadcast %544 : vector<1x384xf32> to vector<8x384xf32>
    %546 = arith.addf %542, %545 : vector<8x384xf32>
    %547 = vector.extract_strided_slice %349 {offsets = [40, 0], sizes = [8, 384], strides = [1, 1]} : vector<64x384xf32> to vector<8x384xf32>
    %548 = vector.extract_strided_slice %547 {offsets = [0, 0], sizes = [8, 64], strides = [1, 1]} : vector<8x384xf32> to vector<8x64xf32>
    %549 = vector.extract_strided_slice %546 {offsets = [0, 0], sizes = [8, 64], strides = [1, 1]} : vector<8x384xf32> to vector<8x64xf32>
    %550 = arith.addf %548, %549 : vector<8x64xf32>
    %cst_220 = arith.constant 5.000000e-01 : f32
    %551 = vector.broadcast %cst_220 : f32 to vector<8x64xf32>
    %552 = arith.mulf %551, %550 : vector<8x64xf32>
    %553 = math.tanh %552 : vector<8x64xf32>
    %cst_221 = arith.constant 5.000000e-01 : f32
    %554 = vector.broadcast %cst_221 : f32 to vector<8x64xf32>
    %555 = arith.mulf %554, %553 : vector<8x64xf32>
    %cst_222 = arith.constant 5.000000e-01 : f32
    %556 = vector.broadcast %cst_222 : f32 to vector<8x64xf32>
    %557 = arith.addf %555, %556 : vector<8x64xf32>
    %558 = vector.extract_strided_slice %547 {offsets = [0, 128], sizes = [8, 64], strides = [1, 1]} : vector<8x384xf32> to vector<8x64xf32>
    %559 = vector.extract_strided_slice %546 {offsets = [0, 128], sizes = [8, 64], strides = [1, 1]} : vector<8x384xf32> to vector<8x64xf32>
    %560 = arith.addf %558, %559 : vector<8x64xf32>
    %cst_223 = arith.constant 5.000000e-01 : f32
    %561 = vector.broadcast %cst_223 : f32 to vector<8x64xf32>
    %562 = arith.mulf %561, %560 : vector<8x64xf32>
    %563 = math.tanh %562 : vector<8x64xf32>
    %cst_224 = arith.constant 5.000000e-01 : f32
    %564 = vector.broadcast %cst_224 : f32 to vector<8x64xf32>
    %565 = arith.mulf %564, %563 : vector<8x64xf32>
    %cst_225 = arith.constant 5.000000e-01 : f32
    %566 = vector.broadcast %cst_225 : f32 to vector<8x64xf32>
    %567 = arith.addf %565, %566 : vector<8x64xf32>
    %568 = vector.extract_strided_slice %547 {offsets = [0, 256], sizes = [8, 64], strides = [1, 1]} : vector<8x384xf32> to vector<8x64xf32>
    %569 = vector.extract_strided_slice %546 {offsets = [0, 256], sizes = [8, 64], strides = [1, 1]} : vector<8x384xf32> to vector<8x64xf32>
    %570 = arith.mulf %557, %569 : vector<8x64xf32>
    %571 = arith.addf %568, %570 : vector<8x64xf32>
    %572 = math.tanh %571 : vector<8x64xf32>
    %cst_226 = arith.constant 1.000000e+00 : f32
    %573 = vector.broadcast %cst_226 : f32 to vector<8x64xf32>
    %574 = arith.subf %573, %567 : vector<8x64xf32>
    %575 = arith.mulf %574, %572 : vector<8x64xf32>
    %576 = arith.mulf %567, %539 : vector<8x64xf32>
    %577 = arith.addf %575, %576 : vector<8x64xf32>
    %c1_227 = arith.constant 1 : index
    %c0_228 = arith.constant 0 : index
    %c0_229 = arith.constant 0 : index
    %578 = vector.load %arg3[%c1_227, %c0_228, %c0_229] : memref<2x64x384xf32, #tpu.memory_space<vmem>>, vector<1x64x384xf32>
    %579 = vector.shape_cast %578 : vector<1x64x384xf32> to vector<64x384xf32>
    %cst_230 = arith.constant dense<0.000000e+00> : vector<8x384xf32>
    %580 = tpu.matmul %577, %579, %cst_230 {dimension_numbers = #tpu.dot_dimension_numbers<[1], [0], [0], [1], [0, 0, 1, 1], [], []>} : vector<8x64xf32>, vector<64x384xf32>, vector<8x384xf32> -> vector<8x384xf32>
    %c1_231 = arith.constant 1 : index
    %c0_232 = arith.constant 0 : index
    %c0_233 = arith.constant 0 : index
    %581 = vector.load %arg5[%c1_231, %c0_232, %c0_233] : memref<2x1x384xf32, #tpu.memory_space<vmem>>, vector<1x1x384xf32>
    %582 = vector.shape_cast %581 : vector<1x1x384xf32> to vector<1x384xf32>
    %583 = vector.broadcast %582 : vector<1x384xf32> to vector<8x384xf32>
    %584 = arith.addf %580, %583 : vector<8x384xf32>
    %585 = vector.extract_strided_slice %349 {offsets = [48, 0], sizes = [8, 384], strides = [1, 1]} : vector<64x384xf32> to vector<8x384xf32>
    %586 = vector.extract_strided_slice %585 {offsets = [0, 0], sizes = [8, 64], strides = [1, 1]} : vector<8x384xf32> to vector<8x64xf32>
    %587 = vector.extract_strided_slice %584 {offsets = [0, 0], sizes = [8, 64], strides = [1, 1]} : vector<8x384xf32> to vector<8x64xf32>
    %588 = arith.addf %586, %587 : vector<8x64xf32>
    %cst_234 = arith.constant 5.000000e-01 : f32
    %589 = vector.broadcast %cst_234 : f32 to vector<8x64xf32>
    %590 = arith.mulf %589, %588 : vector<8x64xf32>
    %591 = math.tanh %590 : vector<8x64xf32>
    %cst_235 = arith.constant 5.000000e-01 : f32
    %592 = vector.broadcast %cst_235 : f32 to vector<8x64xf32>
    %593 = arith.mulf %592, %591 : vector<8x64xf32>
    %cst_236 = arith.constant 5.000000e-01 : f32
    %594 = vector.broadcast %cst_236 : f32 to vector<8x64xf32>
    %595 = arith.addf %593, %594 : vector<8x64xf32>
    %596 = vector.extract_strided_slice %585 {offsets = [0, 128], sizes = [8, 64], strides = [1, 1]} : vector<8x384xf32> to vector<8x64xf32>
    %597 = vector.extract_strided_slice %584 {offsets = [0, 128], sizes = [8, 64], strides = [1, 1]} : vector<8x384xf32> to vector<8x64xf32>
    %598 = arith.addf %596, %597 : vector<8x64xf32>
    %cst_237 = arith.constant 5.000000e-01 : f32
    %599 = vector.broadcast %cst_237 : f32 to vector<8x64xf32>
    %600 = arith.mulf %599, %598 : vector<8x64xf32>
    %601 = math.tanh %600 : vector<8x64xf32>
    %cst_238 = arith.constant 5.000000e-01 : f32
    %602 = vector.broadcast %cst_238 : f32 to vector<8x64xf32>
    %603 = arith.mulf %602, %601 : vector<8x64xf32>
    %cst_239 = arith.constant 5.000000e-01 : f32
    %604 = vector.broadcast %cst_239 : f32 to vector<8x64xf32>
    %605 = arith.addf %603, %604 : vector<8x64xf32>
    %606 = vector.extract_strided_slice %585 {offsets = [0, 256], sizes = [8, 64], strides = [1, 1]} : vector<8x384xf32> to vector<8x64xf32>
    %607 = vector.extract_strided_slice %584 {offsets = [0, 256], sizes = [8, 64], strides = [1, 1]} : vector<8x384xf32> to vector<8x64xf32>
    %608 = arith.mulf %595, %607 : vector<8x64xf32>
    %609 = arith.addf %606, %608 : vector<8x64xf32>
    %610 = math.tanh %609 : vector<8x64xf32>
    %cst_240 = arith.constant 1.000000e+00 : f32
    %611 = vector.broadcast %cst_240 : f32 to vector<8x64xf32>
    %612 = arith.subf %611, %605 : vector<8x64xf32>
    %613 = arith.mulf %612, %610 : vector<8x64xf32>
    %614 = arith.mulf %605, %577 : vector<8x64xf32>
    %615 = arith.addf %613, %614 : vector<8x64xf32>
    %c1_241 = arith.constant 1 : index
    %c0_242 = arith.constant 0 : index
    %c0_243 = arith.constant 0 : index
    %616 = vector.load %arg3[%c1_241, %c0_242, %c0_243] : memref<2x64x384xf32, #tpu.memory_space<vmem>>, vector<1x64x384xf32>
    %617 = vector.shape_cast %616 : vector<1x64x384xf32> to vector<64x384xf32>
    %cst_244 = arith.constant dense<0.000000e+00> : vector<8x384xf32>
    %618 = tpu.matmul %615, %617, %cst_244 {dimension_numbers = #tpu.dot_dimension_numbers<[1], [0], [0], [1], [0, 0, 1, 1], [], []>} : vector<8x64xf32>, vector<64x384xf32>, vector<8x384xf32> -> vector<8x384xf32>
    %c1_245 = arith.constant 1 : index
    %c0_246 = arith.constant 0 : index
    %c0_247 = arith.constant 0 : index
    %619 = vector.load %arg5[%c1_245, %c0_246, %c0_247] : memref<2x1x384xf32, #tpu.memory_space<vmem>>, vector<1x1x384xf32>
    %620 = vector.shape_cast %619 : vector<1x1x384xf32> to vector<1x384xf32>
    %621 = vector.broadcast %620 : vector<1x384xf32> to vector<8x384xf32>
    %622 = arith.addf %618, %621 : vector<8x384xf32>
    %623 = vector.extract_strided_slice %349 {offsets = [56, 0], sizes = [8, 384], strides = [1, 1]} : vector<64x384xf32> to vector<8x384xf32>
    %624 = vector.extract_strided_slice %623 {offsets = [0, 0], sizes = [8, 64], strides = [1, 1]} : vector<8x384xf32> to vector<8x64xf32>
    %625 = vector.extract_strided_slice %622 {offsets = [0, 0], sizes = [8, 64], strides = [1, 1]} : vector<8x384xf32> to vector<8x64xf32>
    %626 = arith.addf %624, %625 : vector<8x64xf32>
    %cst_248 = arith.constant 5.000000e-01 : f32
    %627 = vector.broadcast %cst_248 : f32 to vector<8x64xf32>
    %628 = arith.mulf %627, %626 : vector<8x64xf32>
    %629 = math.tanh %628 : vector<8x64xf32>
    %cst_249 = arith.constant 5.000000e-01 : f32
    %630 = vector.broadcast %cst_249 : f32 to vector<8x64xf32>
    %631 = arith.mulf %630, %629 : vector<8x64xf32>
    %cst_250 = arith.constant 5.000000e-01 : f32
    %632 = vector.broadcast %cst_250 : f32 to vector<8x64xf32>
    %633 = arith.addf %631, %632 : vector<8x64xf32>
    %634 = vector.extract_strided_slice %623 {offsets = [0, 128], sizes = [8, 64], strides = [1, 1]} : vector<8x384xf32> to vector<8x64xf32>
    %635 = vector.extract_strided_slice %622 {offsets = [0, 128], sizes = [8, 64], strides = [1, 1]} : vector<8x384xf32> to vector<8x64xf32>
    %636 = arith.addf %634, %635 : vector<8x64xf32>
    %cst_251 = arith.constant 5.000000e-01 : f32
    %637 = vector.broadcast %cst_251 : f32 to vector<8x64xf32>
    %638 = arith.mulf %637, %636 : vector<8x64xf32>
    %639 = math.tanh %638 : vector<8x64xf32>
    %cst_252 = arith.constant 5.000000e-01 : f32
    %640 = vector.broadcast %cst_252 : f32 to vector<8x64xf32>
    %641 = arith.mulf %640, %639 : vector<8x64xf32>
    %cst_253 = arith.constant 5.000000e-01 : f32
    %642 = vector.broadcast %cst_253 : f32 to vector<8x64xf32>
    %643 = arith.addf %641, %642 : vector<8x64xf32>
    %644 = vector.extract_strided_slice %623 {offsets = [0, 256], sizes = [8, 64], strides = [1, 1]} : vector<8x384xf32> to vector<8x64xf32>
    %645 = vector.extract_strided_slice %622 {offsets = [0, 256], sizes = [8, 64], strides = [1, 1]} : vector<8x384xf32> to vector<8x64xf32>
    %646 = arith.mulf %633, %645 : vector<8x64xf32>
    %647 = arith.addf %644, %646 : vector<8x64xf32>
    %648 = math.tanh %647 : vector<8x64xf32>
    %cst_254 = arith.constant 1.000000e+00 : f32
    %649 = vector.broadcast %cst_254 : f32 to vector<8x64xf32>
    %650 = arith.subf %649, %643 : vector<8x64xf32>
    %651 = arith.mulf %650, %648 : vector<8x64xf32>
    %652 = arith.mulf %643, %615 : vector<8x64xf32>
    %653 = arith.addf %651, %652 : vector<8x64xf32>
    %c0_i32_255 = arith.constant 0 : i32
    %654 = tpu.memref_slice %arg20[%c0_i32_255] : memref<6x!tpu.dma_semaphore, #tpu.memory_space<semaphore_mem>> -> memref<1x!tpu.dma_semaphore, #tpu.memory_space<semaphore_mem>>
    %655 = tpu.memref_squeeze %654 : memref<1x!tpu.dma_semaphore, #tpu.memory_space<semaphore_mem>> -> memref<!tpu.dma_semaphore, #tpu.memory_space<semaphore_mem>>
    tpu.wait_dma2 semaphore(%655 : memref<!tpu.dma_semaphore, #tpu.memory_space<semaphore_mem>>) src(%arg6 : memref<2x64x384xf32, #tpu.memory_space<any>>) dst(%arg14 : memref<2x64x384xf32, #tpu.memory_space<vmem>>)
    %c1_i32_256 = arith.constant 1 : i32
    %656 = tpu.memref_slice %arg20[%c1_i32_256] : memref<6x!tpu.dma_semaphore, #tpu.memory_space<semaphore_mem>> -> memref<1x!tpu.dma_semaphore, #tpu.memory_space<semaphore_mem>>
    %657 = tpu.memref_squeeze %656 : memref<1x!tpu.dma_semaphore, #tpu.memory_space<semaphore_mem>> -> memref<!tpu.dma_semaphore, #tpu.memory_space<semaphore_mem>>
    tpu.wait_dma2 semaphore(%657 : memref<!tpu.dma_semaphore, #tpu.memory_space<semaphore_mem>>) src(%arg7 : memref<2x64x384xf32, #tpu.memory_space<any>>) dst(%arg15 : memref<2x64x384xf32, #tpu.memory_space<vmem>>)
    %c2_i32_257 = arith.constant 2 : i32
    %658 = tpu.memref_slice %arg20[%c2_i32_257] : memref<6x!tpu.dma_semaphore, #tpu.memory_space<semaphore_mem>> -> memref<1x!tpu.dma_semaphore, #tpu.memory_space<semaphore_mem>>
    %659 = tpu.memref_squeeze %658 : memref<1x!tpu.dma_semaphore, #tpu.memory_space<semaphore_mem>> -> memref<!tpu.dma_semaphore, #tpu.memory_space<semaphore_mem>>
    tpu.wait_dma2 semaphore(%659 : memref<!tpu.dma_semaphore, #tpu.memory_space<semaphore_mem>>) src(%arg8 : memref<2x1x384xf32, #tpu.memory_space<any>>) dst(%arg16 : memref<2x1x384xf32, #tpu.memory_space<vmem>>)
    %c3_i32_258 = arith.constant 3 : i32
    %660 = tpu.memref_slice %arg20[%c3_i32_258] : memref<6x!tpu.dma_semaphore, #tpu.memory_space<semaphore_mem>> -> memref<1x!tpu.dma_semaphore, #tpu.memory_space<semaphore_mem>>
    %661 = tpu.memref_squeeze %660 : memref<1x!tpu.dma_semaphore, #tpu.memory_space<semaphore_mem>> -> memref<!tpu.dma_semaphore, #tpu.memory_space<semaphore_mem>>
    tpu.wait_dma2 semaphore(%661 : memref<!tpu.dma_semaphore, #tpu.memory_space<semaphore_mem>>) src(%arg9 : memref<2x1x384xf32, #tpu.memory_space<any>>) dst(%arg17 : memref<2x1x384xf32, #tpu.memory_space<vmem>>)
    %c4_i32_259 = arith.constant 4 : i32
    %662 = tpu.memref_slice %arg20[%c4_i32_259] : memref<6x!tpu.dma_semaphore, #tpu.memory_space<semaphore_mem>> -> memref<1x!tpu.dma_semaphore, #tpu.memory_space<semaphore_mem>>
    %663 = tpu.memref_squeeze %662 : memref<1x!tpu.dma_semaphore, #tpu.memory_space<semaphore_mem>> -> memref<!tpu.dma_semaphore, #tpu.memory_space<semaphore_mem>>
    tpu.wait_dma2 semaphore(%663 : memref<!tpu.dma_semaphore, #tpu.memory_space<semaphore_mem>>) src(%arg10 : memref<64x128xf32, #tpu.memory_space<any>>) dst(%arg18 : memref<64x128xf32, #tpu.memory_space<vmem>>)
    %c5_i32_260 = arith.constant 5 : i32
    %664 = tpu.memref_slice %arg20[%c5_i32_260] : memref<6x!tpu.dma_semaphore, #tpu.memory_space<semaphore_mem>> -> memref<1x!tpu.dma_semaphore, #tpu.memory_space<semaphore_mem>>
    %665 = tpu.memref_squeeze %664 : memref<1x!tpu.dma_semaphore, #tpu.memory_space<semaphore_mem>> -> memref<!tpu.dma_semaphore, #tpu.memory_space<semaphore_mem>>
    tpu.wait_dma2 semaphore(%665 : memref<!tpu.dma_semaphore, #tpu.memory_space<semaphore_mem>>) src(%arg11 : memref<1x128xf32, #tpu.memory_space<any>>) dst(%arg19 : memref<1x128xf32, #tpu.memory_space<vmem>>)
    %c0_261 = arith.constant 0 : index
    %c0_262 = arith.constant 0 : index
    %666 = vector.load %arg1[%c0_261, %c0_262] : memref<8x128xf32, #tpu.memory_space<vmem>>, vector<8x128xf32>
    %667 = vector.extract_strided_slice %666 {offsets = [0, 0], sizes = [8, 64], strides = [1, 1]} : vector<8x128xf32> to vector<8x64xf32>
    %c0_263 = arith.constant 0 : index
    %c0_264 = arith.constant 0 : index
    %c0_265 = arith.constant 0 : index
    %668 = vector.load %arg14[%c0_263, %c0_264, %c0_265] : memref<2x64x384xf32, #tpu.memory_space<vmem>>, vector<1x64x384xf32>
    %669 = vector.shape_cast %668 : vector<1x64x384xf32> to vector<64x384xf32>
    %cst_266 = arith.constant dense<0.000000e+00> : vector<8x384xf32>
    %670 = tpu.matmul %667, %669, %cst_266 {dimension_numbers = #tpu.dot_dimension_numbers<[1], [0], [0], [1], [0, 0, 1, 1], [], []>} : vector<8x64xf32>, vector<64x384xf32>, vector<8x384xf32> -> vector<8x384xf32>
    %c0_267 = arith.constant 0 : index
    %c0_268 = arith.constant 0 : index
    %c0_269 = arith.constant 0 : index
    %671 = vector.load %arg16[%c0_267, %c0_268, %c0_269] : memref<2x1x384xf32, #tpu.memory_space<vmem>>, vector<1x1x384xf32>
    %672 = vector.shape_cast %671 : vector<1x1x384xf32> to vector<1x384xf32>
    %673 = vector.broadcast %672 : vector<1x384xf32> to vector<8x384xf32>
    %674 = arith.addf %670, %673 : vector<8x384xf32>
    %c0_270 = arith.constant 0 : index
    %c0_271 = arith.constant 0 : index
    %c0_272 = arith.constant 0 : index
    %675 = vector.load %arg15[%c0_270, %c0_271, %c0_272] : memref<2x64x384xf32, #tpu.memory_space<vmem>>, vector<1x64x384xf32>
    %676 = vector.shape_cast %675 : vector<1x64x384xf32> to vector<64x384xf32>
    %cst_273 = arith.constant dense<0.000000e+00> : vector<8x384xf32>
    %677 = tpu.matmul %341, %676, %cst_273 {dimension_numbers = #tpu.dot_dimension_numbers<[1], [0], [0], [1], [0, 0, 1, 1], [], []>} : vector<8x64xf32>, vector<64x384xf32>, vector<8x384xf32> -> vector<8x384xf32>
    %c0_274 = arith.constant 0 : index
    %c0_275 = arith.constant 0 : index
    %c0_276 = arith.constant 0 : index
    %678 = vector.load %arg17[%c0_274, %c0_275, %c0_276] : memref<2x1x384xf32, #tpu.memory_space<vmem>>, vector<1x1x384xf32>
    %679 = vector.shape_cast %678 : vector<1x1x384xf32> to vector<1x384xf32>
    %680 = vector.broadcast %679 : vector<1x384xf32> to vector<8x384xf32>
    %681 = arith.addf %677, %680 : vector<8x384xf32>
    %682 = vector.extract_strided_slice %674 {offsets = [0, 0], sizes = [8, 64], strides = [1, 1]} : vector<8x384xf32> to vector<8x64xf32>
    %683 = vector.extract_strided_slice %681 {offsets = [0, 0], sizes = [8, 64], strides = [1, 1]} : vector<8x384xf32> to vector<8x64xf32>
    %684 = arith.addf %682, %683 : vector<8x64xf32>
    %cst_277 = arith.constant 5.000000e-01 : f32
    %685 = vector.broadcast %cst_277 : f32 to vector<8x64xf32>
    %686 = arith.mulf %685, %684 : vector<8x64xf32>
    %687 = math.tanh %686 : vector<8x64xf32>
    %cst_278 = arith.constant 5.000000e-01 : f32
    %688 = vector.broadcast %cst_278 : f32 to vector<8x64xf32>
    %689 = arith.mulf %688, %687 : vector<8x64xf32>
    %cst_279 = arith.constant 5.000000e-01 : f32
    %690 = vector.broadcast %cst_279 : f32 to vector<8x64xf32>
    %691 = arith.addf %689, %690 : vector<8x64xf32>
    %692 = vector.extract_strided_slice %674 {offsets = [0, 128], sizes = [8, 64], strides = [1, 1]} : vector<8x384xf32> to vector<8x64xf32>
    %693 = vector.extract_strided_slice %681 {offsets = [0, 128], sizes = [8, 64], strides = [1, 1]} : vector<8x384xf32> to vector<8x64xf32>
    %694 = arith.addf %692, %693 : vector<8x64xf32>
    %cst_280 = arith.constant 5.000000e-01 : f32
    %695 = vector.broadcast %cst_280 : f32 to vector<8x64xf32>
    %696 = arith.mulf %695, %694 : vector<8x64xf32>
    %697 = math.tanh %696 : vector<8x64xf32>
    %cst_281 = arith.constant 5.000000e-01 : f32
    %698 = vector.broadcast %cst_281 : f32 to vector<8x64xf32>
    %699 = arith.mulf %698, %697 : vector<8x64xf32>
    %cst_282 = arith.constant 5.000000e-01 : f32
    %700 = vector.broadcast %cst_282 : f32 to vector<8x64xf32>
    %701 = arith.addf %699, %700 : vector<8x64xf32>
    %702 = vector.extract_strided_slice %674 {offsets = [0, 256], sizes = [8, 64], strides = [1, 1]} : vector<8x384xf32> to vector<8x64xf32>
    %703 = vector.extract_strided_slice %681 {offsets = [0, 256], sizes = [8, 64], strides = [1, 1]} : vector<8x384xf32> to vector<8x64xf32>
    %704 = arith.mulf %691, %703 : vector<8x64xf32>
    %705 = arith.addf %702, %704 : vector<8x64xf32>
    %706 = math.tanh %705 : vector<8x64xf32>
    %cst_283 = arith.constant 1.000000e+00 : f32
    %707 = vector.broadcast %cst_283 : f32 to vector<8x64xf32>
    %708 = arith.subf %707, %701 : vector<8x64xf32>
    %709 = arith.mulf %708, %706 : vector<8x64xf32>
    %710 = arith.mulf %701, %341 : vector<8x64xf32>
    %711 = arith.addf %709, %710 : vector<8x64xf32>
    %c1_284 = arith.constant 1 : index
    %c0_285 = arith.constant 0 : index
    %c0_286 = arith.constant 0 : index
    %712 = vector.load %arg14[%c1_284, %c0_285, %c0_286] : memref<2x64x384xf32, #tpu.memory_space<vmem>>, vector<1x64x384xf32>
    %713 = vector.shape_cast %712 : vector<1x64x384xf32> to vector<64x384xf32>
    %cst_287 = arith.constant dense<0.000000e+00> : vector<8x384xf32>
    %714 = tpu.matmul %711, %713, %cst_287 {dimension_numbers = #tpu.dot_dimension_numbers<[1], [0], [0], [1], [0, 0, 1, 1], [], []>} : vector<8x64xf32>, vector<64x384xf32>, vector<8x384xf32> -> vector<8x384xf32>
    %c1_288 = arith.constant 1 : index
    %c0_289 = arith.constant 0 : index
    %c0_290 = arith.constant 0 : index
    %715 = vector.load %arg16[%c1_288, %c0_289, %c0_290] : memref<2x1x384xf32, #tpu.memory_space<vmem>>, vector<1x1x384xf32>
    %716 = vector.shape_cast %715 : vector<1x1x384xf32> to vector<1x384xf32>
    %717 = vector.broadcast %716 : vector<1x384xf32> to vector<8x384xf32>
    %718 = arith.addf %714, %717 : vector<8x384xf32>
    %c1_291 = arith.constant 1 : index
    %c0_292 = arith.constant 0 : index
    %c0_293 = arith.constant 0 : index
    %719 = vector.load %arg15[%c1_291, %c0_292, %c0_293] : memref<2x64x384xf32, #tpu.memory_space<vmem>>, vector<1x64x384xf32>
    %720 = vector.shape_cast %719 : vector<1x64x384xf32> to vector<64x384xf32>
    %cst_294 = arith.constant dense<0.000000e+00> : vector<8x384xf32>
    %721 = tpu.matmul %653, %720, %cst_294 {dimension_numbers = #tpu.dot_dimension_numbers<[1], [0], [0], [1], [0, 0, 1, 1], [], []>} : vector<8x64xf32>, vector<64x384xf32>, vector<8x384xf32> -> vector<8x384xf32>
    %c1_295 = arith.constant 1 : index
    %c0_296 = arith.constant 0 : index
    %c0_297 = arith.constant 0 : index
    %722 = vector.load %arg17[%c1_295, %c0_296, %c0_297] : memref<2x1x384xf32, #tpu.memory_space<vmem>>, vector<1x1x384xf32>
    %723 = vector.shape_cast %722 : vector<1x1x384xf32> to vector<1x384xf32>
    %724 = vector.broadcast %723 : vector<1x384xf32> to vector<8x384xf32>
    %725 = arith.addf %721, %724 : vector<8x384xf32>
    %726 = vector.extract_strided_slice %718 {offsets = [0, 0], sizes = [8, 64], strides = [1, 1]} : vector<8x384xf32> to vector<8x64xf32>
    %727 = vector.extract_strided_slice %725 {offsets = [0, 0], sizes = [8, 64], strides = [1, 1]} : vector<8x384xf32> to vector<8x64xf32>
    %728 = arith.addf %726, %727 : vector<8x64xf32>
    %cst_298 = arith.constant 5.000000e-01 : f32
    %729 = vector.broadcast %cst_298 : f32 to vector<8x64xf32>
    %730 = arith.mulf %729, %728 : vector<8x64xf32>
    %731 = math.tanh %730 : vector<8x64xf32>
    %cst_299 = arith.constant 5.000000e-01 : f32
    %732 = vector.broadcast %cst_299 : f32 to vector<8x64xf32>
    %733 = arith.mulf %732, %731 : vector<8x64xf32>
    %cst_300 = arith.constant 5.000000e-01 : f32
    %734 = vector.broadcast %cst_300 : f32 to vector<8x64xf32>
    %735 = arith.addf %733, %734 : vector<8x64xf32>
    %736 = vector.extract_strided_slice %718 {offsets = [0, 128], sizes = [8, 64], strides = [1, 1]} : vector<8x384xf32> to vector<8x64xf32>
    %737 = vector.extract_strided_slice %725 {offsets = [0, 128], sizes = [8, 64], strides = [1, 1]} : vector<8x384xf32> to vector<8x64xf32>
    %738 = arith.addf %736, %737 : vector<8x64xf32>
    %cst_301 = arith.constant 5.000000e-01 : f32
    %739 = vector.broadcast %cst_301 : f32 to vector<8x64xf32>
    %740 = arith.mulf %739, %738 : vector<8x64xf32>
    %741 = math.tanh %740 : vector<8x64xf32>
    %cst_302 = arith.constant 5.000000e-01 : f32
    %742 = vector.broadcast %cst_302 : f32 to vector<8x64xf32>
    %743 = arith.mulf %742, %741 : vector<8x64xf32>
    %cst_303 = arith.constant 5.000000e-01 : f32
    %744 = vector.broadcast %cst_303 : f32 to vector<8x64xf32>
    %745 = arith.addf %743, %744 : vector<8x64xf32>
    %746 = vector.extract_strided_slice %718 {offsets = [0, 256], sizes = [8, 64], strides = [1, 1]} : vector<8x384xf32> to vector<8x64xf32>
    %747 = vector.extract_strided_slice %725 {offsets = [0, 256], sizes = [8, 64], strides = [1, 1]} : vector<8x384xf32> to vector<8x64xf32>
    %748 = arith.mulf %735, %747 : vector<8x64xf32>
    %749 = arith.addf %746, %748 : vector<8x64xf32>
    %750 = math.tanh %749 : vector<8x64xf32>
    %cst_304 = arith.constant 1.000000e+00 : f32
    %751 = vector.broadcast %cst_304 : f32 to vector<8x64xf32>
    %752 = arith.subf %751, %745 : vector<8x64xf32>
    %753 = arith.mulf %752, %750 : vector<8x64xf32>
    %754 = arith.mulf %745, %653 : vector<8x64xf32>
    %755 = arith.addf %753, %754 : vector<8x64xf32>
    %c0_305 = arith.constant 0 : index
    %c0_306 = arith.constant 0 : index
    %756 = vector.load %arg18[%c0_305, %c0_306] : memref<64x128xf32, #tpu.memory_space<vmem>>, vector<64x128xf32>
    %cst_307 = arith.constant dense<0.000000e+00> : vector<8x128xf32>
    %757 = tpu.matmul %755, %756, %cst_307 {dimension_numbers = #tpu.dot_dimension_numbers<[1], [0], [0], [1], [0, 0, 1, 1], [], []>} : vector<8x64xf32>, vector<64x128xf32>, vector<8x128xf32> -> vector<8x128xf32>
    %c0_308 = arith.constant 0 : index
    %c0_309 = arith.constant 0 : index
    %758 = vector.load %arg19[%c0_308, %c0_309] : memref<1x128xf32, #tpu.memory_space<vmem>>, vector<1x128xf32>
    %759 = vector.broadcast %758 : vector<1x128xf32> to vector<8x128xf32>
    %760 = arith.addf %757, %759 : vector<8x128xf32>
    %761 = arith.addf %760, %666 : vector<8x128xf32>
    %c0_310 = arith.constant 0 : index
    %c0_311 = arith.constant 0 : index
    %c0_312 = arith.constant 0 : index
    %762 = vector.load %arg12[%c0_310, %c0_311, %c0_312] : memref<4x8x128xf32, #tpu.memory_space<vmem>>, vector<1x8x128xf32>
    %763 = vector.shape_cast %762 : vector<1x8x128xf32> to vector<8x128xf32>
    %764 = vector.shape_cast %761 : vector<8x128xf32> to vector<1x8x128xf32>
    tpu.vector_store %arg12[%c0_310, %c0_311, %c0_312], %764 {strides = array<i32>} : memref<4x8x128xf32, #tpu.memory_space<vmem>>, vector<1x8x128xf32>,
    %765 = vector.extract_strided_slice %761 {offsets = [0, 0], sizes = [8, 64], strides = [1, 1]} : vector<8x128xf32> to vector<8x64xf32>
    %c0_313 = arith.constant 0 : index
    %c0_314 = arith.constant 0 : index
    %c0_315 = arith.constant 0 : index
    %766 = vector.load %arg14[%c0_313, %c0_314, %c0_315] : memref<2x64x384xf32, #tpu.memory_space<vmem>>, vector<1x64x384xf32>
    %767 = vector.shape_cast %766 : vector<1x64x384xf32> to vector<64x384xf32>
    %cst_316 = arith.constant dense<0.000000e+00> : vector<8x384xf32>
    %768 = tpu.matmul %765, %767, %cst_316 {dimension_numbers = #tpu.dot_dimension_numbers<[1], [0], [0], [1], [0, 0, 1, 1], [], []>} : vector<8x64xf32>, vector<64x384xf32>, vector<8x384xf32> -> vector<8x384xf32>
    %c0_317 = arith.constant 0 : index
    %c0_318 = arith.constant 0 : index
    %c0_319 = arith.constant 0 : index
    %769 = vector.load %arg16[%c0_317, %c0_318, %c0_319] : memref<2x1x384xf32, #tpu.memory_space<vmem>>, vector<1x1x384xf32>
    %770 = vector.shape_cast %769 : vector<1x1x384xf32> to vector<1x384xf32>
    %771 = vector.broadcast %770 : vector<1x384xf32> to vector<8x384xf32>
    %772 = arith.addf %768, %771 : vector<8x384xf32>
    %c0_320 = arith.constant 0 : index
    %c0_321 = arith.constant 0 : index
    %c0_322 = arith.constant 0 : index
    %773 = vector.load %arg15[%c0_320, %c0_321, %c0_322] : memref<2x64x384xf32, #tpu.memory_space<vmem>>, vector<1x64x384xf32>
    %774 = vector.shape_cast %773 : vector<1x64x384xf32> to vector<64x384xf32>
    %cst_323 = arith.constant dense<0.000000e+00> : vector<8x384xf32>
    %775 = tpu.matmul %711, %774, %cst_323 {dimension_numbers = #tpu.dot_dimension_numbers<[1], [0], [0], [1], [0, 0, 1, 1], [], []>} : vector<8x64xf32>, vector<64x384xf32>, vector<8x384xf32> -> vector<8x384xf32>
    %c0_324 = arith.constant 0 : index
    %c0_325 = arith.constant 0 : index
    %c0_326 = arith.constant 0 : index
    %776 = vector.load %arg17[%c0_324, %c0_325, %c0_326] : memref<2x1x384xf32, #tpu.memory_space<vmem>>, vector<1x1x384xf32>
    %777 = vector.shape_cast %776 : vector<1x1x384xf32> to vector<1x384xf32>
    %778 = vector.broadcast %777 : vector<1x384xf32> to vector<8x384xf32>
    %779 = arith.addf %775, %778 : vector<8x384xf32>
    %780 = vector.extract_strided_slice %772 {offsets = [0, 0], sizes = [8, 64], strides = [1, 1]} : vector<8x384xf32> to vector<8x64xf32>
    %781 = vector.extract_strided_slice %779 {offsets = [0, 0], sizes = [8, 64], strides = [1, 1]} : vector<8x384xf32> to vector<8x64xf32>
    %782 = arith.addf %780, %781 : vector<8x64xf32>
    %cst_327 = arith.constant 5.000000e-01 : f32
    %783 = vector.broadcast %cst_327 : f32 to vector<8x64xf32>
    %784 = arith.mulf %783, %782 : vector<8x64xf32>
    %785 = math.tanh %784 : vector<8x64xf32>
    %cst_328 = arith.constant 5.000000e-01 : f32
    %786 = vector.broadcast %cst_328 : f32 to vector<8x64xf32>
    %787 = arith.mulf %786, %785 : vector<8x64xf32>
    %cst_329 = arith.constant 5.000000e-01 : f32
    %788 = vector.broadcast %cst_329 : f32 to vector<8x64xf32>
    %789 = arith.addf %787, %788 : vector<8x64xf32>
    %790 = vector.extract_strided_slice %772 {offsets = [0, 128], sizes = [8, 64], strides = [1, 1]} : vector<8x384xf32> to vector<8x64xf32>
    %791 = vector.extract_strided_slice %779 {offsets = [0, 128], sizes = [8, 64], strides = [1, 1]} : vector<8x384xf32> to vector<8x64xf32>
    %792 = arith.addf %790, %791 : vector<8x64xf32>
    %cst_330 = arith.constant 5.000000e-01 : f32
    %793 = vector.broadcast %cst_330 : f32 to vector<8x64xf32>
    %794 = arith.mulf %793, %792 : vector<8x64xf32>
    %795 = math.tanh %794 : vector<8x64xf32>
    %cst_331 = arith.constant 5.000000e-01 : f32
    %796 = vector.broadcast %cst_331 : f32 to vector<8x64xf32>
    %797 = arith.mulf %796, %795 : vector<8x64xf32>
    %cst_332 = arith.constant 5.000000e-01 : f32
    %798 = vector.broadcast %cst_332 : f32 to vector<8x64xf32>
    %799 = arith.addf %797, %798 : vector<8x64xf32>
    %800 = vector.extract_strided_slice %772 {offsets = [0, 256], sizes = [8, 64], strides = [1, 1]} : vector<8x384xf32> to vector<8x64xf32>
    %801 = vector.extract_strided_slice %779 {offsets = [0, 256], sizes = [8, 64], strides = [1, 1]} : vector<8x384xf32> to vector<8x64xf32>
    %802 = arith.mulf %789, %801 : vector<8x64xf32>
    %803 = arith.addf %800, %802 : vector<8x64xf32>
    %804 = math.tanh %803 : vector<8x64xf32>
    %cst_333 = arith.constant 1.000000e+00 : f32
    %805 = vector.broadcast %cst_333 : f32 to vector<8x64xf32>
    %806 = arith.subf %805, %799 : vector<8x64xf32>
    %807 = arith.mulf %806, %804 : vector<8x64xf32>
    %808 = arith.mulf %799, %711 : vector<8x64xf32>
    %809 = arith.addf %807, %808 : vector<8x64xf32>
    %c1_334 = arith.constant 1 : index
    %c0_335 = arith.constant 0 : index
    %c0_336 = arith.constant 0 : index
    %810 = vector.load %arg14[%c1_334, %c0_335, %c0_336] : memref<2x64x384xf32, #tpu.memory_space<vmem>>, vector<1x64x384xf32>
    %811 = vector.shape_cast %810 : vector<1x64x384xf32> to vector<64x384xf32>
    %cst_337 = arith.constant dense<0.000000e+00> : vector<8x384xf32>
    %812 = tpu.matmul %809, %811, %cst_337 {dimension_numbers = #tpu.dot_dimension_numbers<[1], [0], [0], [1], [0, 0, 1, 1], [], []>} : vector<8x64xf32>, vector<64x384xf32>, vector<8x384xf32> -> vector<8x384xf32>
    %c1_338 = arith.constant 1 : index
    %c0_339 = arith.constant 0 : index
    %c0_340 = arith.constant 0 : index
    %813 = vector.load %arg16[%c1_338, %c0_339, %c0_340] : memref<2x1x384xf32, #tpu.memory_space<vmem>>, vector<1x1x384xf32>
    %814 = vector.shape_cast %813 : vector<1x1x384xf32> to vector<1x384xf32>
    %815 = vector.broadcast %814 : vector<1x384xf32> to vector<8x384xf32>
    %816 = arith.addf %812, %815 : vector<8x384xf32>
    %c1_341 = arith.constant 1 : index
    %c0_342 = arith.constant 0 : index
    %c0_343 = arith.constant 0 : index
    %817 = vector.load %arg15[%c1_341, %c0_342, %c0_343] : memref<2x64x384xf32, #tpu.memory_space<vmem>>, vector<1x64x384xf32>
    %818 = vector.shape_cast %817 : vector<1x64x384xf32> to vector<64x384xf32>
    %cst_344 = arith.constant dense<0.000000e+00> : vector<8x384xf32>
    %819 = tpu.matmul %755, %818, %cst_344 {dimension_numbers = #tpu.dot_dimension_numbers<[1], [0], [0], [1], [0, 0, 1, 1], [], []>} : vector<8x64xf32>, vector<64x384xf32>, vector<8x384xf32> -> vector<8x384xf32>
    %c1_345 = arith.constant 1 : index
    %c0_346 = arith.constant 0 : index
    %c0_347 = arith.constant 0 : index
    %820 = vector.load %arg17[%c1_345, %c0_346, %c0_347] : memref<2x1x384xf32, #tpu.memory_space<vmem>>, vector<1x1x384xf32>
    %821 = vector.shape_cast %820 : vector<1x1x384xf32> to vector<1x384xf32>
    %822 = vector.broadcast %821 : vector<1x384xf32> to vector<8x384xf32>
    %823 = arith.addf %819, %822 : vector<8x384xf32>
    %824 = vector.extract_strided_slice %816 {offsets = [0, 0], sizes = [8, 64], strides = [1, 1]} : vector<8x384xf32> to vector<8x64xf32>
    %825 = vector.extract_strided_slice %823 {offsets = [0, 0], sizes = [8, 64], strides = [1, 1]} : vector<8x384xf32> to vector<8x64xf32>
    %826 = arith.addf %824, %825 : vector<8x64xf32>
    %cst_348 = arith.constant 5.000000e-01 : f32
    %827 = vector.broadcast %cst_348 : f32 to vector<8x64xf32>
    %828 = arith.mulf %827, %826 : vector<8x64xf32>
    %829 = math.tanh %828 : vector<8x64xf32>
    %cst_349 = arith.constant 5.000000e-01 : f32
    %830 = vector.broadcast %cst_349 : f32 to vector<8x64xf32>
    %831 = arith.mulf %830, %829 : vector<8x64xf32>
    %cst_350 = arith.constant 5.000000e-01 : f32
    %832 = vector.broadcast %cst_350 : f32 to vector<8x64xf32>
    %833 = arith.addf %831, %832 : vector<8x64xf32>
    %834 = vector.extract_strided_slice %816 {offsets = [0, 128], sizes = [8, 64], strides = [1, 1]} : vector<8x384xf32> to vector<8x64xf32>
    %835 = vector.extract_strided_slice %823 {offsets = [0, 128], sizes = [8, 64], strides = [1, 1]} : vector<8x384xf32> to vector<8x64xf32>
    %836 = arith.addf %834, %835 : vector<8x64xf32>
    %cst_351 = arith.constant 5.000000e-01 : f32
    %837 = vector.broadcast %cst_351 : f32 to vector<8x64xf32>
    %838 = arith.mulf %837, %836 : vector<8x64xf32>
    %839 = math.tanh %838 : vector<8x64xf32>
    %cst_352 = arith.constant 5.000000e-01 : f32
    %840 = vector.broadcast %cst_352 : f32 to vector<8x64xf32>
    %841 = arith.mulf %840, %839 : vector<8x64xf32>
    %cst_353 = arith.constant 5.000000e-01 : f32
    %842 = vector.broadcast %cst_353 : f32 to vector<8x64xf32>
    %843 = arith.addf %841, %842 : vector<8x64xf32>
    %844 = vector.extract_strided_slice %816 {offsets = [0, 256], sizes = [8, 64], strides = [1, 1]} : vector<8x384xf32> to vector<8x64xf32>
    %845 = vector.extract_strided_slice %823 {offsets = [0, 256], sizes = [8, 64], strides = [1, 1]} : vector<8x384xf32> to vector<8x64xf32>
    %846 = arith.mulf %833, %845 : vector<8x64xf32>
    %847 = arith.addf %844, %846 : vector<8x64xf32>
    %848 = math.tanh %847 : vector<8x64xf32>
    %cst_354 = arith.constant 1.000000e+00 : f32
    %849 = vector.broadcast %cst_354 : f32 to vector<8x64xf32>
    %850 = arith.subf %849, %843 : vector<8x64xf32>
    %851 = arith.mulf %850, %848 : vector<8x64xf32>
    %852 = arith.mulf %843, %755 : vector<8x64xf32>
    %853 = arith.addf %851, %852 : vector<8x64xf32>
    %c0_355 = arith.constant 0 : index
    %c0_356 = arith.constant 0 : index
    %854 = vector.load %arg18[%c0_355, %c0_356] : memref<64x128xf32, #tpu.memory_space<vmem>>, vector<64x128xf32>
    %cst_357 = arith.constant dense<0.000000e+00> : vector<8x128xf32>
    %855 = tpu.matmul %853, %854, %cst_357 {dimension_numbers = #tpu.dot_dimension_numbers<[1], [0], [0], [1], [0, 0, 1, 1], [], []>} : vector<8x64xf32>, vector<64x128xf32>, vector<8x128xf32> -> vector<8x128xf32>
    %c0_358 = arith.constant 0 : index
    %c0_359 = arith.constant 0 : index
    %856 = vector.load %arg19[%c0_358, %c0_359] : memref<1x128xf32, #tpu.memory_space<vmem>>, vector<1x128xf32>
    %857 = vector.broadcast %856 : vector<1x128xf32> to vector<8x128xf32>
    %858 = arith.addf %855, %857 : vector<8x128xf32>
    %859 = arith.addf %858, %761 : vector<8x128xf32>
    %c1_360 = arith.constant 1 : index
    %c0_361 = arith.constant 0 : index
    %c0_362 = arith.constant 0 : index
    %860 = vector.load %arg12[%c1_360, %c0_361, %c0_362] : memref<4x8x128xf32, #tpu.memory_space<vmem>>, vector<1x8x128xf32>
    %861 = vector.shape_cast %860 : vector<1x8x128xf32> to vector<8x128xf32>
    %862 = vector.shape_cast %859 : vector<8x128xf32> to vector<1x8x128xf32>
    tpu.vector_store %arg12[%c1_360, %c0_361, %c0_362], %862 {strides = array<i32>} : memref<4x8x128xf32, #tpu.memory_space<vmem>>, vector<1x8x128xf32>,
    %863 = vector.extract_strided_slice %859 {offsets = [0, 0], sizes = [8, 64], strides = [1, 1]} : vector<8x128xf32> to vector<8x64xf32>
    %c0_363 = arith.constant 0 : index
    %c0_364 = arith.constant 0 : index
    %c0_365 = arith.constant 0 : index
    %864 = vector.load %arg14[%c0_363, %c0_364, %c0_365] : memref<2x64x384xf32, #tpu.memory_space<vmem>>, vector<1x64x384xf32>
    %865 = vector.shape_cast %864 : vector<1x64x384xf32> to vector<64x384xf32>
    %cst_366 = arith.constant dense<0.000000e+00> : vector<8x384xf32>
    %866 = tpu.matmul %863, %865, %cst_366 {dimension_numbers = #tpu.dot_dimension_numbers<[1], [0], [0], [1], [0, 0, 1, 1], [], []>} : vector<8x64xf32>, vector<64x384xf32>, vector<8x384xf32> -> vector<8x384xf32>
    %c0_367 = arith.constant 0 : index
    %c0_368 = arith.constant 0 : index
    %c0_369 = arith.constant 0 : index
    %867 = vector.load %arg16[%c0_367, %c0_368, %c0_369] : memref<2x1x384xf32, #tpu.memory_space<vmem>>, vector<1x1x384xf32>
    %868 = vector.shape_cast %867 : vector<1x1x384xf32> to vector<1x384xf32>
    %869 = vector.broadcast %868 : vector<1x384xf32> to vector<8x384xf32>
    %870 = arith.addf %866, %869 : vector<8x384xf32>
    %c0_370 = arith.constant 0 : index
    %c0_371 = arith.constant 0 : index
    %c0_372 = arith.constant 0 : index
    %871 = vector.load %arg15[%c0_370, %c0_371, %c0_372] : memref<2x64x384xf32, #tpu.memory_space<vmem>>, vector<1x64x384xf32>
    %872 = vector.shape_cast %871 : vector<1x64x384xf32> to vector<64x384xf32>
    %cst_373 = arith.constant dense<0.000000e+00> : vector<8x384xf32>
    %873 = tpu.matmul %809, %872, %cst_373 {dimension_numbers = #tpu.dot_dimension_numbers<[1], [0], [0], [1], [0, 0, 1, 1], [], []>} : vector<8x64xf32>, vector<64x384xf32>, vector<8x384xf32> -> vector<8x384xf32>
    %c0_374 = arith.constant 0 : index
    %c0_375 = arith.constant 0 : index
    %c0_376 = arith.constant 0 : index
    %874 = vector.load %arg17[%c0_374, %c0_375, %c0_376] : memref<2x1x384xf32, #tpu.memory_space<vmem>>, vector<1x1x384xf32>
    %875 = vector.shape_cast %874 : vector<1x1x384xf32> to vector<1x384xf32>
    %876 = vector.broadcast %875 : vector<1x384xf32> to vector<8x384xf32>
    %877 = arith.addf %873, %876 : vector<8x384xf32>
    %878 = vector.extract_strided_slice %870 {offsets = [0, 0], sizes = [8, 64], strides = [1, 1]} : vector<8x384xf32> to vector<8x64xf32>
    %879 = vector.extract_strided_slice %877 {offsets = [0, 0], sizes = [8, 64], strides = [1, 1]} : vector<8x384xf32> to vector<8x64xf32>
    %880 = arith.addf %878, %879 : vector<8x64xf32>
    %cst_377 = arith.constant 5.000000e-01 : f32
    %881 = vector.broadcast %cst_377 : f32 to vector<8x64xf32>
    %882 = arith.mulf %881, %880 : vector<8x64xf32>
    %883 = math.tanh %882 : vector<8x64xf32>
    %cst_378 = arith.constant 5.000000e-01 : f32
    %884 = vector.broadcast %cst_378 : f32 to vector<8x64xf32>
    %885 = arith.mulf %884, %883 : vector<8x64xf32>
    %cst_379 = arith.constant 5.000000e-01 : f32
    %886 = vector.broadcast %cst_379 : f32 to vector<8x64xf32>
    %887 = arith.addf %885, %886 : vector<8x64xf32>
    %888 = vector.extract_strided_slice %870 {offsets = [0, 128], sizes = [8, 64], strides = [1, 1]} : vector<8x384xf32> to vector<8x64xf32>
    %889 = vector.extract_strided_slice %877 {offsets = [0, 128], sizes = [8, 64], strides = [1, 1]} : vector<8x384xf32> to vector<8x64xf32>
    %890 = arith.addf %888, %889 : vector<8x64xf32>
    %cst_380 = arith.constant 5.000000e-01 : f32
    %891 = vector.broadcast %cst_380 : f32 to vector<8x64xf32>
    %892 = arith.mulf %891, %890 : vector<8x64xf32>
    %893 = math.tanh %892 : vector<8x64xf32>
    %cst_381 = arith.constant 5.000000e-01 : f32
    %894 = vector.broadcast %cst_381 : f32 to vector<8x64xf32>
    %895 = arith.mulf %894, %893 : vector<8x64xf32>
    %cst_382 = arith.constant 5.000000e-01 : f32
    %896 = vector.broadcast %cst_382 : f32 to vector<8x64xf32>
    %897 = arith.addf %895, %896 : vector<8x64xf32>
    %898 = vector.extract_strided_slice %870 {offsets = [0, 256], sizes = [8, 64], strides = [1, 1]} : vector<8x384xf32> to vector<8x64xf32>
    %899 = vector.extract_strided_slice %877 {offsets = [0, 256], sizes = [8, 64], strides = [1, 1]} : vector<8x384xf32> to vector<8x64xf32>
    %900 = arith.mulf %887, %899 : vector<8x64xf32>
    %901 = arith.addf %898, %900 : vector<8x64xf32>
    %902 = math.tanh %901 : vector<8x64xf32>
    %cst_383 = arith.constant 1.000000e+00 : f32
    %903 = vector.broadcast %cst_383 : f32 to vector<8x64xf32>
    %904 = arith.subf %903, %897 : vector<8x64xf32>
    %905 = arith.mulf %904, %902 : vector<8x64xf32>
    %906 = arith.mulf %897, %809 : vector<8x64xf32>
    %907 = arith.addf %905, %906 : vector<8x64xf32>
    %c1_384 = arith.constant 1 : index
    %c0_385 = arith.constant 0 : index
    %c0_386 = arith.constant 0 : index
    %908 = vector.load %arg14[%c1_384, %c0_385, %c0_386] : memref<2x64x384xf32, #tpu.memory_space<vmem>>, vector<1x64x384xf32>
    %909 = vector.shape_cast %908 : vector<1x64x384xf32> to vector<64x384xf32>
    %cst_387 = arith.constant dense<0.000000e+00> : vector<8x384xf32>
    %910 = tpu.matmul %907, %909, %cst_387 {dimension_numbers = #tpu.dot_dimension_numbers<[1], [0], [0], [1], [0, 0, 1, 1], [], []>} : vector<8x64xf32>, vector<64x384xf32>, vector<8x384xf32> -> vector<8x384xf32>
    %c1_388 = arith.constant 1 : index
    %c0_389 = arith.constant 0 : index
    %c0_390 = arith.constant 0 : index
    %911 = vector.load %arg16[%c1_388, %c0_389, %c0_390] : memref<2x1x384xf32, #tpu.memory_space<vmem>>, vector<1x1x384xf32>
    %912 = vector.shape_cast %911 : vector<1x1x384xf32> to vector<1x384xf32>
    %913 = vector.broadcast %912 : vector<1x384xf32> to vector<8x384xf32>
    %914 = arith.addf %910, %913 : vector<8x384xf32>
    %c1_391 = arith.constant 1 : index
    %c0_392 = arith.constant 0 : index
    %c0_393 = arith.constant 0 : index
    %915 = vector.load %arg15[%c1_391, %c0_392, %c0_393] : memref<2x64x384xf32, #tpu.memory_space<vmem>>, vector<1x64x384xf32>
    %916 = vector.shape_cast %915 : vector<1x64x384xf32> to vector<64x384xf32>
    %cst_394 = arith.constant dense<0.000000e+00> : vector<8x384xf32>
    %917 = tpu.matmul %853, %916, %cst_394 {dimension_numbers = #tpu.dot_dimension_numbers<[1], [0], [0], [1], [0, 0, 1, 1], [], []>} : vector<8x64xf32>, vector<64x384xf32>, vector<8x384xf32> -> vector<8x384xf32>
    %c1_395 = arith.constant 1 : index
    %c0_396 = arith.constant 0 : index
    %c0_397 = arith.constant 0 : index
    %918 = vector.load %arg17[%c1_395, %c0_396, %c0_397] : memref<2x1x384xf32, #tpu.memory_space<vmem>>, vector<1x1x384xf32>
    %919 = vector.shape_cast %918 : vector<1x1x384xf32> to vector<1x384xf32>
    %920 = vector.broadcast %919 : vector<1x384xf32> to vector<8x384xf32>
    %921 = arith.addf %917, %920 : vector<8x384xf32>
    %922 = vector.extract_strided_slice %914 {offsets = [0, 0], sizes = [8, 64], strides = [1, 1]} : vector<8x384xf32> to vector<8x64xf32>
    %923 = vector.extract_strided_slice %921 {offsets = [0, 0], sizes = [8, 64], strides = [1, 1]} : vector<8x384xf32> to vector<8x64xf32>
    %924 = arith.addf %922, %923 : vector<8x64xf32>
    %cst_398 = arith.constant 5.000000e-01 : f32
    %925 = vector.broadcast %cst_398 : f32 to vector<8x64xf32>
    %926 = arith.mulf %925, %924 : vector<8x64xf32>
    %927 = math.tanh %926 : vector<8x64xf32>
    %cst_399 = arith.constant 5.000000e-01 : f32
    %928 = vector.broadcast %cst_399 : f32 to vector<8x64xf32>
    %929 = arith.mulf %928, %927 : vector<8x64xf32>
    %cst_400 = arith.constant 5.000000e-01 : f32
    %930 = vector.broadcast %cst_400 : f32 to vector<8x64xf32>
    %931 = arith.addf %929, %930 : vector<8x64xf32>
    %932 = vector.extract_strided_slice %914 {offsets = [0, 128], sizes = [8, 64], strides = [1, 1]} : vector<8x384xf32> to vector<8x64xf32>
    %933 = vector.extract_strided_slice %921 {offsets = [0, 128], sizes = [8, 64], strides = [1, 1]} : vector<8x384xf32> to vector<8x64xf32>
    %934 = arith.addf %932, %933 : vector<8x64xf32>
    %cst_401 = arith.constant 5.000000e-01 : f32
    %935 = vector.broadcast %cst_401 : f32 to vector<8x64xf32>
    %936 = arith.mulf %935, %934 : vector<8x64xf32>
    %937 = math.tanh %936 : vector<8x64xf32>
    %cst_402 = arith.constant 5.000000e-01 : f32
    %938 = vector.broadcast %cst_402 : f32 to vector<8x64xf32>
    %939 = arith.mulf %938, %937 : vector<8x64xf32>
    %cst_403 = arith.constant 5.000000e-01 : f32
    %940 = vector.broadcast %cst_403 : f32 to vector<8x64xf32>
    %941 = arith.addf %939, %940 : vector<8x64xf32>
    %942 = vector.extract_strided_slice %914 {offsets = [0, 256], sizes = [8, 64], strides = [1, 1]} : vector<8x384xf32> to vector<8x64xf32>
    %943 = vector.extract_strided_slice %921 {offsets = [0, 256], sizes = [8, 64], strides = [1, 1]} : vector<8x384xf32> to vector<8x64xf32>
    %944 = arith.mulf %931, %943 : vector<8x64xf32>
    %945 = arith.addf %942, %944 : vector<8x64xf32>
    %946 = math.tanh %945 : vector<8x64xf32>
    %cst_404 = arith.constant 1.000000e+00 : f32
    %947 = vector.broadcast %cst_404 : f32 to vector<8x64xf32>
    %948 = arith.subf %947, %941 : vector<8x64xf32>
    %949 = arith.mulf %948, %946 : vector<8x64xf32>
    %950 = arith.mulf %941, %853 : vector<8x64xf32>
    %951 = arith.addf %949, %950 : vector<8x64xf32>
    %c0_405 = arith.constant 0 : index
    %c0_406 = arith.constant 0 : index
    %952 = vector.load %arg18[%c0_405, %c0_406] : memref<64x128xf32, #tpu.memory_space<vmem>>, vector<64x128xf32>
    %cst_407 = arith.constant dense<0.000000e+00> : vector<8x128xf32>
    %953 = tpu.matmul %951, %952, %cst_407 {dimension_numbers = #tpu.dot_dimension_numbers<[1], [0], [0], [1], [0, 0, 1, 1], [], []>} : vector<8x64xf32>, vector<64x128xf32>, vector<8x128xf32> -> vector<8x128xf32>
    %c0_408 = arith.constant 0 : index
    %c0_409 = arith.constant 0 : index
    %954 = vector.load %arg19[%c0_408, %c0_409] : memref<1x128xf32, #tpu.memory_space<vmem>>, vector<1x128xf32>
    %955 = vector.broadcast %954 : vector<1x128xf32> to vector<8x128xf32>
    %956 = arith.addf %953, %955 : vector<8x128xf32>
    %957 = arith.addf %956, %859 : vector<8x128xf32>
    %c2_410 = arith.constant 2 : index
    %c0_411 = arith.constant 0 : index
    %c0_412 = arith.constant 0 : index
    %958 = vector.load %arg12[%c2_410, %c0_411, %c0_412] : memref<4x8x128xf32, #tpu.memory_space<vmem>>, vector<1x8x128xf32>
    %959 = vector.shape_cast %958 : vector<1x8x128xf32> to vector<8x128xf32>
    %960 = vector.shape_cast %957 : vector<8x128xf32> to vector<1x8x128xf32>
    tpu.vector_store %arg12[%c2_410, %c0_411, %c0_412], %960 {strides = array<i32>} : memref<4x8x128xf32, #tpu.memory_space<vmem>>, vector<1x8x128xf32>,
    %961 = vector.extract_strided_slice %957 {offsets = [0, 0], sizes = [8, 64], strides = [1, 1]} : vector<8x128xf32> to vector<8x64xf32>
    %c0_413 = arith.constant 0 : index
    %c0_414 = arith.constant 0 : index
    %c0_415 = arith.constant 0 : index
    %962 = vector.load %arg14[%c0_413, %c0_414, %c0_415] : memref<2x64x384xf32, #tpu.memory_space<vmem>>, vector<1x64x384xf32>
    %963 = vector.shape_cast %962 : vector<1x64x384xf32> to vector<64x384xf32>
    %cst_416 = arith.constant dense<0.000000e+00> : vector<8x384xf32>
    %964 = tpu.matmul %961, %963, %cst_416 {dimension_numbers = #tpu.dot_dimension_numbers<[1], [0], [0], [1], [0, 0, 1, 1], [], []>} : vector<8x64xf32>, vector<64x384xf32>, vector<8x384xf32> -> vector<8x384xf32>
    %c0_417 = arith.constant 0 : index
    %c0_418 = arith.constant 0 : index
    %c0_419 = arith.constant 0 : index
    %965 = vector.load %arg16[%c0_417, %c0_418, %c0_419] : memref<2x1x384xf32, #tpu.memory_space<vmem>>, vector<1x1x384xf32>
    %966 = vector.shape_cast %965 : vector<1x1x384xf32> to vector<1x384xf32>
    %967 = vector.broadcast %966 : vector<1x384xf32> to vector<8x384xf32>
    %968 = arith.addf %964, %967 : vector<8x384xf32>
    %c0_420 = arith.constant 0 : index
    %c0_421 = arith.constant 0 : index
    %c0_422 = arith.constant 0 : index
    %969 = vector.load %arg15[%c0_420, %c0_421, %c0_422] : memref<2x64x384xf32, #tpu.memory_space<vmem>>, vector<1x64x384xf32>
    %970 = vector.shape_cast %969 : vector<1x64x384xf32> to vector<64x384xf32>
    %cst_423 = arith.constant dense<0.000000e+00> : vector<8x384xf32>
    %971 = tpu.matmul %907, %970, %cst_423 {dimension_numbers = #tpu.dot_dimension_numbers<[1], [0], [0], [1], [0, 0, 1, 1], [], []>} : vector<8x64xf32>, vector<64x384xf32>, vector<8x384xf32> -> vector<8x384xf32>
    %c0_424 = arith.constant 0 : index
    %c0_425 = arith.constant 0 : index
    %c0_426 = arith.constant 0 : index
    %972 = vector.load %arg17[%c0_424, %c0_425, %c0_426] : memref<2x1x384xf32, #tpu.memory_space<vmem>>, vector<1x1x384xf32>
    %973 = vector.shape_cast %972 : vector<1x1x384xf32> to vector<1x384xf32>
    %974 = vector.broadcast %973 : vector<1x384xf32> to vector<8x384xf32>
    %975 = arith.addf %971, %974 : vector<8x384xf32>
    %976 = vector.extract_strided_slice %968 {offsets = [0, 0], sizes = [8, 64], strides = [1, 1]} : vector<8x384xf32> to vector<8x64xf32>
    %977 = vector.extract_strided_slice %975 {offsets = [0, 0], sizes = [8, 64], strides = [1, 1]} : vector<8x384xf32> to vector<8x64xf32>
    %978 = arith.addf %976, %977 : vector<8x64xf32>
    %cst_427 = arith.constant 5.000000e-01 : f32
    %979 = vector.broadcast %cst_427 : f32 to vector<8x64xf32>
    %980 = arith.mulf %979, %978 : vector<8x64xf32>
    %981 = math.tanh %980 : vector<8x64xf32>
    %cst_428 = arith.constant 5.000000e-01 : f32
    %982 = vector.broadcast %cst_428 : f32 to vector<8x64xf32>
    %983 = arith.mulf %982, %981 : vector<8x64xf32>
    %cst_429 = arith.constant 5.000000e-01 : f32
    %984 = vector.broadcast %cst_429 : f32 to vector<8x64xf32>
    %985 = arith.addf %983, %984 : vector<8x64xf32>
    %986 = vector.extract_strided_slice %968 {offsets = [0, 128], sizes = [8, 64], strides = [1, 1]} : vector<8x384xf32> to vector<8x64xf32>
    %987 = vector.extract_strided_slice %975 {offsets = [0, 128], sizes = [8, 64], strides = [1, 1]} : vector<8x384xf32> to vector<8x64xf32>
    %988 = arith.addf %986, %987 : vector<8x64xf32>
    %cst_430 = arith.constant 5.000000e-01 : f32
    %989 = vector.broadcast %cst_430 : f32 to vector<8x64xf32>
    %990 = arith.mulf %989, %988 : vector<8x64xf32>
    %991 = math.tanh %990 : vector<8x64xf32>
    %cst_431 = arith.constant 5.000000e-01 : f32
    %992 = vector.broadcast %cst_431 : f32 to vector<8x64xf32>
    %993 = arith.mulf %992, %991 : vector<8x64xf32>
    %cst_432 = arith.constant 5.000000e-01 : f32
    %994 = vector.broadcast %cst_432 : f32 to vector<8x64xf32>
    %995 = arith.addf %993, %994 : vector<8x64xf32>
    %996 = vector.extract_strided_slice %968 {offsets = [0, 256], sizes = [8, 64], strides = [1, 1]} : vector<8x384xf32> to vector<8x64xf32>
    %997 = vector.extract_strided_slice %975 {offsets = [0, 256], sizes = [8, 64], strides = [1, 1]} : vector<8x384xf32> to vector<8x64xf32>
    %998 = arith.mulf %985, %997 : vector<8x64xf32>
    %999 = arith.addf %996, %998 : vector<8x64xf32>
    %1000 = math.tanh %999 : vector<8x64xf32>
    %cst_433 = arith.constant 1.000000e+00 : f32
    %1001 = vector.broadcast %cst_433 : f32 to vector<8x64xf32>
    %1002 = arith.subf %1001, %995 : vector<8x64xf32>
    %1003 = arith.mulf %1002, %1000 : vector<8x64xf32>
    %1004 = arith.mulf %995, %907 : vector<8x64xf32>
    %1005 = arith.addf %1003, %1004 : vector<8x64xf32>
    %c1_434 = arith.constant 1 : index
    %c0_435 = arith.constant 0 : index
    %c0_436 = arith.constant 0 : index
    %1006 = vector.load %arg14[%c1_434, %c0_435, %c0_436] : memref<2x64x384xf32, #tpu.memory_space<vmem>>, vector<1x64x384xf32>
    %1007 = vector.shape_cast %1006 : vector<1x64x384xf32> to vector<64x384xf32>
    %cst_437 = arith.constant dense<0.000000e+00> : vector<8x384xf32>
    %1008 = tpu.matmul %1005, %1007, %cst_437 {dimension_numbers = #tpu.dot_dimension_numbers<[1], [0], [0], [1], [0, 0, 1, 1], [], []>} : vector<8x64xf32>, vector<64x384xf32>, vector<8x384xf32> -> vector<8x384xf32>
    %c1_438 = arith.constant 1 : index
    %c0_439 = arith.constant 0 : index
    %c0_440 = arith.constant 0 : index
    %1009 = vector.load %arg16[%c1_438, %c0_439, %c0_440] : memref<2x1x384xf32, #tpu.memory_space<vmem>>, vector<1x1x384xf32>
    %1010 = vector.shape_cast %1009 : vector<1x1x384xf32> to vector<1x384xf32>
    %1011 = vector.broadcast %1010 : vector<1x384xf32> to vector<8x384xf32>
    %1012 = arith.addf %1008, %1011 : vector<8x384xf32>
    %c1_441 = arith.constant 1 : index
    %c0_442 = arith.constant 0 : index
    %c0_443 = arith.constant 0 : index
    %1013 = vector.load %arg15[%c1_441, %c0_442, %c0_443] : memref<2x64x384xf32, #tpu.memory_space<vmem>>, vector<1x64x384xf32>
    %1014 = vector.shape_cast %1013 : vector<1x64x384xf32> to vector<64x384xf32>
    %cst_444 = arith.constant dense<0.000000e+00> : vector<8x384xf32>
    %1015 = tpu.matmul %951, %1014, %cst_444 {dimension_numbers = #tpu.dot_dimension_numbers<[1], [0], [0], [1], [0, 0, 1, 1], [], []>} : vector<8x64xf32>, vector<64x384xf32>, vector<8x384xf32> -> vector<8x384xf32>
    %c1_445 = arith.constant 1 : index
    %c0_446 = arith.constant 0 : index
    %c0_447 = arith.constant 0 : index
    %1016 = vector.load %arg17[%c1_445, %c0_446, %c0_447] : memref<2x1x384xf32, #tpu.memory_space<vmem>>, vector<1x1x384xf32>
    %1017 = vector.shape_cast %1016 : vector<1x1x384xf32> to vector<1x384xf32>
    %1018 = vector.broadcast %1017 : vector<1x384xf32> to vector<8x384xf32>
    %1019 = arith.addf %1015, %1018 : vector<8x384xf32>
    %1020 = vector.extract_strided_slice %1012 {offsets = [0, 0], sizes = [8, 64], strides = [1, 1]} : vector<8x384xf32> to vector<8x64xf32>
    %1021 = vector.extract_strided_slice %1019 {offsets = [0, 0], sizes = [8, 64], strides = [1, 1]} : vector<8x384xf32> to vector<8x64xf32>
    %1022 = arith.addf %1020, %1021 : vector<8x64xf32>
    %cst_448 = arith.constant 5.000000e-01 : f32
    %1023 = vector.broadcast %cst_448 : f32 to vector<8x64xf32>
    %1024 = arith.mulf %1023, %1022 : vector<8x64xf32>
    %1025 = math.tanh %1024 : vector<8x64xf32>
    %cst_449 = arith.constant 5.000000e-01 : f32
    %1026 = vector.broadcast %cst_449 : f32 to vector<8x64xf32>
    %1027 = arith.mulf %1026, %1025 : vector<8x64xf32>
    %cst_450 = arith.constant 5.000000e-01 : f32
    %1028 = vector.broadcast %cst_450 : f32 to vector<8x64xf32>
    %1029 = arith.addf %1027, %1028 : vector<8x64xf32>
    %1030 = vector.extract_strided_slice %1012 {offsets = [0, 128], sizes = [8, 64], strides = [1, 1]} : vector<8x384xf32> to vector<8x64xf32>
    %1031 = vector.extract_strided_slice %1019 {offsets = [0, 128], sizes = [8, 64], strides = [1, 1]} : vector<8x384xf32> to vector<8x64xf32>
    %1032 = arith.addf %1030, %1031 : vector<8x64xf32>
    %cst_451 = arith.constant 5.000000e-01 : f32
    %1033 = vector.broadcast %cst_451 : f32 to vector<8x64xf32>
    %1034 = arith.mulf %1033, %1032 : vector<8x64xf32>
    %1035 = math.tanh %1034 : vector<8x64xf32>
    %cst_452 = arith.constant 5.000000e-01 : f32
    %1036 = vector.broadcast %cst_452 : f32 to vector<8x64xf32>
    %1037 = arith.mulf %1036, %1035 : vector<8x64xf32>
    %cst_453 = arith.constant 5.000000e-01 : f32
    %1038 = vector.broadcast %cst_453 : f32 to vector<8x64xf32>
    %1039 = arith.addf %1037, %1038 : vector<8x64xf32>
    %1040 = vector.extract_strided_slice %1012 {offsets = [0, 256], sizes = [8, 64], strides = [1, 1]} : vector<8x384xf32> to vector<8x64xf32>
    %1041 = vector.extract_strided_slice %1019 {offsets = [0, 256], sizes = [8, 64], strides = [1, 1]} : vector<8x384xf32> to vector<8x64xf32>
    %1042 = arith.mulf %1029, %1041 : vector<8x64xf32>
    %1043 = arith.addf %1040, %1042 : vector<8x64xf32>
    %1044 = math.tanh %1043 : vector<8x64xf32>
    %cst_454 = arith.constant 1.000000e+00 : f32
    %1045 = vector.broadcast %cst_454 : f32 to vector<8x64xf32>
    %1046 = arith.subf %1045, %1039 : vector<8x64xf32>
    %1047 = arith.mulf %1046, %1044 : vector<8x64xf32>
    %1048 = arith.mulf %1039, %951 : vector<8x64xf32>
    %1049 = arith.addf %1047, %1048 : vector<8x64xf32>
    %c0_455 = arith.constant 0 : index
    %c0_456 = arith.constant 0 : index
    %1050 = vector.load %arg18[%c0_455, %c0_456] : memref<64x128xf32, #tpu.memory_space<vmem>>, vector<64x128xf32>
    %cst_457 = arith.constant dense<0.000000e+00> : vector<8x128xf32>
    %1051 = tpu.matmul %1049, %1050, %cst_457 {dimension_numbers = #tpu.dot_dimension_numbers<[1], [0], [0], [1], [0, 0, 1, 1], [], []>} : vector<8x64xf32>, vector<64x128xf32>, vector<8x128xf32> -> vector<8x128xf32>
    %c0_458 = arith.constant 0 : index
    %c0_459 = arith.constant 0 : index
    %1052 = vector.load %arg19[%c0_458, %c0_459] : memref<1x128xf32, #tpu.memory_space<vmem>>, vector<1x128xf32>
    %1053 = vector.broadcast %1052 : vector<1x128xf32> to vector<8x128xf32>
    %1054 = arith.addf %1051, %1053 : vector<8x128xf32>
    %1055 = arith.addf %1054, %957 : vector<8x128xf32>
    %c3_460 = arith.constant 3 : index
    %c0_461 = arith.constant 0 : index
    %c0_462 = arith.constant 0 : index
    %1056 = vector.load %arg12[%c3_460, %c0_461, %c0_462] : memref<4x8x128xf32, #tpu.memory_space<vmem>>, vector<1x8x128xf32>
    %1057 = vector.shape_cast %1056 : vector<1x8x128xf32> to vector<8x128xf32>
    %1058 = vector.shape_cast %1055 : vector<8x128xf32> to vector<1x8x128xf32>
    tpu.vector_store %arg12[%c3_460, %c0_461, %c0_462], %1058 {strides = array<i32>} : memref<4x8x128xf32, #tpu.memory_space<vmem>>, vector<1x8x128xf32>,
    %cst_463 = arith.constant 0.000000e+00 : f32
    %1059 = vector.broadcast %cst_463 : f32 to vector<8x64xf32>
    %1060 = tpu.concatenate %1005, %1059 in 1 : vector<8x64xf32>, vector<8x64xf32> -> vector<8x128xf32>
    %c0_464 = arith.constant 0 : index
    %c0_465 = arith.constant 0 : index
    %c0_466 = arith.constant 0 : index
    %1061 = vector.load %arg13[%c0_464, %c0_465, %c0_466] : memref<2x8x128xf32, #tpu.memory_space<vmem>>, vector<1x8x128xf32>
    %1062 = vector.shape_cast %1061 : vector<1x8x128xf32> to vector<8x128xf32>
    %1063 = vector.shape_cast %1060 : vector<8x128xf32> to vector<1x8x128xf32>
    tpu.vector_store %arg13[%c0_464, %c0_465, %c0_466], %1063 {strides = array<i32>} : memref<2x8x128xf32, #tpu.memory_space<vmem>>, vector<1x8x128xf32>,
    %1064 = tpu.concatenate %1049, %1059 in 1 : vector<8x64xf32>, vector<8x64xf32> -> vector<8x128xf32>
    %c1_467 = arith.constant 1 : index
    %c0_468 = arith.constant 0 : index
    %c0_469 = arith.constant 0 : index
    %1065 = vector.load %arg13[%c1_467, %c0_468, %c0_469] : memref<2x8x128xf32, #tpu.memory_space<vmem>>, vector<1x8x128xf32>
    %1066 = vector.shape_cast %1065 : vector<1x8x128xf32> to vector<8x128xf32>
    %1067 = vector.shape_cast %1064 : vector<8x128xf32> to vector<1x8x128xf32>
    tpu.vector_store %arg13[%c1_467, %c0_468, %c0_469], %1067 {strides = array<i32>} : memref<2x8x128xf32, #tpu.memory_space<vmem>>, vector<1x8x128xf32>,
    return
  }
}

</mosaic_0001>

<bundles_post_ra>
// kernel: tpu_custom_call.1
= control target key start
LH: loop header
LB: loop body
LE: loop exit
PB: predicated region body
PF: predicated region fallthrough
CT: control target
= control target key end

     0   :  { %19 = vsyncpa [#allocation10], 0  ;;  %s11350_s0 = inlined_call_operand.hbm [shape: f32[8,8,64], index: 0, kind: input, shape index: {}]   ;;  %s11351_s1 = inlined_call_operand.hbm [shape: f32[8,128], index: 1, kind: input, shape index: {}]   ;;  %s11352_s2 = inlined_call_operand.hbm [shape: f32[2,64,384], index: 2, kind: input, shape index: {}]   ;;  %s11353_s3 = inlined_call_operand.hbm [shape: f32[2,64,384], index: 3, kind: input, shape index: {}]   ;;  %s11354_s4 = inlined_call_operand.vmem [shape: f32[2,1,384], index: 4, kind: input, shape index: {}]   ;;  %s11355_s5 = inlined_call_operand.vmem [shape: f32[2,1,384], index: 5, kind: input, shape index: {}]   ;;  %s11356_s6 = inlined_call_operand.hbm [shape: f32[2,64,384], index: 6, kind: input, shape index: {}]   ;;  %s11357_s7 = inlined_call_operand.hbm [shape: f32[2,64,384], index: 7, kind: input, shape index: {}]   ;;  %s11358_s8 = inlined_call_operand.vmem [shape: f32[2,1,384], index: 8, kind: input, shape index: {}]   ;;  %s11359_s9 = inlined_call_operand.vmem [shape: f32[2,1,384], index: 9, kind: input, shape index: {}]   ;;  %s11360_s10 = inlined_call_operand.hbm [shape: f32[64,128], index: 10, kind: input, shape index: {}]   ;;  %s11361_s11 = inlined_call_operand.vmem [shape: f32[1,128], index: 11, kind: input, shape index: {}]   ;;  %s11362_s12 = inlined_call_operand.hbm [shape: f32[4,8,128], index: 12, kind: output, shape index: {0}]   ;;  %s11363_s13 = inlined_call_operand.hbm [shape: f32[2,8,128], index: 13, kind: output, shape index: {1}]  }
   0x1   :  { %20 = vsyncpa [#allocation13], 0 }
   0x2   :  { %21 = vsyncpa [#allocation16], 0 }
   0x3   :  { %22 = vsyncpa [#allocation11], 0 }
   0x4   :  { %23 = vsyncpa [#allocation19], 0  ;;  %s9785_s25 = smov [#allocation12]   ;;  %s9786_s27 = smov [#allocation9]  }
   0x5   :  { %s42_s26 = sshll.u32 %s9785_s25, 4  ;;  %s29_s28 = sshll.u32 %s9786_s27, 4  ;;  %s43_s26 = int_to_ptr.vmem [resolvable:$true] %s42_s26  ;;  %s9871_s28 = int_to_ptr.vmem [resolvable:$true] %s29_s28 }
   0x6   :  { %s9565_s14 = scalar_lea.hbm %s11351_s1, 128 }
   0x7   :  { %p9566_p0 = scmp.ne.s32.totalorder %s11351_s1, %s9565_s14  ;;  %p9569_p1 = scmp.lt.u32.totalorder %s9565_s14, %s11351_s1 }
   0x9   :  { %p9571_p2 = pnand %p9569_p1, %p9566_p0 }
   0xb   :  { %9574 = shalt.err (!%p9571_p2)
}
   0xc   :  { %s9575_s19 = scalar_lea.vmem %s43_s26, 128  ;;  %p9580_p4 = scmp.lt.s32.totalorder %s43_s26, %s43_s26 }
   0xd   :  { %p9576_p3 = scmp.ne.s32.totalorder %s43_s26, %s9575_s19  ;;  %p9581_p5 = scmp.lt.s32.totalorder %s9575_s19, %s9575_s19 }
   0xf   :  { %p9582_p6 = por %p9581_p5, %p9580_p4 }
  0x11   :  { %p9583_p7 = pnand %p9582_p6, %p9576_p3 }
  0x13   :  { %9586 = shalt.err (!%p9583_p7)
}
  0x14   :  { %45 = dma.hbm_to_vmem [thread:$0]  %s11351_s1, 128, %s43_s26, [#allocation13]  }
  0x15   :  { %s9587_s24 = scalar_lea.hbm %s11350_s0, 1024 }
  0x16   :  { %p9588_p8 = scmp.ne.s32.totalorder %s11350_s0, %s9587_s24  ;;  %p9591_p9 = scmp.lt.u32.totalorder %s9587_s24, %s11350_s0 }
  0x18   :  { %p9593_p10 = pnand %p9591_p9, %p9588_p8 }
  0x1a   :  { %9596 = shalt.err (!%p9593_p10)
}
  0x1b   :  { %s9597_s14 = scalar_lea.vmem %s9871_s28, 1024  ;;  %p9602_p12 = scmp.lt.s32.totalorder %s9871_s28, %s9871_s28 }
  0x1c   :  { %p9598_p11 = scmp.ne.s32.totalorder %s9871_s28, %s9597_s14  ;;  %p9603_p13 = scmp.lt.s32.totalorder %s9597_s14, %s9597_s14 }
  0x1e   :  { %p9604_p0 = por %p9603_p13, %p9602_p12 }
  0x20   :  { %p9605_p1 = pnand %p9604_p0, %p9598_p11 }
  0x22   :  { %9608 = shalt.err (!%p9605_p1)
}
  0x23   :  { %s9787_s1 = smov 128   ;;  %s9788_s26 = smov 8  }
  0x24   :  { %35 = dma.hbm_to_vmem [thread:$0]  %s11350_s0, 1024, %s9871_s28, [#allocation10], %s9787_s1, %s9787_s1, %s9788_s26  }
  0x25   :  { %s9789_s17 = smov [#allocation14]   ;;  %s9609_s21 = scalar_lea.hbm %s11352_s2, 6144 }
  0x26   :  { %s51_s18 = sshll.u32 %s9789_s17, 4  ;;  %p9610_p2 = scmp.ne.s32.totalorder %s11352_s2, %s9609_s21  ;;  %s52_s18 = int_to_ptr.vmem [resolvable:$true] %s51_s18 }
  0x27   :  { %p9613_p3 = scmp.lt.u32.totalorder %s9609_s21, %s11352_s2 }
  0x29   :  { %p9615_p4 = pnand %p9613_p3, %p9610_p2 }
  0x2b   :  { %9618 = shalt.err (!%p9615_p4)
}
  0x2c   :  { %s9619_s27 = scalar_lea.vmem %s52_s18, 6144  ;;  %p9624_p6 = scmp.lt.s32.totalorder %s52_s18, %s52_s18 }
  0x2d   :  { %p9620_p5 = scmp.ne.s32.totalorder %s52_s18, %s9619_s27  ;;  %p9625_p7 = scmp.lt.s32.totalorder %s9619_s27, %s9619_s27 }
  0x2f   :  { %p9626_p8 = por %p9625_p7, %p9624_p6 }
  0x31   :  { %p9627_p9 = pnand %p9626_p8, %p9620_p5 }
  0x33   :  { %9630 = shalt.err (!%p9627_p9)
}
  0x34   :  { %s9790_s0 = smov 384   ;;  %s9791_s28 = smov 24  }
  0x35   :  { %57 = dma.hbm_to_vmem [thread:$0]  %s11352_s2, 6144, %s52_s18, [#allocation13], %s9790_s0, %s9790_s0, %s9791_s28  }
  0x36   :  { %s9792_s14 = smov [#allocation15]   ;;  %s9631_s19 = scalar_lea.hbm %s11353_s3, 6144 }
  0x37   :  { %s63_s15 = sshll.u32 %s9792_s14, 4  ;;  %p9632_p10 = scmp.ne.s32.totalorder %s11353_s3, %s9631_s19  ;;  %s64_s15 = int_to_ptr.vmem [resolvable:$true] %s63_s15 }
  0x38   :  { %p9635_p11 = scmp.lt.u32.totalorder %s9631_s19, %s11353_s3 }
  0x3a   :  { %p9637_p12 = pnand %p9635_p11, %p9632_p10 }
  0x3c   :  { %9640 = shalt.err (!%p9637_p12)
}
  0x3d   :  { %s9641_s24 = scalar_lea.vmem %s64_s15, 6144  ;;  %p9646_p0 = scmp.lt.s32.totalorder %s64_s15, %s64_s15 }
  0x3e   :  { %p9642_p13 = scmp.ne.s32.totalorder %s64_s15, %s9641_s24  ;;  %p9647_p1 = scmp.lt.s32.totalorder %s9641_s24, %s9641_s24 }
  0x40   :  { %p9648_p2 = por %p9647_p1, %p9646_p0 }
  0x42   :  { %p9649_p3 = pnand %p9648_p2, %p9642_p13 }
  0x44   :  { %9652 = shalt.err (!%p9649_p3)
}
  0x45   :  { %69 = dma.hbm_to_vmem [thread:$0]  %s11353_s3, 6144, %s64_s15, [#allocation16], %s9790_s0, %s9790_s0, %s9791_s28  }
  0x46   :  { %9763 = dma.done.wait [#allocation10], 1024  }
  0x47   :  { %9764 = vsyncadd [#allocation10], 4294966272 }
  0x48   :  { %9765 = dma.done.wait [#allocation13], 6272  }
  0x49   :  { %9766 = vsyncadd [#allocation13], 4294961024 }
  0x4a   :  { %9767 = dma.done.wait [#allocation16], 6144  }
  0x4b   :  { %9768 = vsyncadd [#allocation16], 4294961152  ;;  %s9793_s25 = smov [#allocation2]   ;;  %s9794_s29 = smov [#allocation3]  }
  0x4c   :  { %s93_s27 = sshll.u32 %s9793_s25, 4  ;;  %s105_s30 = sshll.u32 %s9794_s29, 4  ;;  %s94_s27 = int_to_ptr.vmem [resolvable:$true] %s93_s27  ;;  %s106_s30 = int_to_ptr.vmem [resolvable:$true] %s105_s30 }
  0x4d   :  { %s9653_s17 = scalar_lea.hbm %s11356_s6, 6144 }
  0x4e   :  { %p9654_p4 = scmp.ne.s32.totalorder %s11356_s6, %s9653_s17  ;;  %p9657_p5 = scmp.lt.u32.totalorder %s9653_s17, %s11356_s6 }
  0x50   :  { %p9659_p6 = pnand %p9657_p5, %p9654_p4 }
  0x52   :  { %9662 = shalt.err (!%p9659_p6)  }
  0x53   :  { %s9663_s28 = scalar_lea.vmem %s94_s27, 6144  ;;  %p9668_p8 = scmp.lt.s32.totalorder %s94_s27, %s94_s27 }
  0x54   :  { %p9664_p7 = scmp.ne.s32.totalorder %s94_s27, %s9663_s28  ;;  %p9669_p9 = scmp.lt.s32.totalorder %s9663_s28, %s9663_s28 }
  0x56   :  { %p9670_p10 = por %p9669_p9, %p9668_p8 }
  0x58   :  { %p9671_p11 = pnand %p9670_p10, %p9664_p7 }
  0x5a   :  { %9674 = shalt.err (!%p9671_p11)  }
  0x5b   :  { %96 = dma.hbm_to_vmem [thread:$0]  %s11356_s6, 6144, %s94_s27, [#allocation8] }
  0x5c   :  { %s9675_s24 = scalar_lea.hbm %s11357_s7, 6144 }
  0x5d   :  { %p9676_p12 = scmp.ne.s32.totalorder %s11357_s7, %s9675_s24  ;;  %p9679_p13 = scmp.lt.u32.totalorder %s9675_s24, %s11357_s7 }
  0x5f   :  { %p9681_p0 = pnand %p9679_p13, %p9676_p12 }
  0x61   :  { %9684 = shalt.err (!%p9681_p0)  }
  0x62   :  { %s9685_s14 = scalar_lea.vmem %s106_s30, 6144  ;;  %p9690_p2 = scmp.lt.s32.totalorder %s106_s30, %s106_s30 }
  0x63   :  { %p9686_p1 = scmp.ne.s32.totalorder %s106_s30, %s9685_s14  ;;  %p9691_p3 = scmp.lt.s32.totalorder %s9685_s14, %s9685_s14 }
  0x65   :  { %p9692_p4 = por %p9691_p3, %p9690_p2 }
  0x67   :  { %p9693_p5 = pnand %p9692_p4, %p9686_p1 }
  0x69   :  { %9696 = shalt.err (!%p9693_p5)  }
  0x6a   :  { %108 = dma.hbm_to_vmem [thread:$0]  %s11357_s7, 6144, %s106_s30, [#allocation8 + $0x1]  ;;  %v127_v0 = vld [vmem:[%s11358_s8] sm:$0x3f] }
  0x6b   :  { %128 = vst [vmem:[#allocation4] sm:$0x3f] %v127_v0 }
  0x6c   :  { %153 = vsyncadd [#allocation8 + $0x2], 96  ;;  %v172_v1 = vld [vmem:[%s11359_s9] sm:$0x3f] }
  0x6d   :  { %173 = vst [vmem:[#allocation5] sm:$0x3f] %v172_v1 }
  0x6e   :  { %198 = vsyncadd [#allocation8 + $0x3], 96  ;;  %v229_v2 = vld [vmem:[%s11361_s11] sm:$0x1]  ;;  %s9795_s28 = smov [#allocation6]   ;;  %s9697_s8 = scalar_lea.hbm %s11360_s10, 1024 }
  0x6f   :  { %s207_s15 = sshll.u32 %s9795_s28, 4  ;;  %230 = vst [vmem:[#allocation7] sm:$0x1] %v229_v2  ;;  %p9698_p6 = scmp.ne.s32.totalorder %s11360_s10, %s9697_s8  ;;  %s208_s15 = int_to_ptr.vmem [resolvable:$true] %s207_s15 }
  0x70   :  { %p9701_p7 = scmp.lt.u32.totalorder %s9697_s8, %s11360_s10 }
  0x72   :  { %p9703_p8 = pnand %p9701_p7, %p9698_p6 }
  0x74   :  { %9706 = shalt.err (!%p9703_p8)  }
  0x75   :  { %s9707_s24 = scalar_lea.vmem %s208_s15, 1024  ;;  %p9712_p10 = scmp.lt.s32.totalorder %s208_s15, %s208_s15 }
  0x76   :  { %p9708_p9 = scmp.ne.s32.totalorder %s208_s15, %s9707_s24  ;;  %p9713_p11 = scmp.lt.s32.totalorder %s9707_s24, %s9707_s24 }
  0x78   :  { %p9714_p12 = por %p9713_p11, %p9712_p10 }
  0x7a   :  { %p9715_p13 = pnand %p9714_p12, %p9708_p9 }
  0x7c   :  { %9718 = shalt.err (!%p9715_p13)  }
  0x7d   :  { %210 = dma.hbm_to_vmem [thread:$0]  %s11360_s10, 1024, %s208_s15, [#allocation8 + $0x4] }
  0x7e   :  { %255 = vsyncadd [#allocation8 + $0x5], 16  ;;  %v272_v3 = vld [vmem:[#allocation14 + $0x8] sm:$0xff]  ;;  %v275_v4 = vld [vmem:[#allocation14 + $0x20] sm:$0xff]  ;;  %v11366_v9 = vmov 0.0   ;;  %vm312_vm0 = vcmask 523264  }
  0x7f   :  { %v8253_v5 = vpack.c.bf16 %v275_v4, %v272_v3  ;;  %v271_v6 = vld [vmem:[#allocation14] sm:$0xff]  ;;  %v274_v7 = vld [vmem:[#allocation14 + $0x18] sm:$0xff]  ;;  %401 = vmatprep.mubr.f32.mxu0 %v11366_v9  ;;  %v281_v11 = vld [vmem:[#allocation14 + $0x50] sm:$0xff]  ;;  %vm9798_vm1 = vmmov 0  }
  0x80   :  { %v278_v8 = vld [vmem:[#allocation14 + $0x38] sm:$0xff]  ;;  %v8255_v10 = vpack.c.bf16 %v274_v7, %v271_v6  ;;  %v277_v12 = vld [vmem:[#allocation14 + $0x30] sm:$0xff]  ;;  %v280_v13 = vld [vmem:[#allocation14 + $0x48] sm:$0xff] }
  0x81   :  { %8254 = vmatprep.subr.bf16.mxu0 %v8253_v5  ;;  %v8257_v14 = vpack.c.bf16 %v281_v11, %v278_v8  ;;  %v284_v15 = vld [vmem:[#allocation14 + $0x68] sm:$0xff]  ;;  %v287_v16 = vld [vmem:[#allocation14 + $0x80] sm:$0xff]  ;;  %v8259_v17 = vpack.c.bf16 %v280_v13, %v277_v12  ;;  %v286_v20 = vld [vmem:[#allocation14 + $0x78] sm:$0xff] }
  0x82   :  { %8256 = vmatpush1.bf16.msra.mxu0 %v8255_v10  ;;  %v8261_v18 = vpack.c.bf16 %v287_v16, %v284_v15  ;;  %v283_v19 = vld [vmem:[#allocation14 + $0x60] sm:$0xff]  ;;  %v256_v21 = vld [vmem:[#allocation9] sm:$0xff]  ;;  %v293_v23 = vld [vmem:[#allocation14 + $0xb0] sm:$0xff]  ;;  %v11364_v10 = vmov 0.0|0.0  }
  0x83   :  { %8258 = vmatprep.subr.bf16.mxu0 %v8257_v14  ;;  %v290_v22 = vld [vmem:[#allocation14 + $0x98] sm:$0xff]  ;;  %7529 = vmatprep.mubr.msk.f32.mxu1 %vm312_vm0, %v256_v21  ;;  %v8263_v24 = vpack.c.bf16 %v286_v20, %v283_v19  ;;  %v289_v26 = vld [vmem:[#allocation14 + $0x90] sm:$0xff]  ;;  %v292_v27 = vld [vmem:[#allocation14 + $0xa8] sm:$0xff] }
  0x84   :  { %v8265_v25 = vpack.c.bf16 %v293_v23, %v290_v22  ;;  %v556_v28 = vld [vmem:[#allocation15 + $0x8] sm:$0xff]  ;;  %v559_v29 = vld [vmem:[#allocation15 + $0x20] sm:$0xff]  ;;  %v273_v30 = vld [vmem:[#allocation14 + $0x10] sm:$0xff]  ;;  %v8267_v32 = vpack.c.bf16 %v292_v27, %v289_v26  ;;  %v297_v22 = vlaneseq }
  0x85   :  { %v276_v31 = vld [vmem:[#allocation14 + $0x28] sm:$0xff]  ;;  %v279_v34 = vld [vmem:[#allocation14 + $0x40] sm:$0xff]  ;;  %v282_v35 = vld [vmem:[#allocation14 + $0x58] sm:$0xff]  ;;  %v9976_v36 = vpack.c.bf16 %v559_v29, %v556_v28 }
  0x86   :  { %8260 = vmatpush1.bf16.msra.mxu0 %v8259_v17  ;;  %v8269_v33 = vpack.c.bf16 %v276_v31, %v273_v30  ;;  %v555_v37 = vld [vmem:[#allocation15] sm:$0xff]  ;;  %v558_v38 = vld [vmem:[#allocation15 + $0x18] sm:$0xff]  ;;  %v8273_v40 = vpack.c.bf16 %v282_v35, %v279_v34  ;;  %v565_v41 = vld [vmem:[#allocation15 + $0x50] sm:$0xff]  ;;  %v298_v23 = vshrl.u32 %v297_v22, 7 }
  0x87   :  { %8262 = vmatprep.subr.bf16.mxu0 %v8261_v18  ;;  %v562_v39 = vld [vmem:[#allocation15 + $0x38] sm:$0xff]  ;;  %v285_v42 = vld [vmem:[#allocation14 + $0x70] sm:$0xff]  ;;  %v288_v43 = vld [vmem:[#allocation14 + $0x88] sm:$0xff]  ;;  %v9978_v44 = vpack.c.bf16 %v558_v38, %v555_v37 }
  0x88   :  { %8270 = vmatprep.subr.bf16.mxu1 %v8269_v33  ;;  %v9981_v45 = vpack.c.bf16 %v565_v41, %v562_v39  ;;  %v561_v46 = vld [vmem:[#allocation15 + $0x30] sm:$0xff]  ;;  %v564_v47 = vld [vmem:[#allocation15 + $0x48] sm:$0xff]  ;;  %v8277_v49 = vpack.c.bf16 %v288_v43, %v285_v42  ;;  %v571_v50 = vld [vmem:[#allocation15 + $0x80] sm:$0xff]  ;;  %v10078_v38 = vsub.s32 0, %v298_v23  ;;  %v10085_v42 = vsub.s32 1, %v298_v23 }
  0x89   :  { %8272 = vmatpush3.bf16.msra.mxu1 %v8269_v33  ;;  %v568_v48 = vld [vmem:[#allocation15 + $0x68] sm:$0xff]  ;;  %v291_v51 = vld [vmem:[#allocation14 + $0xa0] sm:$0xff]  ;;  %v294_v52 = vld [vmem:[#allocation14 + $0xb8] sm:$0xff]  ;;  %v9986_v54 = vpack.c.bf16 %v564_v47, %v561_v46 }
  0x8a   :  { %8264 = vmatpush1.bf16.msra.mxu0 %v8263_v24  ;;  %8274 = vmatprep.subr.bf16.mxu1 %v8273_v40  ;;  %v258_v53 = vld [vmem:[#allocation9 + $0x8] sm:$0xff]  ;;  %v9989_v55 = vpack.c.bf16 %v571_v50, %v568_v48  ;;  %v570_v57 = vld [vmem:[#allocation15 + $0x78] sm:$0xff]  ;;  %v8281_v58 = vpack.c.bf16 %v294_v52, %v291_v51  ;;  %v577_v60 = vld [vmem:[#allocation15 + $0xb0] sm:$0xff]  ;;  %v10064_v24 = vsub.s32 2, %v298_v23 }
  0x8b   :  { %8266 = vmatprep.subr.bf16.mxu0 %v8265_v25  ;;  %v567_v56 = vld [vmem:[#allocation15 + $0x60] sm:$0xff]  ;;  %v574_v59 = vld [vmem:[#allocation15 + $0x98] sm:$0xff]  ;;  %v260_v61 = vld [vmem:[#allocation9 + $0x10] sm:$0xff] }
  0x8c   :  { %v9994_v62 = vpack.c.bf16 %v570_v57, %v567_v56  ;;  %v557_v63 = vld [vmem:[#allocation15 + $0x10] sm:$0xff]  ;;  %v560_v0 = vld [vmem:[#allocation15 + $0x28] sm:$0xff]  ;;  %v9997_v1 = vpack.c.bf16 %v577_v60, %v574_v59  ;;  %v563_v7 = vld [vmem:[#allocation15 + $0x40] sm:$0xff] }
  0x8d   :  { %8276 = vmatpush3.bf16.msra.mxu1 %v8273_v40  ;;  %v573_v2 = vld [vmem:[#allocation15 + $0x90] sm:$0xff]  ;;  %v576_v3 = vld [vmem:[#allocation15 + $0xa8] sm:$0xff]  ;;  %v10000_v4 = vpack.c.bf16 %v560_v0, %v557_v63  ;;  %v566_v8 = vld [vmem:[#allocation15 + $0x58] sm:$0xff] }
  0x8e   :  { %8268 = vmatpush1.bf16.msra.mxu0 %v8267_v32  ;;  %8278 = vmatprep.subr.bf16.mxu1 %v8277_v49  ;;  %v262_v5 = vld [vmem:[#allocation9 + $0x18] sm:$0xff]  ;;  %v10004_v6 = vpack.c.bf16 %v576_v3, %v573_v2  ;;  %v10011_v11 = vpack.c.bf16 %v566_v8, %v563_v7  ;;  %v264_v12 = vld [vmem:[#allocation9 + $0x20] sm:$0xff]  ;;  %v572_v14 = vld [vmem:[#allocation15 + $0x88] sm:$0xff] }
  0x8f   :  { %8286 = vmatprep.subr.bf16.mxu0 %v9976_v36  ;;  %v569_v13 = vld [vmem:[#allocation15 + $0x70] sm:$0xff]  ;;  %v266_v16 = vld [vmem:[#allocation9 + $0x28] sm:$0xff]  ;;  %v578_v18 = vld [vmem:[#allocation15 + $0xb8] sm:$0xff] }
  0x90   :  { %v10021_v15 = vpack.c.bf16 %v572_v14, %v569_v13  ;;  %v575_v17 = vld [vmem:[#allocation15 + $0xa0] sm:$0xff]  ;;  %v268_v19 = vld [vmem:[#allocation9 + $0x30] sm:$0xff] }
  0x91   :  { %7049 = vmatmul.mubr.msk.f32.vlgmr.msra.gmra.mrb[0].mxu0 %vm312_vm0, %v256_v21  ;;  %8280 = vmatpush3.bf16.msra.mxu1 %v8277_v49  ;;  %v10029_v20 = vpack.c.bf16 %v578_v18, %v575_v17  ;;  %v270_v21 = vld [vmem:[#allocation9 + $0x38] sm:$0xff]  ;;  %v295_v25 = vld [vmem:[%s11354_s4] sm:$0x7] }
  0x92   :  { %8288 = vmatpush1.bf16.msra.mxu0 %v9978_v44  ;;  %407 = vmatprep.mubr.f32.mxu0 %v11366_v9  ;;  %v308_v26 = vrot.slane %v295_v25, %v10064_v24  ;;  %v579_v40 = vld [vmem:[%s11355_s5] sm:$0x7]  ;;  %v300_v47 = vrot.slane %v295_v25, %v10078_v38  ;;  %v304_v51 = vrot.slane %v295_v25, %v10085_v42 }
  0x93   :  { %8290 = vmatprep.subr.bf16.mxu0 %v9981_v45  ;;  %8282 = vmatprep.subr.bf16.mxu1 %v8281_v58  ;;  %v584_v48 = vrot.slane %v579_v40, %v10078_v38  ;;  %v588_v52 = vrot.slane %v579_v40, %v10085_v42  ;;  %v10102_v2 = vrot.slane %v579_v40, %v10064_v24 }
  0x95   :  { %7050 = vmatmul.mubr.msk.f32.gmra.mrb[2].mxu0 %vm312_vm0, %v258_v53  ;;  %8284 = vmatpush3.bf16.msra.mxu1 %v8281_v58  ;;  %v10095_v56 = vadd.f32 %v584_v48, %v300_v47  ;;  %v10097_v58 = vadd.f32 %v588_v52, %v304_v51 }
  0x96   :  { %413 = vmatprep.mubr.f32.mxu0 %v11366_v9  ;;  %8292 = vmatpush1.bf16.msra.mxu0 %v9986_v54 }
  0x97   :  { %8294 = vmatprep.subr.bf16.mxu0 %v9989_v55  ;;  %8301 = vmatprep.subr.bf16.mxu1 %v11364_v10 }
  0x98   :  { %7530 = vmatmul.mubr.msk.f32.vlgmr.msra.gmra.mrb[0].mxu1 %vm312_vm0, %v258_v53 }
  0x99   :  { %7051 = vmatmul.mubr.msk.f32.gmra.mrb[4].mxu0 %vm312_vm0, %v260_v61  ;;  %8303 = vmatpush3.bf16.msra.mxu1 %v10000_v4 }
  0x9a   :  { %419 = vmatprep.mubr.f32.mxu0 %v11366_v9  ;;  %8296 = vmatpush1.bf16.msra.mxu0 %v9994_v62 }
  0x9b   :  { %8298 = vmatprep.subr.bf16.mxu0 %v9997_v1  ;;  %7532 = vmatprep.mubr.msk.f32.mxu1 %vm312_vm0, %v260_v61 }
  0x9c   :  { %8304 = vmatprep.subr.bf16.mxu1 %v11364_v10  ;;  %7533 = vmatmul.mubr.msk.f32.gmra.mrb[2].mxu1 %vm312_vm0, %v262_v5 }
  0x9d   :  { %7052 = vmatmul.mubr.msk.f32.gmra.mrb[6].mxu0 %vm312_vm0, %v262_v5  ;;  %8306 = vmatpush3.bf16.msra.mxu1 %v10011_v11 }
  0x9e   :  { %425 = vmatprep.mubr.f32.mxu0 %v11366_v9  ;;  %8300 = vmatpush1.bf16.msra.mxu0 %v10004_v6 }
  0x9f   :  { %8314 = vmatprep.subr.bf16.mxu0 %v9976_v36  ;;  %7535 = vmatprep.mubr.msk.f32.mxu1 %vm312_vm0, %v264_v12 }
  0xa0   :  { %8307 = vmatprep.subr.bf16.mxu1 %v11364_v10  ;;  %7536 = vmatmul.mubr.msk.f32.gmra.mrb[4].mxu1 %vm312_vm0, %v266_v16 }
  0xa1   :  { %7053 = vmatmul.mubr.msk.f32.gmra.mrb[8].mxu0 %vm312_vm0, %v264_v12  ;;  %8309 = vmatpush3.bf16.msra.mxu1 %v10021_v15 }
  0xa2   :  { %431 = vmatprep.mubr.f32.mxu0 %v11366_v9  ;;  %7538 = vmatprep.mubr.msk.f32.mxu1 %vm312_vm0, %v268_v19 }
  0xa3   :  { %8310 = vmatprep.subr.bf16.mxu1 %v11364_v10 }
  0xa4   :  { %7539 = vmatmul.mubr.msk.f32.gmra.mrb[6].mxu1 %vm312_vm0, %v270_v21 }
  0xa5   :  { %7054 = vmatmul.mubr.msk.f32.gmra.mrb[10].mxu0 %vm312_vm0, %v266_v16  ;;  %8312 = vmatpush3.bf16.msra.mxu1 %v10029_v20 }
  0xa6   :  { %437 = vmatprep.mubr.f32.mxu0 %v11366_v9  ;;  %7557 = vmatprep.mubr.msk.f32.mxu1 %vm9798_vm1, %v11366_v9 }
  0xa7   :  { %8329 = vmatprep.subr.bf16.mxu1 %v11364_v10 }
  0xa8   :  { %7558 = vmatmul.mubr.f32.vlgmr.msra.gmra.mrb[8].mxu1 %v11366_v9 }
  0xa9   :  { %7055 = vmatmul.mubr.msk.f32.gmra.mrb[12].mxu0 %vm312_vm0, %v268_v19  ;;  %8331 = vmatpush3.bf16.msra.mxu1 %v10000_v4 }
  0xaa   :  { %443 = vmatprep.mubr.f32.mxu0 %v11366_v9  ;;  %8332 = vmatprep.subr.bf16.mxu1 %v11364_v10 }
  0xab   :  { %7576 = vmatprep.mubr.msk.f32.mxu1 %vm9798_vm1, %v11366_v9 }
  0xad   :  { %7056 = vmatmul.mubr.msk.f32.gmra.mrb[14].mxu0 %vm312_vm0, %v270_v21  ;;  %8334 = vmatpush3.bf16.msra.mxu1 %v10011_v11 }
  0xae   :  { %663 = vmatprep.mubr.f32.mxu0 %v11366_v9  ;;  %8335 = vmatprep.subr.bf16.mxu1 %v11364_v10 }
  0xb1   :  { %664 = vmatmul.mubr.f32.vlgmr.msra.gmra.mrb[0].mxu0 %v11366_v9  ;;  %8337 = vmatpush3.bf16.msra.mxu1 %v10021_v15 }
  0xb2   :  { %8316 = vmatpush1.bf16.msra.mxu0 %v9978_v44  ;;  %824 = vmatprep.mubr.f32.mxu0 %v11366_v9 }
  0xb3   :  { %8318 = vmatprep.subr.bf16.mxu0 %v9981_v45  ;;  %8338 = vmatprep.subr.bf16.mxu1 %v11364_v10 }
  0xb5   :  { %8340 = vmatpush3.bf16.msra.mxu1 %v10029_v20 }
  0xb6   :  { %8320 = vmatpush1.bf16.msra.mxu0 %v9986_v54  ;;  %8357 = vmatprep.subr.bf16.mxu1 %v11364_v10 }
  0xb7   :  { %8322 = vmatprep.subr.bf16.mxu0 %v9989_v55 }
  0xba   :  { %8324 = vmatpush1.bf16.msra.mxu0 %v9994_v62 }
  0xbb   :  { %8326 = vmatprep.subr.bf16.mxu0 %v9997_v1 }
  0xbe   :  { %8328 = vmatpush1.bf16.msra.mxu0 %v10004_v6 }
  0xbf   :  { %8342 = vmatprep.subr.bf16.mxu0 %v9976_v36 }
 0x16b   :  { %v7531_v27 = vpop.f32.mrb[0].mxu1 }
 0x16c   :  { %v10070_v28 = vadd.f32 %v7531_v27, %v308_v26  ;;  %v516_v29 = vpop.f32.mrb[1].mxu1 }
 0x16d   :  { %v517_v12 = vadd.f32 %v516_v29, %v308_v26 }
 0x16f   :  { %v7534_v30 = vpop.f32.mrb[2].mxu1 }
 0x170   :  { %v10072_v31 = vadd.f32 %v7534_v30, %v308_v26  ;;  %v526_v32 = vpop.f32.mrb[3].mxu1 }
 0x171   :  { %v10074_v33 = vadd.f32 %v526_v32, %v308_v26 }
 0x173   :  { %v7537_v34 = vpop.f32.mrb[4].mxu1 }
 0x174   :  { %v10076_v35 = vadd.f32 %v7537_v34, %v308_v26  ;;  %v536_v37 = vpop.f32.mrb[5].mxu1 }
 0x175   :  { %v10080_v39 = vadd.f32 %v536_v37, %v308_v26 }
 0x177   :  { %v7540_v41 = vpop.f32.mrb[6].mxu1 }
 0x178   :  { %v10087_v43 = vadd.f32 %v7540_v41, %v308_v26  ;;  %v546_v46 = vpop.f32.mrb[7].mxu1 }
 0x179   :  { %v10091_v49 = vadd.f32 %v546_v46, %v308_v26 }
 0x17b   :  { %v736_v50 = vpop.f32.mrb[8].mxu1 }
 0x17c   :  { %v7559_v53 = vpop.f32.mrb[9].mxu1  ;;  %v737_v7 = vadd.f32 %v736_v50, %v10102_v2 }
 0x184   :  { %v665_v57 = vpop.f32.mrb[0].mxu0 }
 0x185   :  { %v9262_v59 = vadd.f32 %v10095_v56, %v665_v57  ;;  %v667_v60 = vpop.f32.mrb[1].mxu0 }
 0x186   :  { %v9264_v63 = vadd.f32 %v10097_v58, %v667_v60 }
 0x187   :  { %v741_v61 = vmul.f32 0.5, %v9262_v59 }
 0x188   :  { %v746_v0 = vmul.f32 0.5, %v9264_v63 }
 0x189   :  { %9421 = vtanh.f32 %v741_v61 }
 0x18a   :  { %9423 = vtanh.f32 %v746_v0 }
 0x193   :  { %v9422_v3 = vpop.eup %9421 }
 0x194   :  { %v743_v5 = vmul.f32 0.5, %v9422_v3  ;;  %v9424_v14 = vpop.eup %9423 }
 0x195   :  { %v748_v17 = vmul.f32 0.5, %v9424_v14 }
 0x196   :  { %v744_v8 = vadd.f32 0.5, %v743_v5 }
 0x197   :  { %v749_v18 = vadd.f32 0.5, %v748_v17 }
 0x198   :  { %v750_v13 = vmul.f32 %v744_v8, %v737_v7 }
 0x199   :  { %v753_v19 = vsub.f32 1.0, %v749_v18  ;;  %v755_v22 = vmul.f32 0.0, %v749_v18 }
 0x19a   :  { %v751_v16 = vadd.f32 %v750_v13, %v517_v12 }
 0x19c   :  { %9425 = vtanh.f32 %v751_v16 }
 0x1a6   :  { %v9426_v21 = vpop.eup %9425 }
 0x1a7   :  { %v754_v23 = vmul.f32 %v9426_v21, %v753_v19 }
 0x1a9   :  { %v10105_v25 = vadd.f32 %v755_v22, %v754_v23 }
 0x1ab   :  { %7065 = vmatmul.mubr.msk.f32.vlgmr.msra.gmra.mrb[2].mxu0 %vm312_vm0, %v10105_v25  ;;  %7577 = vmatmul.mubr.msk.f32.vlgmr.msra.gmra.mrb[10].mxu1 %vm312_vm0, %v10105_v25 }
 0x1ac   :  { %8344 = vmatpush1.bf16.msra.mxu0 %v9978_v44  ;;  %8359 = vmatpush3.bf16.msra.mxu1 %v10000_v4 }
 0x1ad   :  { %8346 = vmatprep.subr.bf16.mxu0 %v9981_v45  ;;  %8360 = vmatprep.subr.bf16.mxu1 %v11364_v10 }
 0x1ae   :  { %985 = vmatprep.mubr.f32.mxu0 %v11366_v9  ;;  %7595 = vmatprep.mubr.msk.f32.mxu1 %vm9798_vm1, %v11366_v9 }
 0x1b0   :  { %8348 = vmatpush1.bf16.msra.mxu0 %v9986_v54  ;;  %8362 = vmatpush3.bf16.msra.mxu1 %v10011_v11 }
 0x1b1   :  { %8350 = vmatprep.subr.bf16.mxu0 %v9989_v55  ;;  %8363 = vmatprep.subr.bf16.mxu1 %v11364_v10 }
 0x1b4   :  { %8352 = vmatpush1.bf16.msra.mxu0 %v9994_v62  ;;  %8365 = vmatpush3.bf16.msra.mxu1 %v10021_v15 }
 0x1b5   :  { %8354 = vmatprep.subr.bf16.mxu0 %v9997_v1  ;;  %8366 = vmatprep.subr.bf16.mxu1 %v11364_v10 }
 0x1b8   :  { %8356 = vmatpush1.bf16.msra.mxu0 %v10004_v6  ;;  %8368 = vmatpush3.bf16.msra.mxu1 %v10029_v20 }
 0x1b9   :  { %8370 = vmatprep.subr.bf16.mxu0 %v9976_v36  ;;  %8385 = vmatprep.subr.bf16.mxu1 %v11364_v10 }
 0x27e   :  { %v826_v26 = vpop.f32.mrb[2].mxu0  ;;  %v897_v27 = vpop.f32.mrb[10].mxu1 }
 0x27f   :  { %v9266_v29 = vadd.f32 %v10095_v56, %v826_v26  ;;  %v828_v30 = vpop.f32.mrb[3].mxu0  ;;  %v7578_v32 = vpop.f32.mrb[11].mxu1  ;;  %v898_v47 = vadd.f32 %v897_v27, %v10102_v2 }
 0x280   :  { %v9268_v37 = vadd.f32 %v10097_v58, %v828_v30 }
 0x281   :  { %v902_v34 = vmul.f32 0.5, %v9266_v29 }
 0x282   :  { %v907_v40 = vmul.f32 0.5, %v9268_v37 }
 0x283   :  { %9427 = vtanh.f32 %v902_v34 }
 0x284   :  { %9429 = vtanh.f32 %v907_v40 }
 0x28d   :  { %v9428_v41 = vpop.eup %9427 }
 0x28e   :  { %v904_v46 = vmul.f32 0.5, %v9428_v41  ;;  %v9430_v51 = vpop.eup %9429 }
 0x28f   :  { %v909_v53 = vmul.f32 0.5, %v9430_v51 }
 0x290   :  { %v905_v48 = vadd.f32 0.5, %v904_v46 }
 0x291   :  { %v910_v57 = vadd.f32 0.5, %v909_v53 }
 0x292   :  { %v911_v50 = vmul.f32 %v905_v48, %v898_v47 }
 0x293   :  { %v914_v59 = vsub.f32 1.0, %v910_v57  ;;  %v916_v63 = vmul.f32 %v910_v57, %v10105_v25 }
 0x294   :  { %v912_v52 = vadd.f32 %v911_v50, %v10070_v28 }
 0x296   :  { %9431 = vtanh.f32 %v912_v52 }
 0x2a0   :  { %v9432_v60 = vpop.eup %9431 }
 0x2a1   :  { %v915_v61 = vmul.f32 %v9432_v60, %v914_v59 }
 0x2a3   :  { %v10135_v0 = vadd.f32 %v916_v63, %v915_v61 }
 0x2a5   :  { %7067 = vmatmul.mubr.msk.f32.vlgmr.msra.gmra.mrb[4].mxu0 %vm312_vm0, %v10135_v0  ;;  %7596 = vmatmul.mubr.msk.f32.vlgmr.msra.gmra.mrb[12].mxu1 %vm312_vm0, %v10135_v0 }
 0x2a6   :  { %8372 = vmatpush1.bf16.msra.mxu0 %v9978_v44  ;;  %8387 = vmatpush3.bf16.msra.mxu1 %v10000_v4 }
 0x2a7   :  { %8374 = vmatprep.subr.bf16.mxu0 %v9981_v45  ;;  %8388 = vmatprep.subr.bf16.mxu1 %v11364_v10 }
 0x2a8   :  { %1146 = vmatprep.mubr.f32.mxu0 %v11366_v9  ;;  %7614 = vmatprep.mubr.msk.f32.mxu1 %vm9798_vm1, %v11366_v9 }
 0x2aa   :  { %8376 = vmatpush1.bf16.msra.mxu0 %v9986_v54  ;;  %8390 = vmatpush3.bf16.msra.mxu1 %v10011_v11 }
 0x2ab   :  { %8378 = vmatprep.subr.bf16.mxu0 %v9989_v55  ;;  %8391 = vmatprep.subr.bf16.mxu1 %v11364_v10 }
 0x2ae   :  { %8380 = vmatpush1.bf16.msra.mxu0 %v9994_v62  ;;  %8393 = vmatpush3.bf16.msra.mxu1 %v10021_v15 }
 0x2af   :  { %8382 = vmatprep.subr.bf16.mxu0 %v9997_v1  ;;  %8394 = vmatprep.subr.bf16.mxu1 %v11364_v10 }
 0x2b2   :  { %8384 = vmatpush1.bf16.msra.mxu0 %v10004_v6  ;;  %8396 = vmatpush3.bf16.msra.mxu1 %v10029_v20 }
 0x2b3   :  { %8398 = vmatprep.subr.bf16.mxu0 %v9976_v36  ;;  %8413 = vmatprep.subr.bf16.mxu1 %v11364_v10 }
 0x378   :  { %v987_v28 = vpop.f32.mrb[4].mxu0  ;;  %v1058_v3 = vpop.f32.mrb[12].mxu1 }
 0x379   :  { %v9270_v5 = vadd.f32 %v10095_v56, %v987_v28  ;;  %v989_v7 = vpop.f32.mrb[5].mxu0  ;;  %v7597_v8 = vpop.f32.mrb[13].mxu1  ;;  %v1059_v18 = vadd.f32 %v1058_v3, %v10102_v2 }
 0x37a   :  { %v9272_v13 = vadd.f32 %v10097_v58, %v989_v7 }
 0x37b   :  { %v1063_v12 = vmul.f32 0.5, %v9270_v5 }
 0x37c   :  { %v1068_v14 = vmul.f32 0.5, %v9272_v13 }
 0x37d   :  { %9433 = vtanh.f32 %v1063_v12 }
 0x37e   :  { %9435 = vtanh.f32 %v1068_v14 }
 0x387   :  { %v9434_v16 = vpop.eup %9433 }
 0x388   :  { %v1065_v17 = vmul.f32 0.5, %v9434_v16  ;;  %v9436_v22 = vpop.eup %9435 }
 0x389   :  { %v1070_v26 = vmul.f32 0.5, %v9436_v22 }
 0x38a   :  { %v1066_v19 = vadd.f32 0.5, %v1065_v17 }
 0x38b   :  { %v1071_v27 = vadd.f32 0.5, %v1070_v26 }
 0x38c   :  { %v1072_v21 = vmul.f32 %v1066_v19, %v1059_v18 }
 0x38d   :  { %v1075_v29 = vsub.f32 1.0, %v1071_v27  ;;  %v1077_v34 = vmul.f32 %v1071_v27, %v10135_v0 }
 0x38e   :  { %v1073_v23 = vadd.f32 %v1072_v21, %v10074_v33 }
 0x390   :  { %9437 = vtanh.f32 %v1073_v23 }
 0x39a   :  { %v9438_v30 = vpop.eup %9437 }
 0x39b   :  { %v1076_v32 = vmul.f32 %v9438_v30, %v1075_v29 }
 0x39d   :  { %v10165_v37 = vadd.f32 %v1077_v34, %v1076_v32 }
 0x39f   :  { %7069 = vmatmul.mubr.msk.f32.vlgmr.msra.gmra.mrb[6].mxu0 %vm312_vm0, %v10165_v37  ;;  %7615 = vmatmul.mubr.msk.f32.vlgmr.msra.gmra.mrb[14].mxu1 %vm312_vm0, %v10165_v37 }
 0x3a0   :  { %8400 = vmatpush1.bf16.msra.mxu0 %v9978_v44  ;;  %8415 = vmatpush3.bf16.msra.mxu1 %v10000_v4 }
 0x3a1   :  { %8402 = vmatprep.subr.bf16.mxu0 %v9981_v45  ;;  %8416 = vmatprep.subr.bf16.mxu1 %v11364_v10 }
 0x3a2   :  { %1307 = vmatprep.mubr.f32.mxu0 %v11366_v9  ;;  %7633 = vmatprep.mubr.msk.f32.mxu1 %vm9798_vm1, %v11366_v9 }
 0x3a4   :  { %8404 = vmatpush1.bf16.msra.mxu0 %v9986_v54  ;;  %8418 = vmatpush3.bf16.msra.mxu1 %v10011_v11 }
 0x3a5   :  { %8406 = vmatprep.subr.bf16.mxu0 %v9989_v55  ;;  %8419 = vmatprep.subr.bf16.mxu1 %v11364_v10 }
 0x3a8   :  { %8408 = vmatpush1.bf16.msra.mxu0 %v9994_v62  ;;  %8421 = vmatpush3.bf16.msra.mxu1 %v10021_v15 }
 0x3a9   :  { %8410 = vmatprep.subr.bf16.mxu0 %v9997_v1  ;;  %8422 = vmatprep.subr.bf16.mxu1 %v11364_v10 }
 0x3ac   :  { %8412 = vmatpush1.bf16.msra.mxu0 %v10004_v6  ;;  %8424 = vmatpush3.bf16.msra.mxu1 %v10029_v20 }
 0x3ad   :  { %8426 = vmatprep.subr.bf16.mxu0 %v9976_v36  ;;  %8441 = vmatprep.subr.bf16.mxu1 %v11364_v10 }
 0x472   :  { %v1148_v33 = vpop.f32.mrb[6].mxu0  ;;  %v1219_v40 = vpop.f32.mrb[14].mxu1 }
 0x473   :  { %v9274_v41 = vadd.f32 %v10095_v56, %v1148_v33  ;;  %v1150_v46 = vpop.f32.mrb[7].mxu0  ;;  %v7616_v47 = vpop.f32.mrb[15].mxu1  ;;  %v1220_v57 = vadd.f32 %v1219_v40, %v10102_v2 }
 0x474   :  { %v9276_v50 = vadd.f32 %v10097_v58, %v1150_v46 }
 0x475   :  { %v1224_v48 = vmul.f32 0.5, %v9274_v41 }
 0x476   :  { %v1229_v51 = vmul.f32 0.5, %v9276_v50 }
 0x477   :  { %9439 = vtanh.f32 %v1224_v48 }
 0x478   :  { %9441 = vtanh.f32 %v1229_v51 }
 0x481   :  { %v9440_v52 = vpop.eup %9439 }
 0x482   :  { %v1226_v53 = vmul.f32 0.5, %v9440_v52  ;;  %v9442_v61 = vpop.eup %9441 }
 0x483   :  { %v1231_v28 = vmul.f32 0.5, %v9442_v61 }
 0x484   :  { %v1227_v59 = vadd.f32 0.5, %v1226_v53 }
 0x485   :  { %v1232_v3 = vadd.f32 0.5, %v1231_v28 }
 0x486   :  { %v1233_v60 = vmul.f32 %v1227_v59, %v1220_v57 }
 0x487   :  { %v1236_v5 = vsub.f32 1.0, %v1232_v3  ;;  %v1238_v12 = vmul.f32 %v1232_v3, %v10165_v37 }
 0x488   :  { %v1234_v63 = vadd.f32 %v1233_v60, %v10072_v31 }
 0x48a   :  { %9443 = vtanh.f32 %v1234_v63 }
 0x494   :  { %v9444_v7 = vpop.eup %9443 }
 0x495   :  { %v1237_v8 = vmul.f32 %v9444_v7, %v1236_v5 }
 0x497   :  { %v10195_v13 = vadd.f32 %v1238_v12, %v1237_v8 }
 0x499   :  { %7071 = vmatmul.mubr.msk.f32.vlgmr.msra.gmra.mrb[8].mxu0 %vm312_vm0, %v10195_v13  ;;  %7634 = vmatmul.mubr.msk.f32.vlgmr.msra.gmra.mrb[16].mxu1 %vm312_vm0, %v10195_v13 }
 0x49a   :  { %8428 = vmatpush1.bf16.msra.mxu0 %v9978_v44  ;;  %8443 = vmatpush3.bf16.msra.mxu1 %v10000_v4 }
 0x49b   :  { %8430 = vmatprep.subr.bf16.mxu0 %v9981_v45  ;;  %8444 = vmatprep.subr.bf16.mxu1 %v11364_v10 }
 0x49c   :  { %1468 = vmatprep.mubr.f32.mxu0 %v11366_v9  ;;  %7652 = vmatprep.mubr.msk.f32.mxu1 %vm9798_vm1, %v11366_v9 }
 0x49e   :  { %8432 = vmatpush1.bf16.msra.mxu0 %v9986_v54  ;;  %8446 = vmatpush3.bf16.msra.mxu1 %v10011_v11 }
 0x49f   :  { %8434 = vmatprep.subr.bf16.mxu0 %v9989_v55  ;;  %8447 = vmatprep.subr.bf16.mxu1 %v11364_v10 }
 0x4a2   :  { %8436 = vmatpush1.bf16.msra.mxu0 %v9994_v62  ;;  %8449 = vmatpush3.bf16.msra.mxu1 %v10021_v15 }
 0x4a3   :  { %8438 = vmatprep.subr.bf16.mxu0 %v9997_v1  ;;  %8450 = vmatprep.subr.bf16.mxu1 %v11364_v10 }
 0x4a6   :  { %8440 = vmatpush1.bf16.msra.mxu0 %v10004_v6  ;;  %8452 = vmatpush3.bf16.msra.mxu1 %v10029_v20 }
 0x4a7   :  { %8454 = vmatprep.subr.bf16.mxu0 %v9976_v36  ;;  %8469 = vmatprep.subr.bf16.mxu1 %v11364_v10 }
 0x56c   :  { %v1309_v31 = vpop.f32.mrb[8].mxu0  ;;  %v1380_v14 = vpop.f32.mrb[16].mxu1 }
 0x56d   :  { %v9278_v16 = vadd.f32 %v10095_v56, %v1309_v31  ;;  %v1311_v17 = vpop.f32.mrb[9].mxu0  ;;  %v7635_v18 = vpop.f32.mrb[17].mxu1  ;;  %v1381_v27 = vadd.f32 %v1380_v14, %v10102_v2 }
 0x56e   :  { %v9280_v21 = vadd.f32 %v10097_v58, %v1311_v17 }
 0x56f   :  { %v1385_v19 = vmul.f32 0.5, %v9278_v16 }
 0x570   :  { %v1390_v22 = vmul.f32 0.5, %v9280_v21 }
 0x571   :  { %9445 = vtanh.f32 %v1385_v19 }
 0x572   :  { %9447 = vtanh.f32 %v1390_v22 }
 0x57b   :  { %v9446_v23 = vpop.eup %9445 }
 0x57c   :  { %v1387_v26 = vmul.f32 0.5, %v9446_v23  ;;  %v9448_v32 = vpop.eup %9447 }
 0x57d   :  { %v1392_v33 = vmul.f32 0.5, %v9448_v32 }
 0x57e   :  { %v1388_v29 = vadd.f32 0.5, %v1387_v26 }
 0x57f   :  { %v1393_v40 = vadd.f32 0.5, %v1392_v33 }
 0x580   :  { %v1394_v30 = vmul.f32 %v1388_v29, %v1381_v27 }
 0x581   :  { %v1397_v41 = vsub.f32 1.0, %v1393_v40  ;;  %v1399_v48 = vmul.f32 %v1393_v40, %v10195_v13 }
 0x582   :  { %v1395_v34 = vadd.f32 %v1394_v30, %v10080_v39 }
 0x584   :  { %9449 = vtanh.f32 %v1395_v34 }
 0x58e   :  { %v9450_v46 = vpop.eup %9449 }
 0x58f   :  { %v1398_v47 = vmul.f32 %v9450_v46, %v1397_v41  ;;  %v1885_v46 = vld [vmem:[#allocation14 + $0xc0] sm:$0xff] }
 0x591   :  { %v10225_v50 = vadd.f32 %v1399_v48, %v1398_v47  ;;  %v1888_v47 = vld [vmem:[#allocation14 + $0xd8] sm:$0xff] }
 0x593   :  { %7073 = vmatmul.mubr.msk.f32.vlgmr.msra.gmra.mrb[10].mxu0 %vm312_vm0, %v10225_v50  ;;  %7653 = vmatmul.mubr.msk.f32.vlgmr.msra.gmra.mrb[18].mxu1 %vm312_vm0, %v10225_v50 }
 0x594   :  { %8456 = vmatpush1.bf16.msra.mxu0 %v9978_v44  ;;  %8471 = vmatpush3.bf16.msra.mxu1 %v10000_v4 }
 0x595   :  { %8458 = vmatprep.subr.bf16.mxu0 %v9981_v45  ;;  %8472 = vmatprep.subr.bf16.mxu1 %v11364_v10 }
 0x596   :  { %1629 = vmatprep.mubr.f32.mxu0 %v11366_v9  ;;  %7671 = vmatprep.mubr.msk.f32.mxu1 %vm9798_vm1, %v11366_v9 }
 0x598   :  { %8460 = vmatpush1.bf16.msra.mxu0 %v9986_v54  ;;  %8474 = vmatpush3.bf16.msra.mxu1 %v10011_v11 }
 0x599   :  { %8462 = vmatprep.subr.bf16.mxu0 %v9989_v55  ;;  %8475 = vmatprep.subr.bf16.mxu1 %v11364_v10 }
 0x59c   :  { %8464 = vmatpush1.bf16.msra.mxu0 %v9994_v62  ;;  %8477 = vmatpush3.bf16.msra.mxu1 %v10021_v15 }
 0x59d   :  { %8466 = vmatprep.subr.bf16.mxu0 %v9997_v1  ;;  %8478 = vmatprep.subr.bf16.mxu1 %v11364_v10 }
 0x5a0   :  { %8468 = vmatpush1.bf16.msra.mxu0 %v10004_v6  ;;  %8480 = vmatpush3.bf16.msra.mxu1 %v10029_v20 }
 0x5a1   :  { %8482 = vmatprep.subr.bf16.mxu0 %v9976_v36  ;;  %8497 = vmatprep.subr.bf16.mxu1 %v11364_v10 }
 0x666   :  { %v1470_v39 = vpop.f32.mrb[10].mxu0  ;;  %v1541_v51 = vpop.f32.mrb[18].mxu1 }
 0x667   :  { %v9282_v52 = vadd.f32 %v10095_v56, %v1470_v39  ;;  %v1472_v53 = vpop.f32.mrb[11].mxu0  ;;  %v7654_v57 = vpop.f32.mrb[19].mxu1  ;;  %v1542_v3 = vadd.f32 %v1541_v51, %v10102_v2  ;;  %v1892_v39 = vld [vmem:[#allocation14 + $0xf8] sm:$0xff]  ;;  %v1895_v51 = vld [vmem:[#allocation14 + $0x110] sm:$0xff] }
 0x668   :  { %v9284_v60 = vadd.f32 %v10097_v58, %v1472_v53  ;;  %v1893_v57 = vld [vmem:[#allocation14 + $0x100] sm:$0xff] }
 0x669   :  { %v1546_v59 = vmul.f32 0.5, %v9282_v52 }
 0x66a   :  { %v1551_v61 = vmul.f32 0.5, %v9284_v60  ;;  %v8511_v60 = vpack.c.bf16 %v1888_v47, %v1885_v46  ;;  %v2170_v47 = vld [vmem:[#allocation15 + $0x168] sm:$0xff] }
 0x66b   :  { %9451 = vtanh.f32 %v1546_v59  ;;  %v1896_v59 = vld [vmem:[#allocation14 + $0x118] sm:$0xff] }
 0x66c   :  { %9453 = vtanh.f32 %v1551_v61 }
 0x675   :  { %v9452_v63 = vpop.eup %9451 }
 0x676   :  { %v1548_v28 = vmul.f32 0.5, %v9452_v63  ;;  %v9454_v7 = vpop.eup %9453  ;;  %v8513_v63 = vpack.c.bf16 %v1895_v51, %v1892_v39  ;;  %v2151_v39 = vld [vmem:[#allocation15 + $0xd0] sm:$0xff]  ;;  %v2154_v51 = vld [vmem:[#allocation15 + $0xe8] sm:$0xff] }
 0x677   :  { %v1553_v12 = vmul.f32 0.5, %v9454_v7  ;;  %v1899_v7 = vld [vmem:[#allocation14 + $0x130] sm:$0xff] }
 0x678   :  { %v1549_v5 = vadd.f32 0.5, %v1548_v28  ;;  %v1891_v28 = vld [vmem:[#allocation14 + $0xf0] sm:$0xff] }
 0x679   :  { %v1554_v31 = vadd.f32 0.5, %v1553_v12 }
 0x67a   :  { %v1555_v36 = vmul.f32 %v1549_v5, %v1542_v3  ;;  %v1898_v3 = vld [vmem:[#allocation14 + $0x128] sm:$0xff]  ;;  %v8529_v5 = vpack.c.bf16 %v1896_v59, %v1893_v57  ;;  %v2160_v57 = vld [vmem:[#allocation15 + $0x118] sm:$0xff] }
 0x67b   :  { %v1558_v14 = vsub.f32 1.0, %v1554_v31  ;;  %v1560_v18 = vmul.f32 %v1554_v31, %v10225_v50 }
 0x67c   :  { %v1556_v8 = vadd.f32 %v1555_v36, %v10076_v35  ;;  %v1901_v36 = vld [vmem:[#allocation14 + $0x140] sm:$0xff] }
 0x67d   :  { %v8517_v31 = vpack.c.bf16 %v1901_v36, %v1898_v3  ;;  %v2172_v3 = vld [vmem:[#allocation15 + $0x178] sm:$0xff] }
 0x67e   :  { %9455 = vtanh.f32 %v1556_v8  ;;  %v1902_v8 = vld [vmem:[#allocation14 + $0x148] sm:$0xff] }
 0x688   :  { %v9456_v16 = vpop.eup %9455 }
 0x689   :  { %v1559_v17 = vmul.f32 %v9456_v16, %v1558_v14  ;;  %v8533_v14 = vpack.c.bf16 %v1902_v8, %v1899_v7  ;;  %v1897_v16 = vld [vmem:[#allocation14 + $0x120] sm:$0xff] }
 0x68b   :  { %v10255_v19 = vadd.f32 %v1560_v18, %v1559_v17  ;;  %v1900_v17 = vld [vmem:[#allocation14 + $0x138] sm:$0xff] }
 0x68c   :  { %v1904_v18 = vld [vmem:[#allocation14 + $0x158] sm:$0xff] }
 0x68d   :  { %7075 = vmatmul.mubr.msk.f32.vlgmr.msra.gmra.mrb[12].mxu0 %vm312_vm0, %v10255_v19  ;;  %7672 = vmatmul.mubr.msk.f32.vlgmr.msra.gmra.mrb[20].mxu1 %vm312_vm0, %v10255_v19 }
 0x68e   :  { %8484 = vmatpush1.bf16.msra.mxu0 %v9978_v44  ;;  %8499 = vmatpush3.bf16.msra.mxu1 %v10000_v4  ;;  %v1886_v44 = vld [vmem:[#allocation14 + $0xc8] sm:$0xff] }
 0x68f   :  { %8486 = vmatprep.subr.bf16.mxu0 %v9981_v45  ;;  %8500 = vmatprep.subr.bf16.mxu1 %v11364_v10  ;;  %v1889_v45 = vld [vmem:[#allocation14 + $0xe0] sm:$0xff] }
 0x690   :  { %1790 = vmatprep.mubr.f32.mxu0 %v11366_v9  ;;  %7690 = vmatprep.mubr.msk.f32.mxu1 %vm9798_vm1, %v11366_v9  ;;  %v8509_v4 = vpack.c.bf16 %v1889_v45, %v1886_v44  ;;  %v1907_v44 = vld [vmem:[#allocation14 + $0x170] sm:$0xff]  ;;  %v1905_v45 = vld [vmem:[#allocation14 + $0x160] sm:$0xff] }
 0x692   :  { %8488 = vmatpush1.bf16.msra.mxu0 %v9986_v54  ;;  %8502 = vmatpush3.bf16.msra.mxu1 %v10011_v11  ;;  %v1887_v54 = vld [vmem:[#allocation14 + $0xd0] sm:$0xff]  ;;  %v1890_v11 = vld [vmem:[#allocation14 + $0xe8] sm:$0xff] }
 0x693   :  { %8490 = vmatprep.subr.bf16.mxu0 %v9989_v55  ;;  %8503 = vmatprep.subr.bf16.mxu1 %v11364_v10  ;;  %v8525_v55 = vpack.c.bf16 %v1890_v11, %v1887_v54  ;;  %v1908_v54 = vld [vmem:[#allocation14 + $0x178] sm:$0xff]  ;;  %v8521_v11 = vpack.c.bf16 %v1907_v44, %v1904_v18 }
 0x696   :  { %8492 = vmatpush1.bf16.msra.mxu0 %v9994_v62  ;;  %8505 = vmatpush3.bf16.msra.mxu1 %v10021_v15 }
 0x697   :  { %8494 = vmatprep.subr.bf16.mxu0 %v9997_v1  ;;  %8506 = vmatprep.subr.bf16.mxu1 %v11364_v10 }
 0x69a   :  { %8496 = vmatpush1.bf16.msra.mxu0 %v10004_v6  ;;  %8508 = vmatpush3.bf16.msra.mxu1 %v10029_v20 }
 0x69b   :  { %8510 = vmatprep.subr.bf16.mxu1 %v8509_v4  ;;  %8526 = vmatprep.subr.bf16.mxu0 %v8525_v55  ;;  %v8519_v4 = vpack.c.bf16 %v1900_v17, %v1897_v16 }
 0x760   :  { %v1631_v35 = vpop.f32.mrb[12].mxu0  ;;  %v1702_v62 = vpop.f32.mrb[20].mxu1 }
 0x761   :  { %v9286_v15 = vadd.f32 %v10095_v56, %v1631_v35  ;;  %v1633_v21 = vpop.f32.mrb[13].mxu0  ;;  %v7673_v1 = vpop.f32.mrb[21].mxu1  ;;  %v1703_v27 = vadd.f32 %v1702_v62, %v10102_v2  ;;  %v1903_v35 = vld [vmem:[#allocation14 + $0x150] sm:$0xff]  ;;  %v1906_v62 = vld [vmem:[#allocation14 + $0x168] sm:$0xff] }
 0x762   :  { %v9288_v23 = vadd.f32 %v10097_v58, %v1633_v21  ;;  %v2152_v21 = vld [vmem:[#allocation15 + $0xd8] sm:$0xff] }
 0x763   :  { %v1707_v22 = vmul.f32 0.5, %v9286_v15  ;;  %v8523_v15 = vpack.c.bf16 %v1906_v62, %v1903_v35 }
 0x764   :  { %v1712_v6 = vmul.f32 0.5, %v9288_v23  ;;  %v2155_v23 = vld [vmem:[#allocation15 + $0xf0] sm:$0xff] }
 0x765   :  { %9457 = vtanh.f32 %v1707_v22 }
 0x766   :  { %9459 = vtanh.f32 %v1712_v6  ;;  %v2158_v6 = vld [vmem:[#allocation15 + $0x108] sm:$0xff] }
 0x76f   :  { %v9458_v20 = vpop.eup %9457 }
 0x770   :  { %v1709_v26 = vmul.f32 0.5, %v9458_v20  ;;  %v9460_v32 = vpop.eup %9459  ;;  %v10334_v20 = vpack.c.bf16 %v2158_v6, %v2155_v23 }
 0x771   :  { %v1714_v33 = vmul.f32 0.5, %v9460_v32  ;;  %v2164_v32 = vld [vmem:[#allocation15 + $0x138] sm:$0xff] }
 0x772   :  { %v1710_v29 = vadd.f32 0.5, %v1709_v26  ;;  %v2162_v26 = vld [vmem:[#allocation15 + $0x128] sm:$0xff] }
 0x773   :  { %v1715_v40 = vadd.f32 0.5, %v1714_v33  ;;  %v2168_v33 = vld [vmem:[#allocation15 + $0x158] sm:$0xff] }
 0x774   :  { %v1716_v30 = vmul.f32 %v1710_v29, %v1703_v27  ;;  %v2165_v27 = vld [vmem:[#allocation15 + $0x140] sm:$0xff] }
 0x775   :  { %v1719_v41 = vsub.f32 1.0, %v1715_v40  ;;  %v1721_v53 = vmul.f32 %v1715_v40, %v10255_v19  ;;  %v10338_v29 = vpack.c.bf16 %v2165_v27, %v2162_v26  ;;  %v2171_v40 = vld [vmem:[#allocation15 + $0x170] sm:$0xff] }
 0x776   :  { %v1717_v34 = vadd.f32 %v1716_v30, %v10091_v49  ;;  %v1894_v49 = vld [vmem:[#allocation14 + $0x108] sm:$0xff]  ;;  %v2161_v30 = vld [vmem:[#allocation15 + $0x120] sm:$0xff]  ;;  %v10343_v46 = vpack.c.bf16 %v2171_v40, %v2168_v33 }
 0x777   :  { %v8515_v12 = vpack.c.bf16 %v1894_v49, %v1891_v28  ;;  %v2169_v49 = vld [vmem:[#allocation15 + $0x160] sm:$0xff] }
 0x778   :  { %9461 = vtanh.f32 %v1717_v34  ;;  %v10340_v34 = vpack.c.bf16 %v2164_v32, %v2161_v30 }
 0x782   :  { %v9462_v48 = vpop.eup %9461 }
 0x783   :  { %v1720_v52 = vmul.f32 %v9462_v48, %v1719_v41  ;;  %v2167_v41 = vld [vmem:[#allocation15 + $0x150] sm:$0xff] }
 0x784   :  { %v10346_v48 = vpack.c.bf16 %v2170_v47, %v2167_v41 }
 0x785   :  { %v10283_v61 = vadd.f32 %v1721_v53, %v1720_v52  ;;  %v10351_v52 = vpack.c.bf16 %v2154_v51, %v2151_v39  ;;  %v2157_v53 = vld [vmem:[#allocation15 + $0x100] sm:$0xff] }
 0x786   :  { %v10354_v59 = vpack.c.bf16 %v2160_v57, %v2157_v53 }
 0x787   :  { %7077 = vmatmul.mubr.msk.f32.vlgmr.msra.gmra.mrb[14].mxu0 %vm312_vm0, %v10283_v61  ;;  %7691 = vmatmul.mubr.msk.f32.vlgmr.msra.gmra.mrb[22].mxu1 %vm312_vm0, %v10283_v61 }
 0x788   :  { %8512 = vmatpush1.bf16.msra.mxu1 %v8511_v60  ;;  %8528 = vmatpush3.bf16.msra.mxu0 %v8525_v55  ;;  %v8537_v55 = vpack.c.bf16 %v1908_v54, %v1905_v45  ;;  %v2163_v60 = vld [vmem:[#allocation15 + $0x130] sm:$0xff] }
 0x789   :  { %7709 = vmatprep.mubr.msk.f32.mxu0 %vm312_vm0, %v10105_v25  ;;  %8514 = vmatprep.subr.bf16.mxu1 %v8513_v63  ;;  %v2166_v63 = vld [vmem:[#allocation15 + $0x148] sm:$0xff] }
 0x78a   :  { %8530 = vmatprep.subr.bf16.mxu0 %v8529_v5  ;;  %1994 = vmatprep.mubr.f32.mxu1 %v11366_v9  ;;  %v10358_v28 = vpack.c.bf16 %v2166_v63, %v2163_v60 }
 0x78c   :  { %8516 = vmatpush1.bf16.msra.mxu1 %v8515_v12  ;;  %8532 = vmatpush3.bf16.msra.mxu0 %v8529_v5  ;;  %v10362_v5 = vpack.c.bf16 %v2172_v3, %v2169_v49 }
 0x78d   :  { %8518 = vmatprep.subr.bf16.mxu1 %v8517_v31  ;;  %8534 = vmatprep.subr.bf16.mxu0 %v8533_v14 }
 0x790   :  { %8520 = vmatpush1.bf16.msra.mxu1 %v8519_v4  ;;  %8536 = vmatpush3.bf16.msra.mxu0 %v8533_v14 }
 0x791   :  { %8522 = vmatprep.subr.bf16.mxu1 %v8521_v11  ;;  %8538 = vmatprep.subr.bf16.mxu0 %v8537_v55 }
 0x794   :  { %8524 = vmatpush1.bf16.msra.mxu1 %v8523_v15  ;;  %8540 = vmatpush3.bf16.msra.mxu0 %v8537_v55 }
 0x795   :  { %8557 = vmatprep.subr.bf16.mxu0 %v11364_v10 }
 0x797   :  { %7080 = vmatmul.mubr.msk.f32.vlgmr.msra.gmra.mrb[24].mxu1 %vm312_vm0, %v10105_v25  ;;  %7710 = vmatmul.mubr.msk.f32.vlgmr.msra.gmra.mrb[16].mxu0 %vm312_vm0, %v10135_v0  ;;  %v2150_v25 = vld [vmem:[#allocation15 + $0xc8] sm:$0xff] }
 0x798   :  { %7712 = vmatprep.mubr.msk.f32.mxu0 %vm312_vm0, %v10165_v37  ;;  %2000 = vmatprep.mubr.f32.mxu1 %v11366_v9 }
 0x799   :  { %8559 = vmatpush3.bf16.msra.mxu0 %v10351_v52 }
 0x79a   :  { %8560 = vmatprep.subr.bf16.mxu0 %v11364_v10 }
 0x79b   :  { %7081 = vmatmul.mubr.msk.f32.gmra.mrb[26].mxu1 %vm312_vm0, %v10135_v0  ;;  %7713 = vmatmul.mubr.msk.f32.gmra.mrb[18].mxu0 %vm312_vm0, %v10195_v13  ;;  %v2153_v0 = vld [vmem:[#allocation15 + $0xe0] sm:$0xff] }
 0x79c   :  { %7715 = vmatprep.mubr.msk.f32.mxu0 %vm312_vm0, %v10225_v50  ;;  %2006 = vmatprep.mubr.f32.mxu1 %v11366_v9 }
 0x79d   :  { %8562 = vmatpush3.bf16.msra.mxu0 %v10354_v59 }
 0x79e   :  { %8563 = vmatprep.subr.bf16.mxu0 %v11364_v10 }
 0x79f   :  { %7082 = vmatmul.mubr.msk.f32.gmra.mrb[28].mxu1 %vm312_vm0, %v10165_v37  ;;  %7716 = vmatmul.mubr.msk.f32.gmra.mrb[20].mxu0 %vm312_vm0, %v10255_v19  ;;  %v10326_v37 = vpack.c.bf16 %v2153_v0, %v2150_v25 }
 0x7a0   :  { %7718 = vmatprep.mubr.msk.f32.mxu0 %vm312_vm0, %v10283_v61  ;;  %2012 = vmatprep.mubr.f32.mxu1 %v11366_v9 }
 0x7a1   :  { %8542 = vmatprep.subr.bf16.mxu1 %v10326_v37  ;;  %8565 = vmatpush3.bf16.msra.mxu0 %v10358_v28 }
 0x7a2   :  { %8566 = vmatprep.subr.bf16.mxu0 %v11364_v10 }
 0x7a3   :  { %7083 = vmatmul.mubr.msk.f32.gmra.mrb[30].mxu1 %vm312_vm0, %v10195_v13  ;;  %v2149_v13 = vld [vmem:[#allocation15 + $0xc0] sm:$0xff] }
 0x7a4   :  { %2018 = vmatprep.mubr.f32.mxu1 %v11366_v9  ;;  %v10328_v1 = vpack.c.bf16 %v2152_v21, %v2149_v13 }
 0x7a5   :  { %8568 = vmatpush3.bf16.msra.mxu0 %v10362_v5 }
 0x7a6   :  { %8544 = vmatpush1.bf16.msra.mxu1 %v10328_v1  ;;  %8585 = vmatprep.subr.bf16.mxu0 %v11364_v10 }
 0x7a7   :  { %7084 = vmatmul.mubr.msk.f32.gmra.mrb[32].mxu1 %vm312_vm0, %v10225_v50  ;;  %v2156_v50 = vld [vmem:[#allocation15 + $0xf8] sm:$0xff] }
 0x7a8   :  { %2024 = vmatprep.mubr.f32.mxu1 %v11366_v9 }
 0x7ab   :  { %7085 = vmatmul.mubr.msk.f32.gmra.mrb[34].mxu1 %vm312_vm0, %v10255_v19  ;;  %v2159_v19 = vld [vmem:[#allocation15 + $0x110] sm:$0xff] }
 0x7ac   :  { %2030 = vmatprep.mubr.f32.mxu1 %v11366_v9  ;;  %v10332_v22 = vpack.c.bf16 %v2159_v19, %v2156_v50 }
 0x7ae   :  { %8546 = vmatprep.subr.bf16.mxu1 %v10332_v22 }
 0x7af   :  { %7086 = vmatmul.mubr.msk.f32.gmra.mrb[36].mxu1 %vm312_vm0, %v10283_v61 }
 0x7b0   :  { %2036 = vmatprep.mubr.f32.mxu1 %v11366_v9  ;;  %8548 = vmatpush1.bf16.msra.mxu1 %v10334_v20 }
 0x7b1   :  { %8550 = vmatprep.subr.bf16.mxu1 %v10338_v29 }
 0x7b4   :  { %8552 = vmatpush1.bf16.msra.mxu1 %v10340_v34 }
 0x7b5   :  { %8554 = vmatprep.subr.bf16.mxu1 %v10343_v46 }
 0x7b8   :  { %8556 = vmatpush1.bf16.msra.mxu1 %v10346_v48 }
 0x7b9   :  { %8570 = vmatprep.subr.bf16.mxu1 %v10326_v37 }
 0x85a   :  { %v1792_v36 = vpop.f32.mrb[14].mxu0  ;;  %v1863_v7 = vpop.f32.mrb[22].mxu1 }
 0x85b   :  { %v9290_v8 = vadd.f32 %v10095_v56, %v1792_v36  ;;  %v1794_v12 = vpop.f32.mrb[15].mxu0  ;;  %v7692_v31 = vpop.f32.mrb[23].mxu1  ;;  %v1864_v4 = vadd.f32 %v1863_v7, %v10102_v2 }
 0x85c   :  { %v9292_v16 = vadd.f32 %v10097_v58, %v1794_v12 }
 0x85d   :  { %v1868_v14 = vmul.f32 0.5, %v9290_v8 }
 0x85e   :  { %v1873_v17 = vmul.f32 0.5, %v9292_v16 }
 0x85f   :  { %9463 = vtanh.f32 %v1868_v14 }
 0x860   :  { %9465 = vtanh.f32 %v1873_v17 }
 0x869   :  { %v9464_v18 = vpop.eup %9463 }
 0x86a   :  { %v1870_v44 = vmul.f32 0.5, %v9464_v18  ;;  %v10369_v45 = vpop.f32.mrb[16].mxu0  ;;  %v9466_v62 = vpop.eup %9465 }
 0x86b   :  { %v10371_v54 = vpop.f32.mrb[17].mxu0  ;;  %v1875_v25 = vmul.f32 0.5, %v9466_v62 }
 0x86c   :  { %v1871_v11 = vadd.f32 0.5, %v1870_v44 }
 0x86d   :  { %v1876_v13 = vadd.f32 0.5, %v1875_v25 }
 0x86e   :  { %v1877_v55 = vmul.f32 %v1871_v11, %v1864_v4  ;;  %v10374_v35 = vpop.f32.mrb[18].mxu0 }
 0x86f   :  { %v10376_v56 = vpop.f32.mrb[19].mxu0  ;;  %v1880_v21 = vsub.f32 1.0, %v1876_v13  ;;  %v1882_v2 = vmul.f32 %v1876_v13, %v10283_v61  ;;  %v7079_v61 = vld [vmem:[%s11354_s4 + $0x3] sm:$0x7] }
 0x870   :  { %v1878_v58 = vadd.f32 %v1877_v55, %v10087_v43  ;;  %v7096_v43 = vld [vmem:[%s11355_s5 + $0x3] sm:$0x7]  ;;  %v1915_v6 = vrot.slane %v7079_v61, %v10078_v38  ;;  %v1919_v30 = vrot.slane %v7079_v61, %v10085_v42  ;;  %v10438_v7 = vrot.slane %v7079_v61, %v10064_v24 }
 0x871   :  { %v2179_v26 = vrot.slane %v7096_v43, %v10078_v38  ;;  %v2183_v32 = vrot.slane %v7096_v43, %v10085_v42  ;;  %v10435_v3 = vrot.slane %v7096_v43, %v10064_v24 }
 0x872   :  { %9467 = vtanh.f32 %v1878_v58  ;;  %v10379_v15 = vpop.f32.mrb[20].mxu0  ;;  %v2110_v14 = vadd.f32 %v10371_v54, %v10438_v7 }
 0x873   :  { %v10381_v0 = vpop.f32.mrb[21].mxu0  ;;  %v10428_v40 = vadd.f32 %v2179_v26, %v1915_v6  ;;  %v10430_v47 = vadd.f32 %v2183_v32, %v1919_v30 }
 0x87c   :  { %v9468_v50 = vpop.eup %9467 }
 0x87d   :  { %v1881_v19 = vmul.f32 %v9468_v50, %v1880_v21 }
 0x87f   :  { %v10384_v23 = vadd.f32 %v1882_v2, %v1881_v19 }
 0x881   :  { %7087 = vmatmul.mubr.msk.f32.gmra.mrb[38].mxu1 %vm312_vm0, %v10384_v23  ;;  %7719 = vmatmul.mubr.msk.f32.gmra.mrb[22].mxu0 %vm312_vm0, %v10384_v23 }
 0x882   :  { %2255 = vmatprep.mubr.f32.mxu1 %v11366_v9  ;;  %7737 = vmatprep.mubr.msk.f32.mxu0 %vm9798_vm1, %v11366_v9 }
 0x885   :  { %2256 = vmatmul.mubr.f32.vlgmr.msra.gmra.mrb[24].mxu1 %v11366_v9  ;;  %7738 = vmatmul.mubr.f32.vlgmr.msra.gmra.mrb[24].mxu0 %v11366_v9 }
 0x886   :  { %8572 = vmatpush1.bf16.msra.mxu1 %v10328_v1  ;;  %8587 = vmatpush3.bf16.msra.mxu0 %v10351_v52 }
 0x887   :  { %8574 = vmatprep.subr.bf16.mxu1 %v10332_v22  ;;  %8588 = vmatprep.subr.bf16.mxu0 %v11364_v10 }
 0x888   :  { %2416 = vmatprep.mubr.f32.mxu1 %v11366_v9  ;;  %7756 = vmatprep.mubr.msk.f32.mxu0 %vm9798_vm1, %v11366_v9 }
 0x88a   :  { %8576 = vmatpush1.bf16.msra.mxu1 %v10334_v20  ;;  %8590 = vmatpush3.bf16.msra.mxu0 %v10354_v59 }
 0x88b   :  { %8578 = vmatprep.subr.bf16.mxu1 %v10338_v29  ;;  %8591 = vmatprep.subr.bf16.mxu0 %v11364_v10 }
 0x88e   :  { %8580 = vmatpush1.bf16.msra.mxu1 %v10340_v34  ;;  %8593 = vmatpush3.bf16.msra.mxu0 %v10358_v28 }
 0x88f   :  { %8582 = vmatprep.subr.bf16.mxu1 %v10343_v46  ;;  %8594 = vmatprep.subr.bf16.mxu0 %v11364_v10 }
 0x892   :  { %8584 = vmatpush1.bf16.msra.mxu1 %v10346_v48  ;;  %8596 = vmatpush3.bf16.msra.mxu0 %v10362_v5 }
 0x893   :  { %8598 = vmatprep.subr.bf16.mxu1 %v10326_v37  ;;  %8613 = vmatprep.subr.bf16.mxu0 %v11364_v10 }
 0x954   :  { %v10422_v27 = vpop.f32.mrb[22].mxu0 }
 0x955   :  { %v10426_v33 = vpop.f32.mrb[23].mxu0 }
 0x958   :  { %v2257_v41 = vpop.f32.mrb[24].mxu1  ;;  %v2328_v39 = vpop.f32.mrb[24].mxu0 }
 0x959   :  { %v9294_v51 = vadd.f32 %v10428_v40, %v2257_v41  ;;  %v2259_v53 = vpop.f32.mrb[25].mxu1  ;;  %v7739_v57 = vpop.f32.mrb[25].mxu0  ;;  %v2329_v12 = vadd.f32 %v2328_v39, %v10435_v3  ;;  %v2115_v41 = vadd.f32 %v10369_v45, %v10438_v7 }
 0x95a   :  { %v9296_v63 = vadd.f32 %v10430_v47, %v2259_v53 }
 0x95b   :  { %v2333_v60 = vmul.f32 0.5, %v9294_v51 }
 0x95c   :  { %v2338_v49 = vmul.f32 0.5, %v9296_v63 }
 0x95d   :  { %9469 = vtanh.f32 %v2333_v60 }
 0x95e   :  { %9471 = vtanh.f32 %v2338_v49 }
 0x967   :  { %v9470_v36 = vpop.eup %9469 }
 0x968   :  { %v2335_v8 = vmul.f32 0.5, %v9470_v36  ;;  %v9472_v17 = vpop.eup %9471 }
 0x969   :  { %v2340_v44 = vmul.f32 0.5, %v9472_v17 }
 0x96a   :  { %v2336_v31 = vadd.f32 0.5, %v2335_v8 }
 0x96b   :  { %v2341_v4 = vadd.f32 0.5, %v2340_v44 }
 0x96c   :  { %v2342_v16 = vmul.f32 %v2336_v31, %v2329_v12 }
 0x96d   :  { %v2345_v11 = vsub.f32 1.0, %v2341_v4  ;;  %v2347_v62 = vmul.f32 0.0, %v2341_v4 }
 0x96e   :  { %v2343_v18 = vadd.f32 %v2342_v16, %v2110_v14 }
 0x970   :  { %9473 = vtanh.f32 %v2343_v18 }
 0x97a   :  { %v9474_v55 = vpop.eup %9473 }
 0x97b   :  { %v2346_v58 = vmul.f32 %v9474_v55, %v2345_v11 }
 0x97d   :  { %v2348_v25 = vadd.f32 %v2347_v62, %v2346_v58 }
 0x97f   :  { %7097 = vmatmul.mubr.msk.f32.vlgmr.msra.gmra.mrb[26].mxu1 %vm312_vm0, %v2348_v25  ;;  %7757 = vmatmul.mubr.msk.f32.vlgmr.msra.gmra.mrb[26].mxu0 %vm312_vm0, %v2348_v25 }
 0x980   :  { %8600 = vmatpush1.bf16.msra.mxu1 %v10328_v1  ;;  %8615 = vmatpush3.bf16.msra.mxu0 %v10351_v52 }
 0x981   :  { %8602 = vmatprep.subr.bf16.mxu1 %v10332_v22  ;;  %8616 = vmatprep.subr.bf16.mxu0 %v11364_v10 }
 0x982   :  { %2577 = vmatprep.mubr.f32.mxu1 %v11366_v9  ;;  %7775 = vmatprep.mubr.msk.f32.mxu0 %vm9798_vm1, %v11366_v9 }
 0x984   :  { %8604 = vmatpush1.bf16.msra.mxu1 %v10334_v20  ;;  %8618 = vmatpush3.bf16.msra.mxu0 %v10354_v59 }
 0x985   :  { %8606 = vmatprep.subr.bf16.mxu1 %v10338_v29  ;;  %8619 = vmatprep.subr.bf16.mxu0 %v11364_v10 }
 0x988   :  { %8608 = vmatpush1.bf16.msra.mxu1 %v10340_v34  ;;  %8621 = vmatpush3.bf16.msra.mxu0 %v10358_v28 }
 0x989   :  { %8610 = vmatprep.subr.bf16.mxu1 %v10343_v46  ;;  %8622 = vmatprep.subr.bf16.mxu0 %v11364_v10 }
 0x98c   :  { %8612 = vmatpush1.bf16.msra.mxu1 %v10346_v48  ;;  %8624 = vmatpush3.bf16.msra.mxu0 %v10362_v5 }
 0x98d   :  { %8626 = vmatprep.subr.bf16.mxu1 %v10326_v37  ;;  %8641 = vmatprep.subr.bf16.mxu0 %v11364_v10 }
 0xa52   :  { %v2418_v54 = vpop.f32.mrb[26].mxu1  ;;  %v2489_v13 = vpop.f32.mrb[26].mxu0 }
 0xa53   :  { %v9298_v21 = vadd.f32 %v10428_v40, %v2418_v54  ;;  %v2420_v50 = vpop.f32.mrb[27].mxu1  ;;  %v7758_v19 = vpop.f32.mrb[27].mxu0  ;;  %v2490_v30 = vadd.f32 %v2489_v13, %v10435_v3 }
 0xa54   :  { %v9300_v43 = vadd.f32 %v10430_v47, %v2420_v50 }
 0xa55   :  { %v2494_v2 = vmul.f32 0.5, %v9298_v21 }
 0xa56   :  { %v2499_v61 = vmul.f32 0.5, %v9300_v43 }
 0xa57   :  { %9475 = vtanh.f32 %v2494_v2 }
 0xa58   :  { %9477 = vtanh.f32 %v2499_v61 }
 0xa61   :  { %v9476_v6 = vpop.eup %9475 }
 0xa62   :  { %v2496_v26 = vmul.f32 0.5, %v9476_v6  ;;  %v9478_v51 = vpop.eup %9477 }
 0xa63   :  { %v2501_v57 = vmul.f32 0.5, %v9478_v51 }
 0xa64   :  { %v2497_v32 = vadd.f32 0.5, %v2496_v26 }
 0xa65   :  { %v2502_v60 = vadd.f32 0.5, %v2501_v57 }
 0xa66   :  { %v2503_v39 = vmul.f32 %v2497_v32, %v2490_v30 }
 0xa67   :  { %v2506_v63 = vsub.f32 1.0, %v2502_v60  ;;  %v2508_v8 = vmul.f32 %v2502_v60, %v2348_v25  ;;  %v2120_v25 = vadd.f32 %v10376_v56, %v10438_v7 }
 0xa68   :  { %v2504_v53 = vadd.f32 %v2503_v39, %v2115_v41 }
 0xa6a   :  { %9479 = vtanh.f32 %v2504_v53 }
 0xa74   :  { %v9480_v49 = vpop.eup %9479 }
 0xa75   :  { %v2507_v36 = vmul.f32 %v9480_v49, %v2506_v63 }
 0xa77   :  { %v2509_v12 = vadd.f32 %v2508_v8, %v2507_v36  ;;  %v2125_v8 = vadd.f32 %v10374_v35, %v10438_v7 }
 0xa79   :  { %7099 = vmatmul.mubr.msk.f32.vlgmr.msra.gmra.mrb[28].mxu1 %vm312_vm0, %v2509_v12  ;;  %7776 = vmatmul.mubr.msk.f32.vlgmr.msra.gmra.mrb[28].mxu0 %vm312_vm0, %v2509_v12 }
 0xa7a   :  { %8628 = vmatpush1.bf16.msra.mxu1 %v10328_v1  ;;  %8643 = vmatpush3.bf16.msra.mxu0 %v10351_v52 }
 0xa7b   :  { %8630 = vmatprep.subr.bf16.mxu1 %v10332_v22  ;;  %8644 = vmatprep.subr.bf16.mxu0 %v11364_v10 }
 0xa7c   :  { %2738 = vmatprep.mubr.f32.mxu1 %v11366_v9  ;;  %7794 = vmatprep.mubr.msk.f32.mxu0 %vm9798_vm1, %v11366_v9 }
 0xa7e   :  { %8632 = vmatpush1.bf16.msra.mxu1 %v10334_v20  ;;  %8646 = vmatpush3.bf16.msra.mxu0 %v10354_v59 }
 0xa7f   :  { %8634 = vmatprep.subr.bf16.mxu1 %v10338_v29  ;;  %8647 = vmatprep.subr.bf16.mxu0 %v11364_v10 }
 0xa82   :  { %8636 = vmatpush1.bf16.msra.mxu1 %v10340_v34  ;;  %8649 = vmatpush3.bf16.msra.mxu0 %v10358_v28 }
 0xa83   :  { %8638 = vmatprep.subr.bf16.mxu1 %v10343_v46  ;;  %8650 = vmatprep.subr.bf16.mxu0 %v11364_v10 }
 0xa86   :  { %8640 = vmatpush1.bf16.msra.mxu1 %v10346_v48  ;;  %8652 = vmatpush3.bf16.msra.mxu0 %v10362_v5 }
 0xa87   :  { %8654 = vmatprep.subr.bf16.mxu1 %v10326_v37  ;;  %8669 = vmatprep.subr.bf16.mxu0 %v11364_v10 }
 0xb4c   :  { %v2579_v45 = vpop.f32.mrb[28].mxu1  ;;  %v2650_v31 = vpop.f32.mrb[28].mxu0 }
 0xb4d   :  { %v9302_v14 = vadd.f32 %v10428_v40, %v2579_v45  ;;  %v2581_v16 = vpop.f32.mrb[29].mxu1  ;;  %v7777_v17 = vpop.f32.mrb[29].mxu0  ;;  %v2651_v62 = vadd.f32 %v2650_v31, %v10435_v3 }
 0xb4e   :  { %v9304_v44 = vadd.f32 %v10430_v47, %v2581_v16 }
 0xb4f   :  { %v2655_v18 = vmul.f32 0.5, %v9302_v14 }
 0xb50   :  { %v2660_v4 = vmul.f32 0.5, %v9304_v44 }
 0xb51   :  { %9481 = vtanh.f32 %v2655_v18 }
 0xb52   :  { %9483 = vtanh.f32 %v2660_v4 }
 0xb5b   :  { %v9482_v11 = vpop.eup %9481 }
 0xb5c   :  { %v2657_v55 = vmul.f32 0.5, %v9482_v11  ;;  %v9484_v13 = vpop.eup %9483 }
 0xb5d   :  { %v2662_v50 = vmul.f32 0.5, %v9484_v13 }
 0xb5e   :  { %v2658_v58 = vadd.f32 0.5, %v2657_v55 }
 0xb5f   :  { %v2663_v19 = vadd.f32 0.5, %v2662_v50 }
 0xb60   :  { %v2664_v54 = vmul.f32 %v2658_v58, %v2651_v62 }
 0xb61   :  { %v2667_v2 = vsub.f32 1.0, %v2663_v19  ;;  %v2669_v6 = vmul.f32 %v2663_v19, %v2509_v12 }
 0xb62   :  { %v2665_v21 = vadd.f32 %v2664_v54, %v2120_v25 }
 0xb64   :  { %9485 = vtanh.f32 %v2665_v21 }
 0xb6e   :  { %v9486_v43 = vpop.eup %9485 }
 0xb6f   :  { %v2668_v61 = vmul.f32 %v9486_v43, %v2667_v2 }
 0xb71   :  { %v2670_v26 = vadd.f32 %v2669_v6, %v2668_v61  ;;  %v2130_v61 = vadd.f32 %v10381_v0, %v10438_v7 }
 0xb73   :  { %7101 = vmatmul.mubr.msk.f32.vlgmr.msra.gmra.mrb[30].mxu1 %vm312_vm0, %v2670_v26  ;;  %7795 = vmatmul.mubr.msk.f32.vlgmr.msra.gmra.mrb[30].mxu0 %vm312_vm0, %v2670_v26 }
 0xb74   :  { %8656 = vmatpush1.bf16.msra.mxu1 %v10328_v1  ;;  %8671 = vmatpush3.bf16.msra.mxu0 %v10351_v52 }
 0xb75   :  { %8658 = vmatprep.subr.bf16.mxu1 %v10332_v22  ;;  %8672 = vmatprep.subr.bf16.mxu0 %v11364_v10 }
 0xb76   :  { %2899 = vmatprep.mubr.f32.mxu1 %v11366_v9  ;;  %7813 = vmatprep.mubr.msk.f32.mxu0 %vm9798_vm1, %v11366_v9 }
 0xb78   :  { %8660 = vmatpush1.bf16.msra.mxu1 %v10334_v20  ;;  %8674 = vmatpush3.bf16.msra.mxu0 %v10354_v59 }
 0xb79   :  { %8662 = vmatprep.subr.bf16.mxu1 %v10338_v29  ;;  %8675 = vmatprep.subr.bf16.mxu0 %v11364_v10 }
 0xb7c   :  { %8664 = vmatpush1.bf16.msra.mxu1 %v10340_v34  ;;  %8677 = vmatpush3.bf16.msra.mxu0 %v10358_v28 }
 0xb7d   :  { %8666 = vmatprep.subr.bf16.mxu1 %v10343_v46  ;;  %8678 = vmatprep.subr.bf16.mxu0 %v11364_v10 }
 0xb80   :  { %8668 = vmatpush1.bf16.msra.mxu1 %v10346_v48  ;;  %8680 = vmatpush3.bf16.msra.mxu0 %v10362_v5 }
 0xb81   :  { %8682 = vmatprep.subr.bf16.mxu1 %v10326_v37  ;;  %8697 = vmatprep.subr.bf16.mxu0 %v11364_v10 }
 0xc46   :  { %v2740_v56 = vpop.f32.mrb[30].mxu1  ;;  %v2811_v30 = vpop.f32.mrb[30].mxu0 }
 0xc47   :  { %v9306_v32 = vadd.f32 %v10428_v40, %v2740_v56  ;;  %v2742_v41 = vpop.f32.mrb[31].mxu1  ;;  %v7796_v39 = vpop.f32.mrb[31].mxu0  ;;  %v2812_v49 = vadd.f32 %v2811_v30, %v10435_v3 }
 0xc48   :  { %v9308_v53 = vadd.f32 %v10430_v47, %v2742_v41 }
 0xc49   :  { %v2816_v51 = vmul.f32 0.5, %v9306_v32 }
 0xc4a   :  { %v2821_v57 = vmul.f32 0.5, %v9308_v53 }
 0xc4b   :  { %9487 = vtanh.f32 %v2816_v51 }
 0xc4c   :  { %9489 = vtanh.f32 %v2821_v57 }
 0xc55   :  { %v9488_v60 = vpop.eup %9487 }
 0xc56   :  { %v2818_v63 = vmul.f32 0.5, %v9488_v60  ;;  %v9490_v45 = vpop.eup %9489 }
 0xc57   :  { %v2823_v14 = vmul.f32 0.5, %v9490_v45 }
 0xc58   :  { %v2819_v36 = vadd.f32 0.5, %v2818_v63 }
 0xc59   :  { %v2824_v16 = vadd.f32 0.5, %v2823_v14 }
 0xc5a   :  { %v2825_v12 = vmul.f32 %v2819_v36, %v2812_v49 }
 0xc5b   :  { %v2828_v17 = vsub.f32 1.0, %v2824_v16  ;;  %v2830_v4 = vmul.f32 %v2824_v16, %v2670_v26 }
 0xc5c   :  { %v2826_v31 = vadd.f32 %v2825_v12, %v2125_v8 }
 0xc5e   :  { %9491 = vtanh.f32 %v2826_v31 }
 0xc68   :  { %v9492_v18 = vpop.eup %9491 }
 0xc69   :  { %v2829_v44 = vmul.f32 %v9492_v18, %v2828_v17 }
 0xc6b   :  { %v2831_v11 = vadd.f32 %v2830_v4, %v2829_v44 }
 0xc6d   :  { %7103 = vmatmul.mubr.msk.f32.vlgmr.msra.gmra.mrb[32].mxu1 %vm312_vm0, %v2831_v11  ;;  %7814 = vmatmul.mubr.msk.f32.vlgmr.msra.gmra.mrb[32].mxu0 %vm312_vm0, %v2831_v11 }
 0xc6e   :  { %8684 = vmatpush1.bf16.msra.mxu1 %v10328_v1  ;;  %8699 = vmatpush3.bf16.msra.mxu0 %v10351_v52 }
 0xc6f   :  { %8686 = vmatprep.subr.bf16.mxu1 %v10332_v22  ;;  %8700 = vmatprep.subr.bf16.mxu0 %v11364_v10 }
 0xc70   :  { %3060 = vmatprep.mubr.f32.mxu1 %v11366_v9  ;;  %7832 = vmatprep.mubr.msk.f32.mxu0 %vm9798_vm1, %v11366_v9 }
 0xc72   :  { %8688 = vmatpush1.bf16.msra.mxu1 %v10334_v20  ;;  %8702 = vmatpush3.bf16.msra.mxu0 %v10354_v59 }
 0xc73   :  { %8690 = vmatprep.subr.bf16.mxu1 %v10338_v29  ;;  %8703 = vmatprep.subr.bf16.mxu0 %v11364_v10 }
 0xc76   :  { %8692 = vmatpush1.bf16.msra.mxu1 %v10340_v34  ;;  %8705 = vmatpush3.bf16.msra.mxu0 %v10358_v28 }
 0xc77   :  { %8694 = vmatprep.subr.bf16.mxu1 %v10343_v46  ;;  %8706 = vmatprep.subr.bf16.mxu0 %v11364_v10 }
 0xc7a   :  { %8696 = vmatpush1.bf16.msra.mxu1 %v10346_v48  ;;  %8708 = vmatpush3.bf16.msra.mxu0 %v10362_v5 }
 0xc7b   :  { %8710 = vmatprep.subr.bf16.mxu1 %v10326_v37  ;;  %8725 = vmatprep.subr.bf16.mxu0 %v11364_v10 }
 0xd40   :  { %v2901_v35 = vpop.f32.mrb[32].mxu1  ;;  %v2972_v55 = vpop.f32.mrb[32].mxu0 }
 0xd41   :  { %v9310_v62 = vadd.f32 %v10428_v40, %v2901_v35  ;;  %v2903_v58 = vpop.f32.mrb[33].mxu1  ;;  %v7815_v25 = vpop.f32.mrb[33].mxu0  ;;  %v2973_v2 = vadd.f32 %v2972_v55, %v10435_v3 }
 0xd42   :  { %v9312_v13 = vadd.f32 %v10430_v47, %v2903_v58 }
 0xd43   :  { %v2977_v54 = vmul.f32 0.5, %v9310_v62 }
 0xd44   :  { %v2982_v21 = vmul.f32 0.5, %v9312_v13 }
 0xd45   :  { %9493 = vtanh.f32 %v2977_v54 }
 0xd46   :  { %9495 = vtanh.f32 %v2982_v21 }
 0xd4f   :  { %v9494_v50 = vpop.eup %9493 }
 0xd50   :  { %v2979_v19 = vmul.f32 0.5, %v9494_v50  ;;  %v9496_v26 = vpop.eup %9495 }
 0xd51   :  { %v2984_v30 = vmul.f32 0.5, %v9496_v26 }
 0xd52   :  { %v2980_v43 = vadd.f32 0.5, %v2979_v19 }
 0xd53   :  { %v2985_v32 = vadd.f32 0.5, %v2984_v30 }
 0xd54   :  { %v2986_v6 = vmul.f32 %v2980_v43, %v2973_v2 }
 0xd55   :  { %v2989_v41 = vsub.f32 1.0, %v2985_v32  ;;  %v2991_v53 = vmul.f32 %v2985_v32, %v2831_v11 }
 0xd56   :  { %v2987_v56 = vadd.f32 %v2986_v6, %v2130_v61 }
 0xd58   :  { %9497 = vtanh.f32 %v2987_v56 }
 0xd62   :  { %v9498_v39 = vpop.eup %9497 }
 0xd63   :  { %v2990_v51 = vmul.f32 %v9498_v39, %v2989_v41 }
 0xd65   :  { %v2992_v57 = vadd.f32 %v2991_v53, %v2990_v51 }
 0xd67   :  { %7105 = vmatmul.mubr.msk.f32.vlgmr.msra.gmra.mrb[34].mxu1 %vm312_vm0, %v2992_v57  ;;  %7833 = vmatmul.mubr.msk.f32.vlgmr.msra.gmra.mrb[34].mxu0 %vm312_vm0, %v2992_v57 }
 0xd68   :  { %8712 = vmatpush1.bf16.msra.mxu1 %v10328_v1  ;;  %8727 = vmatpush3.bf16.msra.mxu0 %v10351_v52 }
 0xd69   :  { %8714 = vmatprep.subr.bf16.mxu1 %v10332_v22  ;;  %8728 = vmatprep.subr.bf16.mxu0 %v11364_v10 }
 0xd6a   :  { %3221 = vmatprep.mubr.f32.mxu1 %v11366_v9  ;;  %7851 = vmatprep.mubr.msk.f32.mxu0 %vm9798_vm1, %v11366_v9 }
 0xd6c   :  { %8716 = vmatpush1.bf16.msra.mxu1 %v10334_v20  ;;  %8730 = vmatpush3.bf16.msra.mxu0 %v10354_v59 }
 0xd6d   :  { %8718 = vmatprep.subr.bf16.mxu1 %v10338_v29  ;;  %8731 = vmatprep.subr.bf16.mxu0 %v11364_v10 }
 0xd70   :  { %8720 = vmatpush1.bf16.msra.mxu1 %v10340_v34  ;;  %8733 = vmatpush3.bf16.msra.mxu0 %v10358_v28 }
 0xd71   :  { %8722 = vmatprep.subr.bf16.mxu1 %v10343_v46  ;;  %8734 = vmatprep.subr.bf16.mxu0 %v11364_v10 }
 0xd74   :  { %8724 = vmatpush1.bf16.msra.mxu1 %v10346_v48  ;;  %8736 = vmatpush3.bf16.msra.mxu0 %v10362_v5 }
 0xd75   :  { %8738 = vmatprep.subr.bf16.mxu1 %v10326_v37  ;;  %8753 = vmatprep.subr.bf16.mxu0 %v11364_v10  ;;  %v2135_v37 = vadd.f32 %v10379_v15, %v10438_v7 }
 0xe3a   :  { %v3062_v0 = vpop.f32.mrb[34].mxu1  ;;  %v3133_v60 = vpop.f32.mrb[34].mxu0 }
 0xe3b   :  { %v9314_v63 = vadd.f32 %v10428_v40, %v3062_v0  ;;  %v3064_v49 = vpop.f32.mrb[35].mxu1  ;;  %v7834_v36 = vpop.f32.mrb[35].mxu0  ;;  %v3134_v16 = vadd.f32 %v3133_v60, %v10435_v3 }
 0xe3c   :  { %v9316_v12 = vadd.f32 %v10430_v47, %v3064_v49 }
 0xe3d   :  { %v3138_v8 = vmul.f32 0.5, %v9314_v63 }
 0xe3e   :  { %v3143_v45 = vmul.f32 0.5, %v9316_v12 }
 0xe3f   :  { %9499 = vtanh.f32 %v3138_v8  ;;  %v2145_v8 = vadd.f32 %v10422_v27, %v10438_v7 }
 0xe40   :  { %9501 = vtanh.f32 %v3143_v45 }
 0xe49   :  { %v9500_v31 = vpop.eup %9499 }
 0xe4a   :  { %v3140_v14 = vmul.f32 0.5, %v9500_v31  ;;  %v9502_v44 = vpop.eup %9501 }
 0xe4b   :  { %v3145_v11 = vmul.f32 0.5, %v9502_v44 }
 0xe4c   :  { %v3141_v17 = vadd.f32 0.5, %v3140_v14 }
 0xe4d   :  { %v3146_v35 = vadd.f32 0.5, %v3145_v11 }
 0xe4e   :  { %v3147_v18 = vmul.f32 %v3141_v17, %v3134_v16 }
 0xe4f   :  { %v3150_v55 = vsub.f32 1.0, %v3146_v35  ;;  %v3152_v25 = vmul.f32 %v3146_v35, %v2992_v57 }
 0xe50   :  { %v3148_v4 = vadd.f32 %v3147_v18, %v2135_v37 }
 0xe52   :  { %9503 = vtanh.f32 %v3148_v4 }
 0xe5c   :  { %v9504_v62 = vpop.eup %9503 }
 0xe5d   :  { %v3151_v58 = vmul.f32 %v9504_v62, %v3150_v55 }
 0xe5f   :  { %v3153_v54 = vadd.f32 %v3152_v25, %v3151_v58 }
 0xe61   :  { %7107 = vmatmul.mubr.msk.f32.vlgmr.msra.gmra.mrb[36].mxu1 %vm312_vm0, %v3153_v54  ;;  %7852 = vmatmul.mubr.msk.f32.vlgmr.msra.gmra.mrb[36].mxu0 %vm312_vm0, %v3153_v54 }
 0xe62   :  { %8740 = vmatpush1.bf16.msra.mxu1 %v10328_v1  ;;  %8755 = vmatpush3.bf16.msra.mxu0 %v10351_v52 }
 0xe63   :  { %8742 = vmatprep.subr.bf16.mxu1 %v10332_v22  ;;  %8756 = vmatprep.subr.bf16.mxu0 %v11364_v10 }
 0xe64   :  { %3382 = vmatprep.mubr.f32.mxu1 %v11366_v9  ;;  %7870 = vmatprep.mubr.msk.f32.mxu0 %vm9798_vm1, %v11366_v9 }
 0xe66   :  { %8744 = vmatpush1.bf16.msra.mxu1 %v10334_v20  ;;  %8758 = vmatpush3.bf16.msra.mxu0 %v10354_v59 }
 0xe67   :  { %8746 = vmatprep.subr.bf16.mxu1 %v10338_v29  ;;  %8759 = vmatprep.subr.bf16.mxu0 %v11364_v10 }
 0xe6a   :  { %8748 = vmatpush1.bf16.msra.mxu1 %v10340_v34  ;;  %8761 = vmatpush3.bf16.msra.mxu0 %v10358_v28 }
 0xe6b   :  { %8750 = vmatprep.subr.bf16.mxu1 %v10343_v46  ;;  %8762 = vmatprep.subr.bf16.mxu0 %v11364_v10 }
 0xe6e   :  { %8752 = vmatpush1.bf16.msra.mxu1 %v10346_v48  ;;  %8764 = vmatpush3.bf16.msra.mxu0 %v10362_v5  ;;  %v2140_v48 = vadd.f32 %v10426_v33, %v10438_v7 }
 0xf34   :  { %v3223_v1 = vpop.f32.mrb[36].mxu1  ;;  %v3294_v22 = vpop.f32.mrb[36].mxu0 }
 0xf35   :  { %v9318_v20 = vadd.f32 %v10428_v40, %v3223_v1  ;;  %v3225_v52 = vpop.f32.mrb[37].mxu1  ;;  %v7853_v29 = vpop.f32.mrb[37].mxu0  ;;  %v3295_v13 = vadd.f32 %v3294_v22, %v10435_v3 }
 0xf36   :  { %v9320_v15 = vadd.f32 %v10430_v47, %v3225_v52 }
 0xf37   :  { %v3299_v59 = vmul.f32 0.5, %v9318_v20 }
 0xf38   :  { %v3304_v34 = vmul.f32 0.5, %v9320_v15 }
 0xf39   :  { %9505 = vtanh.f32 %v3299_v59 }
 0xf3a   :  { %9507 = vtanh.f32 %v3304_v34 }
 0xf43   :  { %v9506_v28 = vpop.eup %9505 }
 0xf44   :  { %v3301_v46 = vmul.f32 0.5, %v9506_v28  ;;  %v9508_v50 = vpop.eup %9507 }
 0xf45   :  { %v3306_v2 = vmul.f32 0.5, %v9508_v50 }
 0xf46   :  { %v3302_v21 = vadd.f32 0.5, %v3301_v46 }
 0xf47   :  { %v3307_v43 = vadd.f32 0.5, %v3306_v2 }
 0xf48   :  { %v3308_v5 = vmul.f32 %v3302_v21, %v3295_v13 }
 0xf49   :  { %v3311_v61 = vsub.f32 1.0, %v3307_v43  ;;  %v3313_v56 = vmul.f32 %v3307_v43, %v3153_v54 }
 0xf4a   :  { %v3309_v19 = vadd.f32 %v3308_v5, %v2140_v48 }
 0xf4c   :  { %9509 = vtanh.f32 %v3309_v19 }
 0xf56   :  { %v9510_v6 = vpop.eup %9509 }
 0xf57   :  { %v3312_v26 = vmul.f32 %v9510_v6, %v3311_v61 }
 0xf59   :  { %v3314_v30 = vadd.f32 %v3313_v56, %v3312_v26 }
 0xf5b   :  { %7109 = vmatmul.mubr.msk.f32.vlgmr.msra.gmra.mrb[38].mxu1 %vm312_vm0, %v3314_v30  ;;  %7871 = vmatmul.mubr.msk.f32.vlgmr.msra.gmra.mrb[38].mxu0 %vm312_vm0, %v3314_v30 }
0x102e   :  { %v3384_v32 = vpop.f32.mrb[38].mxu1  ;;  %v3455_v41 = vpop.f32.mrb[38].mxu0 }
0x102f   :  { %v9322_v39 = vadd.f32 %v10428_v40, %v3384_v32  ;;  %v3386_v33 = vpop.f32.mrb[39].mxu1  ;;  %v7872_v51 = vpop.f32.mrb[39].mxu0  ;;  %v3456_v49 = vadd.f32 %v3455_v41, %v10435_v3 }
0x1030   :  { %v9324_v57 = vadd.f32 %v10430_v47, %v3386_v33 }
0x1031   :  { %v3460_v53 = vmul.f32 0.5, %v9322_v39 }
0x1032   :  { %v3465_v0 = vmul.f32 0.5, %v9324_v57 }
0x1033   :  { %9511 = vtanh.f32 %v3460_v53 }
0x1034   :  { %9513 = vtanh.f32 %v3465_v0 }
0x103d   :  { %v9512_v60 = vpop.eup %9511 }
0x103e   :  { %v3462_v63 = vmul.f32 0.5, %v9512_v60  ;;  %v9514_v45 = vpop.eup %9513 }
0x103f   :  { %v3467_v40 = vmul.f32 0.5, %v9514_v45 }
0x1040   :  { %v3463_v36 = vadd.f32 0.5, %v3462_v63 }
0x1041   :  { %v3468_v14 = vadd.f32 0.5, %v3467_v40 }
0x1042   :  { %v3469_v12 = vmul.f32 %v3463_v36, %v3456_v49 }
0x1043   :  { %v3472_v16 = vsub.f32 1.0, %v3468_v14  ;;  %v3474_v37 = vmul.f32 %v3468_v14, %v3314_v30 }
0x1044   :  { %v3470_v31 = vadd.f32 %v3469_v12, %v2145_v8 }
0x1046   :  { %9515 = vtanh.f32 %v3470_v31 }
0x1050   :  { %v9516_v17 = vpop.eup %9515 }
0x1051   :  { %v3473_v47 = vmul.f32 %v9516_v17, %v3472_v16 }
0x1053   :  { %v10604_v18 = vadd.f32 %v3474_v37, %v3473_v47 }
0x1054   :  { %9769 = dma.done.wait [#allocation8], 6144 }
0x1055   :  { %9770 = vsyncadd [#allocation8], 4294961152 }
0x1056   :  { %9771 = dma.done.wait [#allocation8 + $0x1], 6144 }
0x1057   :  { %9772 = vsyncadd [#allocation8 + $0x1], 4294961152 }
0x1058   :  { %9773 = dma.done.wait [#allocation8 + $0x2], 96 }
0x1059   :  { %9774 = vsyncadd [#allocation8 + $0x2], 4294967200 }
0x105a   :  { %9775 = dma.done.wait [#allocation8 + $0x3], 96 }
0x105b   :  { %9776 = vsyncadd [#allocation8 + $0x3], 4294967200 }
0x105c   :  { %9777 = dma.done.wait [#allocation8 + $0x4], 1024 }
0x105d   :  { %9778 = vsyncadd [#allocation8 + $0x4], 4294966272 }
0x105e   :  { %9779 = dma.done.wait [#allocation8 + $0x5], 16 }
0x105f   :  { %9780 = vsyncadd [#allocation8 + $0x5], 4294967280  ;;  %3604 = vmatprep.mubr.f32.mxu0 %v11366_v9  ;;  %8781 = vmatprep.subr.bf16.mxu1 %v11364_v10  ;;  %v3497_v27 = vld [vmem:[#allocation2 + $0x8] sm:$0xff]  ;;  %v3500_v3 = vld [vmem:[#allocation2 + $0x20] sm:$0xff]  ;;  %s9799_s4 = smov [#allocation18]  }
0x1060   :  { %7889 = vmatprep.mubr.msk.f32.mxu1 %vm9798_vm1, %v11366_v9  ;;  %v3496_v7 = vld [vmem:[#allocation2] sm:$0xff]  ;;  %v10610_v44 = vpack.c.bf16 %v3500_v3, %v3497_v27  ;;  %v3499_v4 = vld [vmem:[#allocation2 + $0x18] sm:$0xff]  ;;  %v3506_v35 = vld [vmem:[#allocation2 + $0x50] sm:$0xff]  ;;  %s6960_s5 = sshll.u32 %s9799_s4, 4  ;;  %s6961_s5 = int_to_ptr.vmem [resolvable:$true] %s6960_s5 }
0x1061   :  { %v3503_v11 = vld [vmem:[#allocation2 + $0x38] sm:$0xff]  ;;  %v10612_v55 = vpack.c.bf16 %v3499_v4, %v3496_v7  ;;  %v3502_v58 = vld [vmem:[#allocation2 + $0x30] sm:$0xff]  ;;  %v3505_v25 = vld [vmem:[#allocation2 + $0x48] sm:$0xff]  ;;  %s9719_s17 = scalar_lea.vmem %s6961_s5, 256  ;;  %p9724_p1 = scmp.lt.s32.totalorder %s6961_s5, %s6961_s5 }
0x1062   :  { %v10614_v62 = vpack.c.bf16 %v3506_v35, %v3503_v11  ;;  %v3509_v54 = vld [vmem:[#allocation2 + $0x68] sm:$0xff]  ;;  %8766 = vmatprep.subr.bf16.mxu0 %v10610_v44  ;;  %v3512_v1 = vld [vmem:[#allocation2 + $0x80] sm:$0xff]  ;;  %v10618_v22 = vpack.c.bf16 %v3505_v25, %v3502_v58  ;;  %v3511_v29 = vld [vmem:[#allocation2 + $0x78] sm:$0xff]  ;;  %p9720_p0 = scmp.ne.s32.totalorder %s6961_s5, %s9719_s17  ;;  %p9725_p2 = scmp.lt.s32.totalorder %s9719_s17, %s9719_s17 }
0x1063   :  { %8768 = vmatpush1.bf16.msra.mxu0 %v10612_v55  ;;  %v10621_v20 = vpack.c.bf16 %v3512_v1, %v3509_v54  ;;  %v3508_v52 = vld [vmem:[#allocation2 + $0x60] sm:$0xff]  ;;  %v3515_v59 = vld [vmem:[#allocation2 + $0x98] sm:$0xff]  ;;  %v3518_v15 = vld [vmem:[#allocation2 + $0xb0] sm:$0xff] }
0x1064   :  { %8770 = vmatprep.subr.bf16.mxu0 %v10614_v62  ;;  %v3498_v34 = vld [vmem:[#allocation2 + $0x10] sm:$0xff]  ;;  %v3501_v28 = vld [vmem:[#allocation2 + $0x28] sm:$0xff]  ;;  %v10626_v13 = vpack.c.bf16 %v3511_v29, %v3508_v52  ;;  %v3504_v21 = vld [vmem:[#allocation2 + $0x40] sm:$0xff]  ;;  %v10629_v5 = vpack.c.bf16 %v3518_v15, %v3515_v59  ;;  %p9726_p3 = por %p9725_p2, %p9724_p1 }
0x1065   :  { %v10623_v46 = vpack.c.bf16 %v3501_v28, %v3498_v34  ;;  %v3507_v48 = vld [vmem:[#allocation2 + $0x58] sm:$0xff]  ;;  %v3514_v50 = vld [vmem:[#allocation2 + $0x90] sm:$0xff]  ;;  %v3517_v19 = vld [vmem:[#allocation2 + $0xa8] sm:$0xff] }
0x1066   :  { %v3682_v2 = vld [vmem:[#allocation3 + $0x8] sm:$0xff]  ;;  %v10632_v43 = vpack.c.bf16 %v3507_v48, %v3504_v21  ;;  %v3685_v61 = vld [vmem:[#allocation3 + $0x20] sm:$0xff]  ;;  %v3510_v6 = vld [vmem:[#allocation2 + $0x70] sm:$0xff]  ;;  %v10636_v56 = vpack.c.bf16 %v3517_v19, %v3514_v50  ;;  %p9727_p4 = pnand %p9726_p3, %p9720_p0 }
0x1067   :  { %8772 = vmatpush1.bf16.msra.mxu0 %v10618_v22  ;;  %8783 = vmatpush3.bf16.msra.mxu1 %v10623_v46  ;;  %v3513_v26 = vld [vmem:[#allocation2 + $0x88] sm:$0xff]  ;;  %v10639_v30 = vpack.c.bf16 %v3685_v61, %v3682_v2  ;;  %v3681_v32 = vld [vmem:[#allocation3] sm:$0xff]  ;;  %v3684_v41 = vld [vmem:[#allocation3 + $0x18] sm:$0xff] }
0x1068   :  { %8774 = vmatprep.subr.bf16.mxu0 %v10621_v20  ;;  %8784 = vmatprep.subr.bf16.mxu1 %v11364_v10  ;;  %v3688_v39 = vld [vmem:[#allocation3 + $0x38] sm:$0xff]  ;;  %v10642_v33 = vpack.c.bf16 %v3513_v26, %v3510_v6  ;;  %v3691_v51 = vld [vmem:[#allocation3 + $0x50] sm:$0xff]  ;;  %v3516_v53 = vld [vmem:[#allocation2 + $0xa0] sm:$0xff]  ;;  %v10648_v60 = vpack.c.bf16 %v3684_v41, %v3681_v32 }
0x1069   :  { %v3519_v57 = vld [vmem:[#allocation2 + $0xb8] sm:$0xff]  ;;  %v10646_v0 = vld [vmem:[#allocation12] sm:$0xff]  ;;  %v10651_v63 = vpack.c.bf16 %v3691_v51, %v3688_v39  ;;  %v3697_v45 = vld [vmem:[#allocation3 + $0x80] sm:$0xff] }
0x106a   :  { %v3687_v49 = vld [vmem:[#allocation3 + $0x30] sm:$0xff]  ;;  %v3690_v36 = vld [vmem:[#allocation3 + $0x48] sm:$0xff]  ;;  %v10654_v12 = vpack.c.bf16 %v3519_v57, %v3516_v53  ;;  %v3693_v17 = vld [vmem:[#allocation3 + $0x60] sm:$0xff] }
0x106b   :  { %8776 = vmatpush1.bf16.msra.mxu0 %v10626_v13  ;;  %8786 = vmatpush3.bf16.msra.mxu1 %v10632_v43  ;;  %v3694_v8 = vld [vmem:[#allocation3 + $0x68] sm:$0xff]  ;;  %v3683_v31 = vld [vmem:[#allocation3 + $0x10] sm:$0xff]  ;;  %v10660_v14 = vpack.c.bf16 %v3690_v36, %v3687_v49  ;;  %v3696_v47 = vld [vmem:[#allocation3 + $0x78] sm:$0xff] }
0x106c   :  { %8778 = vmatprep.subr.bf16.mxu0 %v10629_v5  ;;  %8787 = vmatprep.subr.bf16.mxu1 %v11364_v10  ;;  %v3686_v40 = vld [vmem:[#allocation3 + $0x28] sm:$0xff]  ;;  %v10664_v16 = vpack.c.bf16 %v3697_v45, %v3694_v8  ;;  %v3700_v37 = vld [vmem:[#allocation3 + $0x98] sm:$0xff]  ;;  %v3703_v3 = vld [vmem:[#allocation3 + $0xb0] sm:$0xff]  ;;  %v10671_v11 = vpack.c.bf16 %v3696_v47, %v3693_v17 }
0x106d   :  { %v10667_v27 = vpack.c.bf16 %v3686_v40, %v3683_v31  ;;  %v3689_v7 = vld [vmem:[#allocation3 + $0x40] sm:$0xff]  ;;  %v3692_v4 = vld [vmem:[#allocation3 + $0x58] sm:$0xff]  ;;  %v10676_v35 = vpack.c.bf16 %v3703_v3, %v3700_v37  ;;  %v3699_v58 = vld [vmem:[#allocation3 + $0x90] sm:$0xff] }
0x106e   :  { %v3702_v25 = vld [vmem:[#allocation3 + $0xa8] sm:$0xff]  ;;  %v10679_v54 = vpack.c.bf16 %v3692_v4, %v3689_v7  ;;  %v3695_v1 = vld [vmem:[#allocation3 + $0x70] sm:$0xff]  ;;  %v3701_v15 = vld [vmem:[#allocation3 + $0xa0] sm:$0xff] }
0x106f   :  { %8780 = vmatpush1.bf16.msra.mxu0 %v10636_v56  ;;  %8789 = vmatpush3.bf16.msra.mxu1 %v10642_v33  ;;  %v3698_v52 = vld [vmem:[#allocation3 + $0x88] sm:$0xff]  ;;  %v10685_v29 = vpack.c.bf16 %v3702_v25, %v3699_v58  ;;  %v3704_v34 = vld [vmem:[#allocation3 + $0xb8] sm:$0xff]  ;;  %v3885_v48 = vld [vmem:[#allocation2 + $0xe0] sm:$0xff] }
0x1070   :  { %8794 = vmatprep.subr.bf16.mxu0 %v10639_v30  ;;  %8790 = vmatprep.subr.bf16.mxu1 %v11364_v10  ;;  %v10689_v59 = vpack.c.bf16 %v3698_v52, %v3695_v1  ;;  %v10694_v28 = vpack.c.bf16 %v3704_v34, %v3701_v15  ;;  %v3882_v21 = vld [vmem:[#allocation2 + $0xc8] sm:$0xff]  ;;  %v3881_v19 = vld [vmem:[#allocation2 + $0xc0] sm:$0xff]  ;;  %v3884_v2 = vld [vmem:[#allocation2 + $0xd8] sm:$0xff] }
0x1071   :  { %v10706_v50 = vpack.c.bf16 %v3885_v48, %v3882_v21  ;;  %v10708_v61 = vpack.c.bf16 %v3884_v2, %v3881_v19  ;;  %v3883_v6 = vld [vmem:[#allocation2 + $0xd0] sm:$0xff]  ;;  %v3886_v26 = vld [vmem:[#allocation2 + $0xe8] sm:$0xff]  ;;  %v3888_v41 = vld [vmem:[#allocation2 + $0xf8] sm:$0xff] }
0x1072   :  { %7111 = vmatmul.mubr.msk.f32.vlgmr.msra.gmra.mrb[40].mxu0 %vm312_vm0, %v10646_v0  ;;  %v10711_v32 = vpack.c.bf16 %v3886_v26, %v3883_v6  ;;  %v3891_v39 = vld [vmem:[#allocation2 + $0x110] sm:$0xff]  ;;  %v3890_v57 = vld [vmem:[#allocation2 + $0x108] sm:$0xff]  ;;  %v3889_v49 = vld [vmem:[#allocation2 + $0x100] sm:$0xff] }
0x1073   :  { %8796 = vmatpush1.bf16.msra.mxu0 %v10648_v60  ;;  %3786 = vmatprep.mubr.f32.mxu0 %v11366_v9  ;;  %v10715_v51 = vpack.c.bf16 %v3891_v39, %v3888_v41  ;;  %v3887_v53 = vld [vmem:[#allocation2 + $0xf0] sm:$0xff]  ;;  %v3892_v8 = vld [vmem:[#allocation2 + $0x118] sm:$0xff]  ;;  %v3894_v45 = vld [vmem:[#allocation2 + $0x128] sm:$0xff] }
0x1074   :  { %8798 = vmatprep.subr.bf16.mxu0 %v10651_v63  ;;  %8792 = vmatpush3.bf16.msra.mxu1 %v10654_v12  ;;  %v10717_v36 = vpack.c.bf16 %v3890_v57, %v3887_v53  ;;  %v3897_v31 = vld [vmem:[#allocation2 + $0x140] sm:$0xff]  ;;  %v10721_v40 = vpack.c.bf16 %v3892_v8, %v3889_v49  ;;  %v3896_v37 = vld [vmem:[#allocation2 + $0x138] sm:$0xff]  ;;  %v3895_v3 = vld [vmem:[#allocation2 + $0x130] sm:$0xff] }
0x1075   :  { %8809 = vmatprep.subr.bf16.mxu1 %v11364_v10  ;;  %v10723_v17 = vpack.c.bf16 %v3897_v31, %v3894_v45  ;;  %v3893_v47 = vld [vmem:[#allocation2 + $0x120] sm:$0xff]  ;;  %v3898_v4 = vld [vmem:[#allocation2 + $0x148] sm:$0xff]  ;;  %v3900_v58 = vld [vmem:[#allocation2 + $0x158] sm:$0xff] }
0x1076   :  { %v10726_v7 = vpack.c.bf16 %v3896_v37, %v3893_v47  ;;  %v3903_v25 = vld [vmem:[#allocation2 + $0x170] sm:$0xff]  ;;  %v10730_v1 = vpack.c.bf16 %v3898_v4, %v3895_v3  ;;  %v3902_v34 = vld [vmem:[#allocation2 + $0x168] sm:$0xff]  ;;  %v3901_v21 = vld [vmem:[#allocation2 + $0x160] sm:$0xff] }
0x1077   :  { %8800 = vmatpush1.bf16.msra.mxu0 %v10660_v14  ;;  %7890 = vmatmul.mubr.msk.f32.vlgmr.msra.gmra.mrb[40].mxu1 %vm312_vm0, %v10646_v0  ;;  %v10732_v52 = vpack.c.bf16 %v3903_v25, %v3900_v58  ;;  %v3899_v15 = vld [vmem:[#allocation2 + $0x150] sm:$0xff]  ;;  %v3904_v48 = vld [vmem:[#allocation2 + $0x178] sm:$0xff]  ;;  %v4069_v19 = vld [vmem:[#allocation3 + $0xc8] sm:$0xff] }
0x1078   :  { %8802 = vmatprep.subr.bf16.mxu0 %v10664_v16  ;;  %8811 = vmatpush3.bf16.msra.mxu1 %v10667_v27  ;;  %v4072_v2 = vld [vmem:[#allocation3 + $0xe0] sm:$0xff]  ;;  %v10736_v6 = vpack.c.bf16 %v3902_v34, %v3899_v15  ;;  %v10740_v26 = vpack.c.bf16 %v3904_v48, %v3901_v21 }
0x1079   :  { %8812 = vmatprep.subr.bf16.mxu1 %v11364_v10  ;;  %7908 = vmatprep.mubr.msk.f32.mxu1 %vm9798_vm1, %v11366_v9  ;;  %v10742_v41 = vpack.c.bf16 %v4072_v2, %v4069_v19  ;;  %v3520_v53 = vld [vmem:[#allocation4] sm:$0x7]  ;;  %v3705_v57 = vld [vmem:[#allocation5] sm:$0x7] }
0x107a   :  { %11389 = vst [vmem:[#allocation42_spill] sm:$0xff] %v10740_v26  ;;  %v3525_v8 = vrot.slane %v3520_v53, %v10078_v38  ;;  %v3710_v45 = vrot.slane %v3705_v57, %v10078_v38  ;;  %v3529_v31 = vrot.slane %v3520_v53, %v10085_v42  ;;  %v3714_v47 = vrot.slane %v3705_v57, %v10085_v42 }
0x107b   :  { %8804 = vmatpush1.bf16.msra.mxu0 %v10671_v11  ;;  %11390 = vst [vmem:[#allocation43_spill] sm:$0xff] %v10742_v41  ;;  %v3718_v2 = vrot.slane %v3705_v57, %v10064_v24  ;;  %v4070_v57 = vld [vmem:[#allocation3 + $0xd0] sm:$0xff] }
0x107c   :  { %8806 = vmatprep.subr.bf16.mxu0 %v10676_v35  ;;  %8814 = vmatpush3.bf16.msra.mxu1 %v10679_v54  ;;  %v9325_v37 = vadd.f32 %v3710_v45, %v3525_v8  ;;  %v9327_v4 = vadd.f32 %v3714_v47, %v3529_v31 }
0x107d   :  { %8815 = vmatprep.subr.bf16.mxu1 %v11364_v10 }
0x107f   :  { %8808 = vmatpush1.bf16.msra.mxu0 %v10685_v29 }
0x1080   :  { %8817 = vmatpush3.bf16.msra.mxu1 %v10689_v59  ;;  %8822 = vmatprep.subr.bf16.mxu0 %v10706_v50 }
0x1081   :  { %8818 = vmatprep.subr.bf16.mxu1 %v11364_v10 }
0x1082   :  { %7113 = vmatmul.mubr.msk.f32.vlgmr.msra.gmra.mrb[40].mxu0 %vm312_vm0, %v10384_v23 }
0x1083   :  { %3990 = vmatprep.mubr.f32.mxu0 %v11366_v9  ;;  %8824 = vmatpush1.bf16.msra.mxu0 %v10708_v61 }
0x1084   :  { %8820 = vmatpush3.bf16.msra.mxu1 %v10694_v28  ;;  %8826 = vmatprep.subr.bf16.mxu0 %v10715_v51 }
0x1085   :  { %8837 = vmatprep.subr.bf16.mxu1 %v11364_v10 }
0x1087   :  { %7909 = vmatmul.mubr.msk.f32.vlgmr.msra.gmra.mrb[42].mxu1 %vm312_vm0, %v10384_v23  ;;  %8828 = vmatpush1.bf16.msra.mxu0 %v10717_v36 }
0x1088   :  { %7927 = vmatprep.mubr.msk.f32.mxu1 %vm9798_vm1, %v11366_v9  ;;  %8839 = vmatpush3.bf16.msra.mxu1 %v10711_v32  ;;  %v3533_v9 = vrot.slane %v3520_v53, %v10064_v24 }
0x1089   :  { %8840 = vmatprep.subr.bf16.mxu1 %v11364_v10  ;;  %8830 = vmatprep.subr.bf16.mxu0 %v10723_v17 }
0x108b   :  { %8832 = vmatpush1.bf16.msra.mxu0 %v10726_v7 }
0x108c   :  { %8842 = vmatpush3.bf16.msra.mxu1 %v10721_v40  ;;  %8834 = vmatprep.subr.bf16.mxu0 %v10732_v52 }
0x108d   :  { %8843 = vmatprep.subr.bf16.mxu1 %v11364_v10 }
0x108f   :  { %8836 = vmatpush1.bf16.msra.mxu0 %v10736_v6 }
0x1090   :  { %8845 = vmatpush3.bf16.msra.mxu1 %v10730_v1  ;;  %8850 = vmatprep.subr.bf16.mxu0 %v10742_v41 }
0x1091   :  { %8846 = vmatprep.subr.bf16.mxu1 %v11364_v10 }
0x1094   :  { %8848 = vmatpush3.bf16.msra.mxu1 %v10740_v26 }
0x1095   :  { %8865 = vmatprep.subr.bf16.mxu1 %v11364_v10 }
0x114a   :  { %v3677_v39 = vpop.f32.mrb[40].mxu1 }
0x114b   :  { %v7891_v49 = vpop.f32.mrb[41].mxu1  ;;  %v3678_v8 = vadd.f32 %v3677_v39, %v3533_v9  ;;  %v4081_v39 = vld [vmem:[#allocation3 + $0x128] sm:$0xff] }
0x1155   :  { %v3788_v3 = vpop.f32.mrb[40].mxu0 }
0x1156   :  { %v9326_v58 = vadd.f32 %v9325_v37, %v3788_v3  ;;  %v3790_v25 = vpop.f32.mrb[41].mxu0 }
0x1157   :  { %v9328_v34 = vadd.f32 %v9327_v4, %v3790_v25  ;;  %v4071_v25 = vld [vmem:[#allocation3 + $0xd8] sm:$0xff] }
0x1158   :  { %v3864_v15 = vmul.f32 0.5, %v9326_v58  ;;  %v4068_v58 = vld [vmem:[#allocation3 + $0xc0] sm:$0xff] }
0x1159   :  { %v3869_v19 = vmul.f32 0.5, %v9328_v34 }
0x115a   :  { %9517 = vtanh.f32 %v3864_v15  ;;  %v3859_v21 = vpop.f32.mrb[42].mxu1  ;;  %v4075_v15 = vld [vmem:[#allocation3 + $0xf8] sm:$0xff] }
0x115b   :  { %v7910_v48 = vpop.f32.mrb[43].mxu1  ;;  %9519 = vtanh.f32 %v3869_v19  ;;  %v3860_v41 = vadd.f32 %v3859_v21, %v3718_v2  ;;  %v4073_v19 = vld [vmem:[#allocation3 + $0xe8] sm:$0xff]  ;;  %v10756_v21 = vpack.c.bf16 %v4071_v25, %v4068_v58  ;;  %v4087_v58 = vld [vmem:[#allocation3 + $0x158] sm:$0xff] }
0x115c   :  { %v4078_v48 = vld [vmem:[#allocation3 + $0x110] sm:$0xff]  ;;  %v10762_v2 = vpack.c.bf16 %v4073_v19, %v4070_v57  ;;  %v4085_v57 = vld [vmem:[#allocation3 + $0x148] sm:$0xff] }
0x1164   :  { %v9518_v49 = vpop.eup %9517 }
0x1165   :  { %v3866_v10 = vmul.f32 0.5, %v9518_v49  ;;  %v9520_v31 = vpop.eup %9519 }
0x1166   :  { %v3871_v37 = vmul.f32 0.5, %v9520_v31  ;;  %v4079_v31 = vld [vmem:[#allocation3 + $0x118] sm:$0xff] }
0x1167   :  { %v3867_v26 = vadd.f32 0.5, %v3866_v10  ;;  %v10760_v10 = vpack.c.bf16 %v4078_v48, %v4075_v15  ;;  %v4090_v15 = vld [vmem:[#allocation3 + $0x170] sm:$0xff] }
0x1168   :  { %v3872_v3 = vadd.f32 0.5, %v3871_v37  ;;  %v4082_v48 = vld [vmem:[#allocation3 + $0x130] sm:$0xff] }
0x1169   :  { %v3873_v45 = vmul.f32 %v3867_v26, %v3860_v41  ;;  %v4074_v26 = vld [vmem:[#allocation3 + $0xf0] sm:$0xff]  ;;  %v4077_v41 = vld [vmem:[#allocation3 + $0x108] sm:$0xff] }
0x116a   :  { %v3876_v4 = vsub.f32 1.0, %v3872_v3  ;;  %v3878_v49 = vmul.f32 %v3872_v3, %v10384_v23  ;;  %v10769_v23 = vpack.c.bf16 %v4077_v41, %v4074_v26  ;;  %v4080_v3 = vld [vmem:[#allocation3 + $0x120] sm:$0xff]  ;;  %v4089_v26 = vld [vmem:[#allocation3 + $0x168] sm:$0xff]  ;;  %v10788_v41 = vpack.c.bf16 %v4085_v57, %v4082_v48 }
0x116b   :  { %v3874_v47 = vadd.f32 %v3873_v45, %v3678_v8  ;;  %v4084_v8 = vld [vmem:[#allocation3 + $0x140] sm:$0xff]  ;;  %v4093_v57 = vld [vmem:[#allocation5 + $0x3] sm:$0x7] }
0x116c   :  { %v4076_v45 = vld [vmem:[#allocation3 + $0x100] sm:$0xff]  ;;  %v10773_v37 = vpack.c.bf16 %v4084_v8, %v4081_v39  ;;  %11394 = vst [vmem:[#allocation45_spill] sm:$0xff] %v10788_v41  ;;  %v4091_v8 = vld [vmem:[#allocation3 + $0x178] sm:$0xff] }
0x116d   :  { %9521 = vtanh.f32 %v3874_v47  ;;  %v11391_v47 = vmov 0.0   ;;  %v10776_v25 = vpack.c.bf16 %v4079_v31, %v4076_v45  ;;  %v4088_v39 = vld [vmem:[#allocation3 + $0x160] sm:$0xff] }
0x116e   :  { %v10796_v31 = vpack.c.bf16 %v4091_v8, %v4088_v39  ;;  %v4098_v39 = vrot.slane %v4093_v57, %v10078_v38 }
0x1170   :  { %11396 = vst [vmem:[#allocation47_spill] sm:$0xff] %v10796_v31 }
0x1177   :  { %v9522_v34 = vpop.eup %9521 }
0x1178   :  { %v3877_v53 = vmul.f32 %v9522_v34, %v3876_v4  ;;  %v4083_v4 = vld [vmem:[#allocation3 + $0x138] sm:$0xff]  ;;  %v11392_v34 = vmov 0.0|0.0  }
0x1179   :  { %v10782_v19 = vpack.c.bf16 %v4083_v4, %v4080_v3  ;;  %v4272_v3 = vld [vmem:[#allocation6 + $0x8] sm:$0xff] }
0x117a   :  { %v10758_v9 = vadd.f32 %v3878_v49, %v3877_v53  ;;  %v10785_v49 = vpack.c.bf16 %v4090_v15, %v4087_v58  ;;  %v4086_v53 = vld [vmem:[#allocation3 + $0x150] sm:$0xff] }
0x117b   :  { %v10792_v45 = vpack.c.bf16 %v4089_v26, %v4086_v53  ;;  %v3906_v53 = vld [vmem:[#allocation4 + $0x3] sm:$0x7] }
0x117c   :  { %7115 = vmatmul.mubr.msk.f32.vlgmr.msra.gmra.mrb[42].mxu0 %vm312_vm0, %v10758_v9  ;;  %7928 = vmatmul.mubr.msk.f32.vlgmr.msra.gmra.mrb[44].mxu1 %vm312_vm0, %v10758_v9  ;;  %11393 = vst [vmem:[#allocation44_spill] sm:$0xff] %v10785_v49  ;;  %v3911_v26 = vrot.slane %v3906_v53, %v10078_v38  ;;  %v3915_v8 = vrot.slane %v3906_v53, %v10085_v42 }
0x117d   :  { %8852 = vmatpush1.bf16.msra.mxu0 %v10756_v21  ;;  %4177 = vmatprep.mubr.f32.mxu0 %v11391_v47  ;;  %11395 = vst [vmem:[#allocation46_spill] sm:$0xff] %v10792_v45 }
0x117e   :  { %8854 = vmatprep.subr.bf16.mxu0 %v10760_v10  ;;  %8867 = vmatpush3.bf16.msra.mxu1 %v10762_v2 }
0x117f   :  { %8868 = vmatprep.subr.bf16.mxu1 %v11392_v34  ;;  %7946 = vmatprep.mubr.msk.f32.mxu1 %vm9798_vm1, %v11391_v47 }
0x1181   :  { %8856 = vmatpush1.bf16.msra.mxu0 %v10769_v23 }
0x1182   :  { %8858 = vmatprep.subr.bf16.mxu0 %v10773_v37  ;;  %8870 = vmatpush3.bf16.msra.mxu1 %v10776_v25 }
0x1183   :  { %8871 = vmatprep.subr.bf16.mxu1 %v11392_v34 }
0x1185   :  { %8860 = vmatpush1.bf16.msra.mxu0 %v10782_v19 }
0x1186   :  { %8862 = vmatprep.subr.bf16.mxu0 %v10785_v49  ;;  %8873 = vmatpush3.bf16.msra.mxu1 %v10788_v41 }
0x1187   :  { %8874 = vmatprep.subr.bf16.mxu1 %v11392_v34 }
0x1189   :  { %8864 = vmatpush1.bf16.msra.mxu0 %v10792_v45 }
0x118a   :  { %8876 = vmatpush3.bf16.msra.mxu1 %v10796_v31  ;;  %8877 = vmatprep.subr.bf16.mxu0 %v11392_v34  ;;  %v3919_v31 = vrot.slane %v3906_v53, %v10064_v24 }
0x118b   :  { %8890 = vmatprep.subr.bf16.mxu1 %v10610_v44  ;;  %v4271_v44 = vld [vmem:[#allocation6] sm:$0xff] }
0x118c   :  { %7117 = vmatmul.mubr.msk.f32.vlgmr.msra.gmra.mrb[42].mxu0 %vm312_vm0, %v10604_v18  ;;  %v10818_v4 = vpack.c.bf16 %v4272_v3, %v4271_v44  ;;  %v4102_v44 = vrot.slane %v4093_v57, %v10085_v42  ;;  %v9329_v3 = vadd.f32 %v4098_v39, %v3911_v26 }
0x118d   :  { %7947 = vmatmul.mubr.msk.f32.vlgmr.msra.gmra.mrb[46].mxu1 %vm312_vm0, %v10604_v18  ;;  %7965 = vmatprep.mubr.msk.f32.mxu0 %vm9798_vm1, %v11391_v47 }
0x118e   :  { %8892 = vmatpush1.bf16.msra.mxu1 %v10612_v55  ;;  %4469 = vmatprep.mubr.f32.mxu1 %v11391_v47  ;;  %11397 = vst [vmem:[#allocation48_spill] sm:$0xff] %v10818_v4  ;;  %v4273_v55 = vld [vmem:[#allocation6 + $0x10] sm:$0xff] }
0x118f   :  { %8894 = vmatprep.subr.bf16.mxu1 %v10614_v62  ;;  %8879 = vmatpush3.bf16.msra.mxu0 %v10818_v4  ;;  %v4274_v62 = vld [vmem:[#allocation6 + $0x18] sm:$0xff] }
0x1190   :  { %8880 = vmatprep.subr.bf16.mxu0 %v11392_v34 }
0x1192   :  { %8896 = vmatpush1.bf16.msra.mxu1 %v10618_v22  ;;  %v10822_v22 = vpack.c.bf16 %v4274_v62, %v4273_v55  ;;  %v9331_v62 = vadd.f32 %v4102_v44, %v3915_v8 }
0x1193   :  { %8898 = vmatprep.subr.bf16.mxu1 %v10621_v20  ;;  %v4275_v20 = vld [vmem:[#allocation6 + $0x20] sm:$0xff] }
0x1194   :  { %11398 = vst [vmem:[#allocation49_spill] sm:$0xff] %v10822_v22  ;;  %8882 = vmatpush3.bf16.msra.mxu0 %v10822_v22  ;;  %v4106_v22 = vrot.slane %v4093_v57, %v10064_v24 }
0x1195   :  { %8883 = vmatprep.subr.bf16.mxu0 %v11392_v34 }
0x1196   :  { %8900 = vmatpush1.bf16.msra.mxu1 %v10626_v13  ;;  %v4276_v13 = vld [vmem:[#allocation6 + $0x28] sm:$0xff] }
0x1197   :  { %8902 = vmatprep.subr.bf16.mxu1 %v10629_v5  ;;  %v10825_v5 = vpack.c.bf16 %v4276_v13, %v4275_v20 }
0x1199   :  { %11399 = vst [vmem:[#allocation50_spill] sm:$0xff] %v10825_v5  ;;  %8885 = vmatpush3.bf16.msra.mxu0 %v10825_v5 }
0x119a   :  { %8904 = vmatpush1.bf16.msra.mxu1 %v10636_v56  ;;  %v4277_v56 = vld [vmem:[#allocation6 + $0x30] sm:$0xff]  ;;  %8886 = vmatprep.subr.bf16.mxu0 %v11392_v34 }
0x119b   :  { %8918 = vmatprep.subr.bf16.mxu1 %v10639_v30  ;;  %v4278_v30 = vld [vmem:[#allocation6 + $0x38] sm:$0xff] }
0x119c   :  { %v10829_v58 = vpack.c.bf16 %v4278_v30, %v4277_v56 }
0x119e   :  { %11400 = vst [vmem:[#allocation51_spill] sm:$0xff] %v10829_v58  ;;  %8888 = vmatpush3.bf16.msra.mxu0 %v10829_v58 }
0x119f   :  { %8905 = vmatprep.subr.bf16.mxu0 %v11392_v34 }
0x124f   :  { %v4063_v15 = vpop.f32.mrb[44].mxu1 }
0x1250   :  { %v7929_v48 = vpop.f32.mrb[45].mxu1  ;;  %v4064_v26 = vadd.f32 %v4063_v15, %v3919_v31 }
0x125f   :  { %v4179_v55 = vpop.f32.mrb[42].mxu0 }
0x1260   :  { %v9330_v20 = vadd.f32 %v9329_v3, %v4179_v55  ;;  %v4181_v13 = vpop.f32.mrb[43].mxu0  ;;  %v4250_v56 = vpop.f32.mrb[46].mxu1 }
0x1261   :  { %v7948_v30 = vpop.f32.mrb[47].mxu1  ;;  %v9332_v5 = vadd.f32 %v9331_v62, %v4181_v13  ;;  %v4251_v49 = vadd.f32 %v4250_v56, %v4106_v22 }
0x1262   :  { %v4255_v58 = vmul.f32 0.5, %v9330_v20 }
0x1263   :  { %v4260_v48 = vmul.f32 0.5, %v9332_v5 }
0x1264   :  { %9523 = vtanh.f32 %v4255_v58 }
0x1265   :  { %9525 = vtanh.f32 %v4260_v48 }
0x126e   :  { %v9524_v4 = vpop.eup %9523 }
0x126f   :  { %v4257_v45 = vmul.f32 0.5, %v9524_v4  ;;  %v9526_v8 = vpop.eup %9525 }
0x1270   :  { %v4262_v3 = vmul.f32 0.5, %v9526_v8  ;;  %v5221_v8 = vld [vmem:[#allocation2 + $0x8] sm:$0xff] }
0x1271   :  { %v4258_v41 = vadd.f32 0.5, %v4257_v45 }
0x1272   :  { %v4263_v55 = vadd.f32 0.5, %v4262_v3  ;;  %v5220_v3 = vld [vmem:[#allocation2] sm:$0xff] }
0x1273   :  { %v4264_v39 = vmul.f32 %v4258_v41, %v4251_v49 }
0x1274   :  { %v4267_v20 = vsub.f32 1.0, %v4263_v55  ;;  %v4269_v5 = vmul.f32 %v4263_v55, %v10604_v18  ;;  %v10855_v18 = vld [vmem:[#allocation7] ss:$0 sm:$0xff] }
0x1275   :  { %v4265_v44 = vadd.f32 %v4264_v39, %v4064_v26 }
0x1277   :  { %9527 = vtanh.f32 %v4265_v44  ;;  %v5224_v44 = vld [vmem:[#allocation2 + $0x20] sm:$0xff] }
0x1278   :  { %v10954_v55 = vpack.c.bf16 %v5224_v44, %v5221_v8  ;;  %v5228_v44 = vld [vmem:[#allocation2 + $0x40] sm:$0xff] }
0x1281   :  { %v9528_v62 = vpop.eup %9527 }
0x1282   :  { %v4268_v58 = vmul.f32 %v9528_v62, %v4267_v20  ;;  %v5223_v20 = vld [vmem:[#allocation2 + $0x18] sm:$0xff] }
0x1283   :  { %v10956_v62 = vpack.c.bf16 %v5223_v20, %v5220_v3  ;;  %v5231_v3 = vld [vmem:[#allocation2 + $0x58] sm:$0xff] }
0x1284   :  { %v10841_v13 = vadd.f32 %v4269_v5, %v4268_v58  ;;  %v5227_v5 = vld [vmem:[#allocation2 + $0x38] sm:$0xff]  ;;  %v5230_v58 = vld [vmem:[#allocation2 + $0x50] sm:$0xff]  ;;  %v10986_v20 = vpack.c.bf16 %v5231_v3, %v5228_v44  ;;  %v5426_v44 = vld [vmem:[#allocation3 + $0xa8] sm:$0xff] }
0x1285   :  { %v5425_v3 = vld [vmem:[#allocation3 + $0xa0] sm:$0xff] }
0x1286   :  { %7966 = vmatmul.mubr.msk.f32.vlgmr.msra.gmra.mrb[44].mxu0 %vm312_vm0, %v10841_v13 }
0x1287   :  { %8907 = vmatpush3.bf16.msra.mxu0 %v10623_v46  ;;  %7984 = vmatprep.mubr.msk.f32.mxu0 %vm9798_vm1, %v11391_v47 }
0x1288   :  { %8908 = vmatprep.subr.bf16.mxu0 %v11392_v34 }
0x128b   :  { %8910 = vmatpush3.bf16.msra.mxu0 %v10632_v43  ;;  %v11401_v43 = vld [vmem:[#allocation42_spill] sm:$0xff] }
0x128c   :  { %8911 = vmatprep.subr.bf16.mxu0 %v11392_v34 }
0x128f   :  { %8913 = vmatpush3.bf16.msra.mxu0 %v10642_v33  ;;  %v11402_v33 = vld [vmem:[#allocation43_spill] sm:$0xff] }
0x1290   :  { %8914 = vmatprep.subr.bf16.mxu0 %v11392_v34 }
0x1293   :  { %8916 = vmatpush3.bf16.msra.mxu0 %v10654_v12  ;;  %v4385_v12 = vld [vmem:[#allocation4] sm:$0x7] }
0x1294   :  { %8933 = vmatprep.subr.bf16.mxu0 %v11392_v34 }
0x1359   :  { %v4355_v46 = vpop.f32.mrb[44].mxu0 }
0x135a   :  { %v4356_v49 = vadd.f32 %v10855_v18, %v4355_v46  ;;  %v7967_v41 = vpop.f32.mrb[45].mxu0  ;;  %v5226_v46 = vld [vmem:[#allocation2 + $0x30] sm:$0xff] }
0x135b   :  { %v5229_v41 = vld [vmem:[#allocation2 + $0x48] sm:$0xff] }
0x135c   :  { %v10859_v45 = vadd.f32 %v4356_v49, %v10646_v0  ;;  %v10959_v49 = vpack.c.bf16 %v5230_v58, %v5227_v5  ;;  %v5234_v5 = vld [vmem:[#allocation2 + $0x70] sm:$0xff] }
0x135e   :  { %4360 = vst [vmem:[#allocation17] sm:$0xff] %v10859_v45  ;;  %7121 = vmatmul.mubr.msk.f32.vlgmr.msra.gmra.mrb[48].mxu1 %vm312_vm0, %v10859_v45  ;;  %7985 = vmatmul.mubr.msk.f32.vlgmr.msra.gmra.mrb[46].mxu0 %vm312_vm0, %v10859_v45 }
0x135f   :  { %8920 = vmatpush1.bf16.msra.mxu1 %v10648_v60  ;;  %8935 = vmatpush3.bf16.msra.mxu0 %v10667_v27  ;;  %v4394_v27 = vrot.slane %v4385_v12, %v10085_v42 }
0x1360   :  { %8922 = vmatprep.subr.bf16.mxu1 %v10651_v63  ;;  %8936 = vmatprep.subr.bf16.mxu0 %v11392_v34  ;;  %v4570_v63 = vld [vmem:[#allocation5] sm:$0x7] }
0x1361   :  { %4651 = vmatprep.mubr.f32.mxu1 %v11391_v47  ;;  %8003 = vmatprep.mubr.msk.f32.mxu0 %vm9798_vm1, %v11391_v47 }
0x1363   :  { %8924 = vmatpush1.bf16.msra.mxu1 %v10660_v14  ;;  %8938 = vmatpush3.bf16.msra.mxu0 %v10679_v54  ;;  %v4390_v14 = vrot.slane %v4385_v12, %v10078_v38 }
0x1364   :  { %8926 = vmatprep.subr.bf16.mxu1 %v10664_v16  ;;  %8939 = vmatprep.subr.bf16.mxu0 %v11392_v34  ;;  %v4575_v16 = vrot.slane %v4570_v63, %v10078_v38 }
0x1367   :  { %8928 = vmatpush1.bf16.msra.mxu1 %v10671_v11  ;;  %8941 = vmatpush3.bf16.msra.mxu0 %v10689_v59  ;;  %v4579_v11 = vrot.slane %v4570_v63, %v10085_v42 }
0x1368   :  { %8930 = vmatprep.subr.bf16.mxu1 %v10676_v35  ;;  %8942 = vmatprep.subr.bf16.mxu0 %v11392_v34  ;;  %v9333_v35 = vadd.f32 %v4575_v16, %v4390_v14 }
0x1369   :  { %v9335_v59 = vadd.f32 %v4579_v11, %v4394_v27  ;;  %v4954_v11 = vld [vmem:[#allocation5 + $0x3] sm:$0x7] }
0x136b   :  { %8932 = vmatpush1.bf16.msra.mxu1 %v10685_v29  ;;  %8944 = vmatpush3.bf16.msra.mxu0 %v10694_v28 }
0x136c   :  { %8946 = vmatprep.subr.bf16.mxu1 %v10706_v50  ;;  %8961 = vmatprep.subr.bf16.mxu0 %v11392_v34 }
0x136e   :  { %7123 = vmatmul.mubr.msk.f32.vlgmr.msra.gmra.mrb[48].mxu1 %vm312_vm0, %v10758_v9  ;;  %8004 = vmatmul.mubr.msk.f32.vlgmr.msra.gmra.mrb[48].mxu0 %vm312_vm0, %v10758_v9 }
0x136f   :  { %8948 = vmatpush1.bf16.msra.mxu1 %v10708_v61  ;;  %8963 = vmatpush3.bf16.msra.mxu0 %v10711_v32 }
0x1370   :  { %8950 = vmatprep.subr.bf16.mxu1 %v10715_v51  ;;  %8964 = vmatprep.subr.bf16.mxu0 %v11392_v34 }
0x1371   :  { %4853 = vmatprep.mubr.f32.mxu1 %v11391_v47  ;;  %8022 = vmatprep.mubr.msk.f32.mxu0 %vm9798_vm1, %v11391_v47 }
0x1373   :  { %8952 = vmatpush1.bf16.msra.mxu1 %v10717_v36  ;;  %8966 = vmatpush3.bf16.msra.mxu0 %v10721_v40  ;;  %v4583_v40 = vrot.slane %v4570_v63, %v10064_v24  ;;  %v5232_v63 = vld [vmem:[#allocation2 + $0x60] sm:$0xff] }
0x1374   :  { %8954 = vmatprep.subr.bf16.mxu1 %v10723_v17  ;;  %8967 = vmatprep.subr.bf16.mxu0 %v11392_v34 }
0x1377   :  { %8956 = vmatpush1.bf16.msra.mxu1 %v10726_v7  ;;  %8969 = vmatpush3.bf16.msra.mxu0 %v10730_v1  ;;  %v4398_v7 = vrot.slane %v4385_v12, %v10064_v24  ;;  %v5235_v12 = vld [vmem:[#allocation2 + $0x78] sm:$0xff] }
0x1378   :  { %8958 = vmatprep.subr.bf16.mxu1 %v10732_v52  ;;  %8970 = vmatprep.subr.bf16.mxu0 %v11392_v34  ;;  %v10968_v14 = vpack.c.bf16 %v5235_v12, %v5232_v63  ;;  %v5241_v63 = vld [vmem:[#allocation2 + $0xa8] sm:$0xff]  ;;  %v5240_v12 = vld [vmem:[#allocation2 + $0xa0] sm:$0xff] }
0x137b   :  { %8960 = vmatpush1.bf16.msra.mxu1 %v10736_v6  ;;  %8972 = vmatpush3.bf16.msra.mxu0 %v11401_v43  ;;  %v10962_v43 = vpack.c.bf16 %v5229_v41, %v5226_v46  ;;  %v5239_v46 = vld [vmem:[#allocation2 + $0x98] sm:$0xff]  ;;  %v5242_v41 = vld [vmem:[#allocation2 + $0xb0] sm:$0xff] }
0x137c   :  { %8974 = vmatprep.subr.bf16.mxu1 %v11402_v33  ;;  %8989 = vmatprep.subr.bf16.mxu0 %v11392_v34  ;;  %v5233_v33 = vld [vmem:[#allocation2 + $0x68] sm:$0xff] }
0x1431   :  { %v4542_v0 = vpop.f32.mrb[46].mxu0 }
0x1432   :  { %v7986_v60 = vpop.f32.mrb[47].mxu0  ;;  %v4543_v31 = vadd.f32 %v4542_v0, %v4398_v7  ;;  %v5236_v0 = vld [vmem:[#allocation2 + $0x80] sm:$0xff] }
0x1433   :  { %v10965_v60 = vpack.c.bf16 %v5236_v0, %v5233_v33  ;;  %v10997_v33 = vpack.c.bf16 %v5242_v41, %v5239_v46  ;;  %v5238_v0 = vld [vmem:[#allocation2 + $0x90] sm:$0xff]  ;;  %v5605_v41 = vld [vmem:[#allocation2 + $0xc8] sm:$0xff] }
0x1441   :  { %v4653_v54 = vpop.f32.mrb[48].mxu1  ;;  %v4724_v29 = vpop.f32.mrb[48].mxu0 }
0x1442   :  { %v9334_v28 = vadd.f32 %v9333_v35, %v4653_v54  ;;  %v4655_v50 = vpop.f32.mrb[49].mxu1  ;;  %v8005_v61 = vpop.f32.mrb[49].mxu0  ;;  %v4725_v52 = vadd.f32 %v4724_v29, %v4583_v40  ;;  %v4769_v35 = vld [vmem:[#allocation4 + $0x3] sm:$0x7]  ;;  %v4959_v29 = vrot.slane %v4954_v11, %v10078_v38 }
0x1443   :  { %v9336_v51 = vadd.f32 %v9335_v59, %v4655_v50  ;;  %v4774_v54 = vrot.slane %v4769_v35, %v10078_v38  ;;  %v4778_v59 = vrot.slane %v4769_v35, %v10085_v42 }
0x1444   :  { %v4729_v32 = vmul.f32 0.5, %v9334_v28  ;;  %v4963_v28 = vrot.slane %v4954_v11, %v10085_v42 }
0x1445   :  { %v4734_v36 = vmul.f32 0.5, %v9336_v51  ;;  %v9337_v50 = vadd.f32 %v4959_v29, %v4774_v54  ;;  %v5409_v54 = vld [vmem:[#allocation3 + $0x20] sm:$0xff] }
0x1446   :  { %9529 = vtanh.f32 %v4729_v32  ;;  %v9339_v51 = vadd.f32 %v4963_v28, %v4778_v59  ;;  %v5405_v59 = vld [vmem:[#allocation3] sm:$0xff]  ;;  %v5408_v28 = vld [vmem:[#allocation3 + $0x18] sm:$0xff] }
0x1447   :  { %9531 = vtanh.f32 %v4734_v36 }
0x1450   :  { %v9530_v17 = vpop.eup %9529 }
0x1451   :  { %v4731_v1 = vmul.f32 0.5, %v9530_v17  ;;  %v9532_v22 = vpop.eup %9531 }
0x1452   :  { %v4736_v57 = vmul.f32 0.5, %v9532_v22 }
0x1453   :  { %v4732_v6 = vadd.f32 0.5, %v4731_v1 }
0x1454   :  { %v4737_v53 = vadd.f32 0.5, %v4736_v57 }
0x1455   :  { %v4738_v4 = vmul.f32 %v4732_v6, %v4725_v52  ;;  %v4967_v6 = vrot.slane %v4954_v11, %v10064_v24 }
0x1456   :  { %v4741_v56 = vsub.f32 1.0, %v4737_v53  ;;  %v4743_v26 = vmul.f32 %v4737_v53, %v10758_v9  ;;  %v11404_v9 = vld [vmem:[#allocation44_spill] sm:$0xff] }
0x1457   :  { %v4739_v15 = vadd.f32 %v4738_v4, %v4543_v31  ;;  %v4782_v4 = vrot.slane %v4769_v35, %v10064_v24  ;;  %v5406_v35 = vld [vmem:[#allocation3 + $0x8] sm:$0xff] }
0x1458   :  { %v11006_v29 = vpack.c.bf16 %v5409_v54, %v5406_v35  ;;  %v5606_v35 = vld [vmem:[#allocation2 + $0xd0] sm:$0xff] }
0x1459   :  { %9533 = vtanh.f32 %v4739_v15 }
0x1463   :  { %v9534_v30 = vpop.eup %9533 }
0x1464   :  { %v4742_v48 = vmul.f32 %v9534_v30, %v4741_v56 }
0x1466   :  { %v10915_v39 = vadd.f32 %v4743_v26, %v4742_v48 }
0x1468   :  { %7125 = vmatmul.mubr.msk.f32.vlgmr.msra.gmra.mrb[50].mxu1 %vm312_vm0, %v10915_v39  ;;  %8023 = vmatmul.mubr.msk.f32.vlgmr.msra.gmra.mrb[50].mxu0 %vm312_vm0, %v10915_v39 }
0x1469   :  { %8976 = vmatpush1.bf16.msra.mxu1 %v10756_v21  ;;  %8991 = vmatpush3.bf16.msra.mxu0 %v10762_v2  ;;  %v11403_v21 = vld [vmem:[#allocation45_spill] sm:$0xff]  ;;  %v11406_v2 = vld [vmem:[#allocation47_spill] sm:$0xff] }
0x146a   :  { %8978 = vmatprep.subr.bf16.mxu1 %v10760_v10  ;;  %8992 = vmatprep.subr.bf16.mxu0 %v11392_v34  ;;  %v11405_v10 = vld [vmem:[#allocation46_spill] sm:$0xff] }
0x146b   :  { %5035 = vmatprep.mubr.f32.mxu1 %v11391_v47  ;;  %8041 = vmatprep.mubr.msk.f32.mxu0 %vm9798_vm1, %v11391_v47 }
0x146d   :  { %8980 = vmatpush1.bf16.msra.mxu1 %v10769_v23  ;;  %8994 = vmatpush3.bf16.msra.mxu0 %v10776_v25  ;;  %v11407_v23 = vld [vmem:[#allocation48_spill] sm:$0xff]  ;;  %v11409_v25 = vld [vmem:[#allocation50_spill] sm:$0xff] }
0x146e   :  { %8982 = vmatprep.subr.bf16.mxu1 %v10773_v37  ;;  %8995 = vmatprep.subr.bf16.mxu0 %v11392_v34  ;;  %v11408_v37 = vld [vmem:[#allocation49_spill] sm:$0xff] }
0x1471   :  { %8984 = vmatpush1.bf16.msra.mxu1 %v10782_v19  ;;  %8997 = vmatpush3.bf16.msra.mxu0 %v11403_v21  ;;  %v11410_v19 = vld [vmem:[#allocation51_spill] sm:$0xff] }
0x1472   :  { %8986 = vmatprep.subr.bf16.mxu1 %v11404_v9  ;;  %8998 = vmatprep.subr.bf16.mxu0 %v11392_v34 }
0x1475   :  { %8988 = vmatpush1.bf16.msra.mxu1 %v11405_v10  ;;  %9000 = vmatpush3.bf16.msra.mxu0 %v11406_v2  ;;  %v5222_v10 = vld [vmem:[#allocation2 + $0x10] sm:$0xff]  ;;  %v5225_v2 = vld [vmem:[#allocation2 + $0x28] sm:$0xff] }
0x1476   :  { %9001 = vmatprep.subr.bf16.mxu1 %v11392_v34  ;;  %9014 = vmatprep.subr.bf16.mxu0 %v10954_v55 }
0x1478   :  { %7127 = vmatmul.mubr.msk.f32.vlgmr.msra.gmra.mrb[50].mxu1 %vm312_vm0, %v10841_v13  ;;  %8042 = vmatmul.mubr.msk.f32.vlgmr.msra.gmra.mrb[52].mxu0 %vm312_vm0, %v10841_v13 }
0x1479   :  { %9003 = vmatpush3.bf16.msra.mxu1 %v11407_v23  ;;  %8060 = vmatprep.mubr.msk.f32.mxu1 %vm9798_vm1, %v11391_v47 }
0x147a   :  { %9004 = vmatprep.subr.bf16.mxu1 %v11392_v34  ;;  %5328 = vmatprep.mubr.f32.mxu0 %v11391_v47 }
0x147b   :  { %9016 = vmatpush1.bf16.msra.mxu0 %v10956_v62 }
0x147c   :  { %9018 = vmatprep.subr.bf16.mxu0 %v10959_v49 }
0x147d   :  { %9006 = vmatpush3.bf16.msra.mxu1 %v11408_v37 }
0x147e   :  { %9007 = vmatprep.subr.bf16.mxu1 %v11392_v34 }
0x147f   :  { %9020 = vmatpush1.bf16.msra.mxu0 %v10962_v43 }
0x1480   :  { %9022 = vmatprep.subr.bf16.mxu0 %v10965_v60 }
0x1481   :  { %9009 = vmatpush3.bf16.msra.mxu1 %v11409_v25 }
0x1482   :  { %9010 = vmatprep.subr.bf16.mxu1 %v11392_v34 }
0x1483   :  { %9024 = vmatpush1.bf16.msra.mxu0 %v10968_v14 }
0x1484   :  { %9026 = vmatprep.subr.bf16.mxu0 %v10997_v33 }
0x1485   :  { %9012 = vmatpush3.bf16.msra.mxu1 %v11410_v19  ;;  %v10979_v19 = vpack.c.bf16 %v5225_v2, %v5222_v10  ;;  %v5427_v10 = vld [vmem:[#allocation3 + $0xb0] sm:$0xff] }
0x1486   :  { %9029 = vmatprep.subr.bf16.mxu1 %v11392_v34 }
0x153b   :  { %v4926_v16 = vpop.f32.mrb[50].mxu0 }
0x153c   :  { %v8024_v27 = vpop.f32.mrb[51].mxu0  ;;  %v4927_v53 = vadd.f32 %v4926_v16, %v4782_v4  ;;  %v10999_v16 = vpack.c.bf16 %v5241_v63, %v5238_v0  ;;  %v5414_v4 = vld [vmem:[#allocation3 + $0x48] sm:$0xff]  ;;  %v5608_v0 = vld [vmem:[#allocation2 + $0xe0] sm:$0xff] }
0x153d   :  { %v5243_v27 = vld [vmem:[#allocation2 + $0xb8] sm:$0xff]  ;;  %v11066_v63 = vpack.c.bf16 %v5608_v0, %v5605_v41  ;;  %v5624_v41 = vld [vmem:[#allocation2 + $0x160] sm:$0xff] }
0x153e   :  { %v11002_v11 = vpack.c.bf16 %v5243_v27, %v5240_v12  ;;  %9028 = vmatpush1.bf16.msra.mxu0 %v10999_v16  ;;  %v5604_v12 = vld [vmem:[#allocation2 + $0xc0] sm:$0xff]  ;;  %v5607_v27 = vld [vmem:[#allocation2 + $0xd8] sm:$0xff] }
0x153f   :  { %9042 = vmatprep.subr.bf16.mxu0 %v11006_v29  ;;  %v11068_v54 = vpack.c.bf16 %v5607_v27, %v5604_v12  ;;  %v5627_v12 = vld [vmem:[#allocation2 + $0x178] sm:$0xff] }
0x1540   :  { %v11101_v27 = vpack.c.bf16 %v5627_v12, %v5624_v41 }
0x1542   :  { %11414 = vst [vmem:[#allocation44_spill] sm:$0xff] %v11101_v27 }
0x154b   :  { %v5037_v61 = vpop.f32.mrb[50].mxu1  ;;  %v5108_v32 = vpop.f32.mrb[52].mxu0 }
0x154c   :  { %v9338_v36 = vadd.f32 %v9337_v50, %v5037_v61  ;;  %v5039_v40 = vpop.f32.mrb[51].mxu1  ;;  %v8043_v17 = vpop.f32.mrb[53].mxu0  ;;  %v5109_v15 = vadd.f32 %v5108_v32, %v4967_v6  ;;  %v5407_v50 = vld [vmem:[#allocation3 + $0x10] sm:$0xff]  ;;  %v5410_v61 = vld [vmem:[#allocation3 + $0x28] sm:$0xff] }
0x154d   :  { %v9340_v1 = vadd.f32 %v9339_v51, %v5039_v40  ;;  %v5412_v51 = vld [vmem:[#allocation3 + $0x38] sm:$0xff] }
0x154e   :  { %v5113_v7 = vmul.f32 0.5, %v9338_v36  ;;  %v5415_v36 = vld [vmem:[#allocation3 + $0x50] sm:$0xff] }
0x154f   :  { %v5118_v52 = vmul.f32 0.5, %v9340_v1  ;;  %v11013_v1 = vpack.c.bf16 %v5410_v61, %v5407_v50  ;;  %v5611_v50 = vld [vmem:[#allocation2 + $0xf8] sm:$0xff]  ;;  %v5614_v61 = vld [vmem:[#allocation2 + $0x110] sm:$0xff] }
0x1550   :  { %9535 = vtanh.f32 %v5113_v7  ;;  %v11011_v7 = vpack.c.bf16 %v5408_v28, %v5405_v59  ;;  %v5609_v59 = vld [vmem:[#allocation2 + $0xe8] sm:$0xff] }
0x1551   :  { %9537 = vtanh.f32 %v5118_v52  ;;  %v5411_v52 = vld [vmem:[#allocation3 + $0x30] sm:$0xff]  ;;  %v11071_v28 = vpack.c.bf16 %v5609_v59, %v5606_v35  ;;  %v5790_v35 = vld [vmem:[#allocation3 + $0xc8] sm:$0xff]  ;;  %v5793_v59 = vld [vmem:[#allocation3 + $0xe0] sm:$0xff] }
0x155a   :  { %v9536_v31 = vpop.eup %9535 }
0x155b   :  { %v5115_v22 = vmul.f32 0.5, %v9536_v31  ;;  %v9538_v30 = vpop.eup %9537  ;;  %v11018_v31 = vpack.c.bf16 %v5415_v36, %v5412_v51  ;;  %v5610_v51 = vld [vmem:[#allocation2 + $0xf0] sm:$0xff]  ;;  %v5613_v36 = vld [vmem:[#allocation2 + $0x108] sm:$0xff] }
0x155c   :  { %v5120_v26 = vmul.f32 0.5, %v9538_v30 }
0x155d   :  { %v5116_v57 = vadd.f32 0.5, %v5115_v22  ;;  %v5413_v22 = vld [vmem:[#allocation3 + $0x40] sm:$0xff] }
0x155e   :  { %v5121_v21 = vadd.f32 0.5, %v5120_v26  ;;  %v5419_v26 = vld [vmem:[#allocation3 + $0x70] sm:$0xff] }
0x155f   :  { %v5122_v56 = vmul.f32 %v5116_v57, %v5109_v15  ;;  %v5416_v15 = vld [vmem:[#allocation3 + $0x58] sm:$0xff]  ;;  %v5418_v57 = vld [vmem:[#allocation3 + $0x68] sm:$0xff] }
0x1560   :  { %v5125_v9 = vsub.f32 1.0, %v5121_v21  ;;  %v5127_v25 = vmul.f32 %v5121_v21, %v10841_v13  ;;  %v5237_v13 = vld [vmem:[#allocation2 + $0x88] sm:$0xff] }
0x1561   :  { %v5123_v48 = vadd.f32 %v5122_v56, %v4927_v53  ;;  %v10992_v58 = vpack.c.bf16 %v5237_v13, %v5234_v5  ;;  %v5421_v53 = vld [vmem:[#allocation3 + $0x80] sm:$0xff]  ;;  %v5422_v21 = vld [vmem:[#allocation3 + $0x88] sm:$0xff]  ;;  %v5428_v5 = vld [vmem:[#allocation3 + $0xb8] sm:$0xff] }
0x1562   :  { %v5417_v56 = vld [vmem:[#allocation3 + $0x60] sm:$0xff]  ;;  %v11033_v30 = vpack.c.bf16 %v5421_v53, %v5418_v57  ;;  %v11052_v46 = vpack.c.bf16 %v5428_v5, %v5425_v3  ;;  %v5622_v3 = vld [vmem:[#allocation2 + $0x150] sm:$0xff]  ;;  %v5625_v5 = vld [vmem:[#allocation2 + $0x168] sm:$0xff] }
0x1563   :  { %9539 = vtanh.f32 %v5123_v48  ;;  %v5420_v48 = vld [vmem:[#allocation3 + $0x78] sm:$0xff]  ;;  %v5616_v53 = vld [vmem:[#allocation2 + $0x120] sm:$0xff]  ;;  %v11098_v0 = vpack.c.bf16 %v5625_v5, %v5622_v3 }
0x1564   :  { %v11040_v2 = vpack.c.bf16 %v5420_v48, %v5417_v56  ;;  %v5619_v56 = vld [vmem:[#allocation2 + $0x138] sm:$0xff]  ;;  %v5618_v48 = vld [vmem:[#allocation2 + $0x130] sm:$0xff] }
0x1565   :  { %11413 = vst [vmem:[#allocation45_spill] sm:$0xff] %v11098_v0 }
0x156d   :  { %v9540_v23 = vpop.eup %9539 }
0x156e   :  { %v5126_v37 = vmul.f32 %v9540_v23, %v5125_v9  ;;  %v5424_v9 = vld [vmem:[#allocation3 + $0x98] sm:$0xff]  ;;  %v11042_v23 = vpack.c.bf16 %v5422_v21, %v5419_v26  ;;  %v11088_v26 = vpack.c.bf16 %v5619_v56, %v5616_v53  ;;  %v5621_v21 = vld [vmem:[#allocation2 + $0x148] sm:$0xff] }
0x1570   :  { %v10981_v8 = vadd.f32 %v5127_v25, %v5126_v37  ;;  %v5423_v37 = vld [vmem:[#allocation3 + $0x90] sm:$0xff]  ;;  %v11046_v25 = vpack.c.bf16 %v5427_v10, %v5424_v9  ;;  %v11091_v9 = vpack.c.bf16 %v5621_v21, %v5618_v48  ;;  %v5623_v10 = vld [vmem:[#allocation2 + $0x158] sm:$0xff] }
0x1571   :  { %v11050_v13 = vpack.c.bf16 %v5426_v44, %v5423_v37  ;;  %v5626_v37 = vld [vmem:[#allocation2 + $0x170] sm:$0xff] }
0x1572   :  { %8061 = vmatmul.mubr.msk.f32.vlgmr.msra.gmra.mrb[52].mxu1 %vm312_vm0, %v10981_v8  ;;  %11411 = vst [vmem:[#allocation42_spill] sm:$0xff] %v11091_v9  ;;  %v11095_v44 = vpack.c.bf16 %v5626_v37, %v5623_v10 }
0x1573   :  { %9031 = vmatpush3.bf16.msra.mxu1 %v10979_v19  ;;  %8079 = vmatprep.mubr.msk.f32.mxu1 %vm9798_vm1, %v11391_v47 }
0x1574   :  { %9032 = vmatprep.subr.bf16.mxu1 %v11392_v34  ;;  %11412 = vst [vmem:[#allocation43_spill] sm:$0xff] %v11095_v44 }
0x1577   :  { %9034 = vmatpush3.bf16.msra.mxu1 %v10986_v20 }
0x1578   :  { %9035 = vmatprep.subr.bf16.mxu1 %v11392_v34 }
0x157b   :  { %9037 = vmatpush3.bf16.msra.mxu1 %v10992_v58 }
0x157c   :  { %9038 = vmatprep.subr.bf16.mxu1 %v11392_v34 }
0x157f   :  { %9040 = vmatpush3.bf16.msra.mxu1 %v11002_v11 }
0x1580   :  { %9057 = vmatprep.subr.bf16.mxu1 %v11392_v34 }
0x1645   :  { %v5213_v32 = vpop.f32.mrb[52].mxu1 }
0x1646   :  { %v5214_v40 = vadd.f32 %v10855_v18, %v5213_v32  ;;  %v8062_v17 = vpop.f32.mrb[53].mxu1  ;;  %v11027_v18 = vpack.c.bf16 %v5414_v4, %v5411_v52  ;;  %v11075_v32 = vpack.c.bf16 %v5614_v61, %v5611_v50  ;;  %v5615_v52 = vld [vmem:[#allocation2 + $0x118] sm:$0xff]  ;;  %v11105_v50 = vpack.c.bf16 %v5793_v59, %v5790_v35 }
0x1647   :  { %v11078_v17 = vpack.c.bf16 %v5613_v36, %v5610_v51  ;;  %v5429_v36 = vld [vmem:[#allocation5] sm:$0x7] }
0x1648   :  { %v11016_v6 = vadd.f32 %v5214_v40, %v10859_v45  ;;  %v11029_v45 = vpack.c.bf16 %v5416_v15, %v5413_v22  ;;  %v5612_v40 = vld [vmem:[#allocation2 + $0x100] sm:$0xff]  ;;  %v5617_v22 = vld [vmem:[#allocation2 + $0x128] sm:$0xff]  ;;  %11415 = vst [vmem:[#allocation46_spill] sm:$0xff] %v11105_v50  ;;  %v5438_v53 = vrot.slane %v5429_v36, %v10085_v42  ;;  %v5442_v59 = vrot.slane %v5429_v36, %v10064_v24 }
0x1649   :  { %v11081_v4 = vpack.c.bf16 %v5615_v52, %v5612_v40  ;;  %v5620_v15 = vld [vmem:[#allocation2 + $0x140] sm:$0xff] }
0x164a   :  { %5219 = vst [vmem:[#allocation17 + $0x8] sm:$0xff] %v11016_v6  ;;  %7131 = vmatmul.mubr.msk.f32.vlgmr.msra.gmra.mrb[54].mxu0 %vm312_vm0, %v11016_v6  ;;  %8080 = vmatmul.mubr.msk.f32.vlgmr.msra.gmra.mrb[54].mxu1 %vm312_vm0, %v11016_v6  ;;  %v11085_v57 = vpack.c.bf16 %v5620_v15, %v5617_v22  ;;  %v5244_v40 = vld [vmem:[#allocation4] sm:$0x7]  ;;  %v5434_v22 = vrot.slane %v5429_v36, %v10078_v38  ;;  %v5796_v36 = vld [vmem:[#allocation3 + $0xf8] sm:$0xff] }
0x164b   :  { %9044 = vmatpush1.bf16.msra.mxu0 %v11011_v7  ;;  %9059 = vmatpush3.bf16.msra.mxu1 %v11013_v1  ;;  %v5249_v52 = vrot.slane %v5244_v40, %v10078_v38  ;;  %v5253_v15 = vrot.slane %v5244_v40, %v10085_v42 }
0x164c   :  { %9046 = vmatprep.subr.bf16.mxu0 %v11018_v31  ;;  %9060 = vmatprep.subr.bf16.mxu1 %v11392_v34 }
0x164d   :  { %5510 = vmatprep.mubr.f32.mxu0 %v11391_v47  ;;  %8098 = vmatprep.mubr.msk.f32.mxu1 %vm9798_vm1, %v11391_v47  ;;  %v9341_v56 = vadd.f32 %v5434_v22, %v5249_v52  ;;  %v9343_v10 = vadd.f32 %v5438_v53, %v5253_v15 }
0x164f   :  { %9048 = vmatpush1.bf16.msra.mxu0 %v11027_v18  ;;  %9062 = vmatpush3.bf16.msra.mxu1 %v11029_v45 }
0x1650   :  { %9050 = vmatprep.subr.bf16.mxu0 %v11033_v30  ;;  %9063 = vmatprep.subr.bf16.mxu1 %v11392_v34 }
0x1653   :  { %9052 = vmatpush1.bf16.msra.mxu0 %v11040_v2  ;;  %9065 = vmatpush3.bf16.msra.mxu1 %v11042_v23 }
0x1654   :  { %9054 = vmatprep.subr.bf16.mxu0 %v11046_v25  ;;  %9066 = vmatprep.subr.bf16.mxu1 %v11392_v34 }
0x1657   :  { %9056 = vmatpush1.bf16.msra.mxu0 %v11050_v13  ;;  %9068 = vmatpush3.bf16.msra.mxu1 %v11052_v46 }
0x1658   :  { %9085 = vmatprep.subr.bf16.mxu1 %v11392_v34  ;;  %9070 = vmatprep.subr.bf16.mxu0 %v11066_v63 }
0x165a   :  { %7133 = vmatmul.mubr.msk.f32.vlgmr.msra.gmra.mrb[54].mxu0 %vm312_vm0, %v10915_v39  ;;  %8099 = vmatmul.mubr.msk.f32.vlgmr.msra.gmra.mrb[56].mxu1 %vm312_vm0, %v10915_v39 }
0x165b   :  { %5712 = vmatprep.mubr.f32.mxu0 %v11391_v47  ;;  %8117 = vmatprep.mubr.msk.f32.mxu1 %vm9798_vm1, %v11391_v47 }
0x165c   :  { %9072 = vmatpush1.bf16.msra.mxu0 %v11068_v54  ;;  %9087 = vmatpush3.bf16.msra.mxu1 %v11071_v28 }
0x165d   :  { %9088 = vmatprep.subr.bf16.mxu1 %v11392_v34  ;;  %9074 = vmatprep.subr.bf16.mxu0 %v11075_v32 }
0x1660   :  { %9076 = vmatpush1.bf16.msra.mxu0 %v11078_v17  ;;  %9090 = vmatpush3.bf16.msra.mxu1 %v11081_v4 }
0x1661   :  { %9091 = vmatprep.subr.bf16.mxu1 %v11392_v34  ;;  %9078 = vmatprep.subr.bf16.mxu0 %v11085_v57 }
0x1664   :  { %9080 = vmatpush1.bf16.msra.mxu0 %v11088_v26  ;;  %9093 = vmatpush3.bf16.msra.mxu1 %v11091_v9 }
0x1665   :  { %9094 = vmatprep.subr.bf16.mxu1 %v11392_v34  ;;  %9082 = vmatprep.subr.bf16.mxu0 %v11095_v44 }
0x1668   :  { %9084 = vmatpush1.bf16.msra.mxu0 %v11098_v0  ;;  %9096 = vmatpush3.bf16.msra.mxu1 %v11101_v27 }
0x1669   :  { %9113 = vmatprep.subr.bf16.mxu1 %v11392_v34  ;;  %9098 = vmatprep.subr.bf16.mxu0 %v11105_v50  ;;  %v5257_v50 = vrot.slane %v5244_v40, %v10064_v24 }
0x171d   :  { %v5401_v61 = vpop.f32.mrb[54].mxu1 }
0x171e   :  { %v8081_v51 = vpop.f32.mrb[55].mxu1  ;;  %v5402_v52 = vadd.f32 %v5401_v61, %v5257_v50  ;;  %v5798_v50 = vld [vmem:[#allocation3 + $0x108] sm:$0xff]  ;;  %v5797_v61 = vld [vmem:[#allocation3 + $0x100] sm:$0xff] }
0x172d   :  { %v5512_v48 = vpop.f32.mrb[54].mxu0  ;;  %v5583_v21 = vpop.f32.mrb[56].mxu1 }
0x172e   :  { %v9342_v37 = vadd.f32 %v9341_v56, %v5512_v48  ;;  %v5514_v3 = vpop.f32.mrb[55].mxu0  ;;  %v8100_v5 = vpop.f32.mrb[57].mxu1  ;;  %v5584_v0 = vadd.f32 %v5583_v21, %v5442_v59  ;;  %v5789_v48 = vld [vmem:[#allocation3 + $0xc0] sm:$0xff]  ;;  %v5800_v59 = vld [vmem:[#allocation3 + $0x118] sm:$0xff] }
0x172f   :  { %v9344_v12 = vadd.f32 %v9343_v10, %v5514_v3  ;;  %v5791_v3 = vld [vmem:[#allocation3 + $0xd0] sm:$0xff]  ;;  %v5794_v5 = vld [vmem:[#allocation3 + $0xe8] sm:$0xff] }
0x1730   :  { %v5588_v41 = vmul.f32 0.5, %v9342_v37  ;;  %v5792_v37 = vld [vmem:[#allocation3 + $0xd8] sm:$0xff] }
0x1731   :  { %v5593_v35 = vmul.f32 0.5, %v9344_v12  ;;  %v5799_v12 = vld [vmem:[#allocation3 + $0x110] sm:$0xff]  ;;  %v11116_v21 = vpack.c.bf16 %v5792_v37, %v5789_v48  ;;  %v5808_v37 = vld [vmem:[#allocation3 + $0x158] sm:$0xff] }
0x1732   :  { %9541 = vtanh.f32 %v5588_v41  ;;  %v5803_v48 = vld [vmem:[#allocation3 + $0x130] sm:$0xff] }
0x1733   :  { %9543 = vtanh.f32 %v5593_v35 }
0x173c   :  { %v9542_v51 = vpop.eup %9541 }
0x173d   :  { %v5590_v27 = vmul.f32 0.5, %v9542_v51  ;;  %v9544_v9 = vpop.eup %9543  ;;  %v5802_v51 = vld [vmem:[#allocation3 + $0x128] sm:$0xff] }
0x173e   :  { %v5595_v53 = vmul.f32 0.5, %v9544_v9  ;;  %v11122_v9 = vpack.c.bf16 %v5799_v12, %v5796_v36  ;;  %v5807_v36 = vld [vmem:[#allocation3 + $0x150] sm:$0xff] }
0x173f   :  { %v5591_v44 = vadd.f32 0.5, %v5590_v27  ;;  %v11118_v27 = vpack.c.bf16 %v5794_v5, %v5791_v3  ;;  %v5811_v3 = vld [vmem:[#allocation3 + $0x170] sm:$0xff] }
0x1740   :  { %v5596_v56 = vadd.f32 0.5, %v5595_v53  ;;  %v11149_v12 = vpack.c.bf16 %v5811_v3, %v5808_v37 }
0x1741   :  { %v5597_v22 = vmul.f32 %v5591_v44, %v5584_v0  ;;  %v5795_v44 = vld [vmem:[#allocation3 + $0xf0] sm:$0xff] }
0x1742   :  { %v5600_v10 = vsub.f32 1.0, %v5596_v56  ;;  %v5602_v40 = vmul.f32 %v5596_v56, %v10915_v39  ;;  %v11130_v39 = vpack.c.bf16 %v5798_v50, %v5795_v44  ;;  %v5804_v56 = vld [vmem:[#allocation3 + $0x138] sm:$0xff] }
0x1743   :  { %v5598_v15 = vadd.f32 %v5597_v22, %v5402_v52  ;;  %v5805_v52 = vld [vmem:[#allocation3 + $0x140] sm:$0xff]  ;;  %v11132_v22 = vpack.c.bf16 %v5800_v59, %v5797_v61  ;;  %v5812_v44 = vld [vmem:[#allocation3 + $0x178] sm:$0xff] }
0x1744   :  { %v11136_v53 = vpack.c.bf16 %v5805_v52, %v5802_v51  ;;  %v5989_v59 = vld [vmem:[#allocation6 + $0x8] sm:$0xff] }
0x1745   :  { %9545 = vtanh.f32 %v5598_v15  ;;  %v5801_v15 = vld [vmem:[#allocation3 + $0x120] sm:$0xff] }
0x1746   :  { %v11143_v5 = vpack.c.bf16 %v5804_v56, %v5801_v15 }
0x174f   :  { %v9546_v41 = vpop.eup %9545 }
0x1750   :  { %v5601_v35 = vmul.f32 %v9546_v41, %v5600_v10  ;;  %v5806_v10 = vld [vmem:[#allocation3 + $0x148] sm:$0xff] }
0x1751   :  { %v11145_v41 = vpack.c.bf16 %v5806_v10, %v5803_v48  ;;  %v5813_v48 = vld [vmem:[#allocation5 + $0x3] sm:$0x7]  ;;  %v5628_v10 = vld [vmem:[#allocation4 + $0x3] sm:$0x7] }
0x1752   :  { %v11120_v0 = vadd.f32 %v5602_v40, %v5601_v35  ;;  %v5810_v35 = vld [vmem:[#allocation3 + $0x168] sm:$0xff]  ;;  %v5809_v40 = vld [vmem:[#allocation3 + $0x160] sm:$0xff]  ;;  %v5633_v37 = vrot.slane %v5628_v10, %v10078_v38  ;;  %v5818_v3 = vrot.slane %v5813_v48, %v10078_v38 }
0x1753   :  { %v11153_v50 = vpack.c.bf16 %v5810_v35, %v5807_v36  ;;  %v11155_v61 = vpack.c.bf16 %v5812_v44, %v5809_v40  ;;  %v5637_v36 = vrot.slane %v5628_v10, %v10085_v42  ;;  %v5822_v35 = vrot.slane %v5813_v48, %v10085_v42 }
0x1754   :  { %7135 = vmatmul.mubr.msk.f32.vlgmr.msra.gmra.mrb[56].mxu0 %vm312_vm0, %v11120_v0  ;;  %8118 = vmatmul.mubr.msk.f32.vlgmr.msra.gmra.mrb[58].mxu1 %vm312_vm0, %v11120_v0  ;;  %v9345_v40 = vadd.f32 %v5818_v3, %v5633_v37 }
0x1755   :  { %9100 = vmatpush1.bf16.msra.mxu0 %v11116_v21  ;;  %9115 = vmatpush3.bf16.msra.mxu1 %v11118_v27  ;;  %11416 = vst [vmem:[#allocation47_spill] sm:$0xff] %v11153_v50  ;;  %11417 = vst [vmem:[#allocation48_spill] sm:$0xff] %v11155_v61 }
0x1756   :  { %9102 = vmatprep.subr.bf16.mxu0 %v11122_v9  ;;  %9116 = vmatprep.subr.bf16.mxu1 %v11392_v34 }
0x1757   :  { %5894 = vmatprep.mubr.f32.mxu0 %v11391_v47  ;;  %8136 = vmatprep.mubr.msk.f32.mxu1 %vm9798_vm1, %v11391_v47 }
0x1759   :  { %9104 = vmatpush1.bf16.msra.mxu0 %v11130_v39  ;;  %9118 = vmatpush3.bf16.msra.mxu1 %v11132_v22 }
0x175a   :  { %9106 = vmatprep.subr.bf16.mxu0 %v11136_v53  ;;  %9119 = vmatprep.subr.bf16.mxu1 %v11392_v34 }
0x175d   :  { %9108 = vmatpush1.bf16.msra.mxu0 %v11143_v5  ;;  %9121 = vmatpush3.bf16.msra.mxu1 %v11145_v41 }
0x175e   :  { %9110 = vmatprep.subr.bf16.mxu0 %v11149_v12  ;;  %9122 = vmatprep.subr.bf16.mxu1 %v11392_v34 }
0x1761   :  { %9112 = vmatpush1.bf16.msra.mxu0 %v11153_v50  ;;  %9124 = vmatpush3.bf16.msra.mxu1 %v11155_v61 }
0x1762   :  { %9125 = vmatprep.subr.bf16.mxu0 %v11392_v34  ;;  %9138 = vmatprep.subr.bf16.mxu1 %v10954_v55  ;;  %v5988_v55 = vld [vmem:[#allocation6] sm:$0xff] }
0x1763   :  { %v11178_v51 = vpack.c.bf16 %v5989_v59, %v5988_v55  ;;  %v9347_v59 = vadd.f32 %v5822_v35, %v5637_v36 }
0x1764   :  { %7137 = vmatmul.mubr.msk.f32.vlgmr.msra.gmra.mrb[56].mxu0 %vm312_vm0, %v10981_v8  ;;  %8137 = vmatmul.mubr.msk.f32.vlgmr.msra.gmra.mrb[60].mxu1 %vm312_vm0, %v10981_v8 }
0x1765   :  { %8155 = vmatprep.mubr.msk.f32.mxu0 %vm9798_vm1, %v11391_v47  ;;  %9140 = vmatpush1.bf16.msra.mxu1 %v10956_v62  ;;  %11418 = vst [vmem:[#allocation49_spill] sm:$0xff] %v11178_v51  ;;  %v5990_v62 = vld [vmem:[#allocation6 + $0x10] sm:$0xff] }
0x1766   :  { %9142 = vmatprep.subr.bf16.mxu1 %v10959_v49  ;;  %6187 = vmatprep.mubr.f32.mxu1 %v11391_v47  ;;  %v5991_v49 = vld [vmem:[#allocation6 + $0x18] sm:$0xff] }
0x1767   :  { %9127 = vmatpush3.bf16.msra.mxu0 %v11178_v51 }
0x1768   :  { %9128 = vmatprep.subr.bf16.mxu0 %v11392_v34 }
0x1769   :  { %9144 = vmatpush1.bf16.msra.mxu1 %v10962_v43  ;;  %v11182_v43 = vpack.c.bf16 %v5991_v49, %v5990_v62 }
0x176a   :  { %9146 = vmatprep.subr.bf16.mxu1 %v10965_v60  ;;  %v5992_v60 = vld [vmem:[#allocation6 + $0x20] sm:$0xff] }
0x176b   :  { %11419 = vst [vmem:[#allocation50_spill] sm:$0xff] %v11182_v43  ;;  %9130 = vmatpush3.bf16.msra.mxu0 %v11182_v43 }
0x176c   :  { %9131 = vmatprep.subr.bf16.mxu0 %v11392_v34 }
0x176d   :  { %9148 = vmatpush1.bf16.msra.mxu1 %v10968_v14  ;;  %v5993_v14 = vld [vmem:[#allocation6 + $0x28] sm:$0xff] }
0x176e   :  { %9150 = vmatprep.subr.bf16.mxu1 %v10997_v33  ;;  %v11186_v33 = vpack.c.bf16 %v5993_v14, %v5992_v60 }
0x1770   :  { %11420 = vst [vmem:[#allocation51_spill] sm:$0xff] %v11186_v33  ;;  %9133 = vmatpush3.bf16.msra.mxu0 %v11186_v33  ;;  %v5641_v33 = vrot.slane %v5628_v10, %v10064_v24 }
0x1771   :  { %9152 = vmatpush1.bf16.msra.mxu1 %v10999_v16  ;;  %9134 = vmatprep.subr.bf16.mxu0 %v11392_v34  ;;  %v5994_v16 = vld [vmem:[#allocation6 + $0x30] sm:$0xff] }
0x1772   :  { %9166 = vmatprep.subr.bf16.mxu1 %v11006_v29  ;;  %v5995_v29 = vld [vmem:[#allocation6 + $0x38] sm:$0xff] }
0x1773   :  { %v11190_v52 = vpack.c.bf16 %v5995_v29, %v5994_v16 }
0x1775   :  { %11421 = vst [vmem:[#allocation52_spill] sm:$0xff] %v11190_v52  ;;  %9136 = vmatpush3.bf16.msra.mxu0 %v11190_v52 }
0x1776   :  { %9153 = vmatprep.subr.bf16.mxu0 %v11392_v34 }
0x1827   :  { %v5785_v15 = vpop.f32.mrb[58].mxu1 }
0x1828   :  { %v8119_v56 = vpop.f32.mrb[59].mxu1  ;;  %v5786_v37 = vadd.f32 %v5785_v15, %v5641_v33 }
0x1829   :  { %v5826_v56 = vrot.slane %v5813_v48, %v10064_v24 }
0x1837   :  { %v5896_v44 = vpop.f32.mrb[56].mxu0  ;;  %v5967_v55 = vpop.f32.mrb[60].mxu1 }
0x1838   :  { %v9346_v62 = vadd.f32 %v9345_v40, %v5896_v44  ;;  %v5898_v49 = vpop.f32.mrb[57].mxu0  ;;  %v8138_v60 = vpop.f32.mrb[61].mxu1  ;;  %v5968_v51 = vadd.f32 %v5967_v55, %v5826_v56 }
0x1839   :  { %v9348_v16 = vadd.f32 %v9347_v59, %v5898_v49 }
0x183a   :  { %v5972_v14 = vmul.f32 0.5, %v9346_v62 }
0x183b   :  { %v5977_v29 = vmul.f32 0.5, %v9348_v16 }
0x183c   :  { %9547 = vtanh.f32 %v5972_v14 }
0x183d   :  { %9549 = vtanh.f32 %v5977_v29 }
0x1846   :  { %v9548_v52 = vpop.eup %9547 }
0x1847   :  { %v5974_v43 = vmul.f32 0.5, %v9548_v52  ;;  %v9550_v50 = vpop.eup %9549 }
0x1848   :  { %v5979_v35 = vmul.f32 0.5, %v9550_v50 }
0x1849   :  { %v5975_v61 = vadd.f32 0.5, %v5974_v43 }
0x184a   :  { %v5980_v40 = vadd.f32 0.5, %v5979_v35 }
0x184b   :  { %v5981_v3 = vmul.f32 %v5975_v61, %v5968_v51 }
0x184c   :  { %v5984_v44 = vsub.f32 1.0, %v5980_v40  ;;  %v5986_v49 = vmul.f32 %v5980_v40, %v10981_v8  ;;  %v11215_v8 = vld [vmem:[#allocation7] ss:$0 sm:$0xff] }
0x184d   :  { %v5982_v36 = vadd.f32 %v5981_v3, %v5786_v37 }
0x184f   :  { %9551 = vtanh.f32 %v5982_v36 }
0x1859   :  { %v9552_v59 = vpop.eup %9551 }
0x185a   :  { %v5985_v62 = vmul.f32 %v9552_v59, %v5984_v44 }
0x185c   :  { %v11201_v60 = vadd.f32 %v5986_v49, %v5985_v62 }
0x185e   :  { %8156 = vmatmul.mubr.msk.f32.vlgmr.msra.gmra.mrb[58].mxu0 %vm312_vm0, %v11201_v60 }
0x185f   :  { %9155 = vmatpush3.bf16.msra.mxu0 %v10979_v19  ;;  %8174 = vmatprep.mubr.msk.f32.mxu0 %vm9798_vm1, %v11391_v47 }
0x1860   :  { %9156 = vmatprep.subr.bf16.mxu0 %v11392_v34 }
0x1863   :  { %9158 = vmatpush3.bf16.msra.mxu0 %v10986_v20  ;;  %v11422_v20 = vld [vmem:[#allocation42_spill] sm:$0xff] }
0x1864   :  { %9159 = vmatprep.subr.bf16.mxu0 %v11392_v34 }
0x1867   :  { %9161 = vmatpush3.bf16.msra.mxu0 %v10992_v58  ;;  %v11423_v58 = vld [vmem:[#allocation43_spill] sm:$0xff] }
0x1868   :  { %9162 = vmatprep.subr.bf16.mxu0 %v11392_v34 }
0x186b   :  { %9164 = vmatpush3.bf16.msra.mxu0 %v11002_v11  ;;  %v11424_v11 = vld [vmem:[#allocation45_spill] sm:$0xff] }
0x186c   :  { %9181 = vmatprep.subr.bf16.mxu0 %v11392_v34 }
0x1931   :  { %v6072_v19 = vpop.f32.mrb[58].mxu0 }
0x1932   :  { %v6073_v50 = vadd.f32 %v11215_v8, %v6072_v19  ;;  %v8157_v61 = vpop.f32.mrb[59].mxu0 }
0x1934   :  { %v11219_v51 = vadd.f32 %v6073_v50, %v11016_v6 }
0x1936   :  { %6078 = vst [vmem:[#allocation17 + $0x10] sm:$0xff] %v11219_v51  ;;  %7141 = vmatmul.mubr.msk.f32.vlgmr.msra.gmra.mrb[62].mxu1 %vm312_vm0, %v11219_v51  ;;  %8175 = vmatmul.mubr.msk.f32.vlgmr.msra.gmra.mrb[60].mxu0 %vm312_vm0, %v11219_v51 }
0x1937   :  { %9168 = vmatpush1.bf16.msra.mxu1 %v11011_v7  ;;  %9183 = vmatpush3.bf16.msra.mxu0 %v11013_v1  ;;  %v11425_v7 = vld [vmem:[#allocation44_spill] sm:$0xff]  ;;  %v11426_v1 = vld [vmem:[#allocation46_spill] sm:$0xff] }
0x1938   :  { %9170 = vmatprep.subr.bf16.mxu1 %v11018_v31  ;;  %9184 = vmatprep.subr.bf16.mxu0 %v11392_v34 }
0x1939   :  { %6369 = vmatprep.mubr.f32.mxu1 %v11391_v47  ;;  %8193 = vmatprep.mubr.msk.f32.mxu0 %vm9798_vm1, %v11391_v47 }
0x193b   :  { %9172 = vmatpush1.bf16.msra.mxu1 %v11027_v18  ;;  %9186 = vmatpush3.bf16.msra.mxu0 %v11029_v45  ;;  %v6288_v18 = vld [vmem:[#allocation5] sm:$0x7]  ;;  %v6103_v45 = vld [vmem:[#allocation4] sm:$0x7] }
0x193c   :  { %9174 = vmatprep.subr.bf16.mxu1 %v11033_v30  ;;  %9187 = vmatprep.subr.bf16.mxu0 %v11392_v34  ;;  %v6108_v30 = vrot.slane %v6103_v45, %v10078_v38  ;;  %v6301_v43 = vrot.slane %v6288_v18, %v10064_v24  ;;  %v6116_v52 = vrot.slane %v6103_v45, %v10064_v24 }
0x193f   :  { %9176 = vmatpush1.bf16.msra.mxu1 %v11040_v2  ;;  %9189 = vmatpush3.bf16.msra.mxu0 %v11042_v23  ;;  %v6293_v2 = vrot.slane %v6288_v18, %v10078_v38  ;;  %v6112_v23 = vrot.slane %v6103_v45, %v10085_v42 }
0x1940   :  { %9178 = vmatprep.subr.bf16.mxu1 %v11046_v25  ;;  %9190 = vmatprep.subr.bf16.mxu0 %v11392_v34  ;;  %v6297_v25 = vrot.slane %v6288_v18, %v10085_v42 }
0x1943   :  { %9180 = vmatpush1.bf16.msra.mxu1 %v11050_v13  ;;  %9192 = vmatpush3.bf16.msra.mxu0 %v11052_v46  ;;  %v9349_v13 = vadd.f32 %v6293_v2, %v6108_v30 }
0x1944   :  { %9194 = vmatprep.subr.bf16.mxu1 %v11066_v63  ;;  %9209 = vmatprep.subr.bf16.mxu0 %v11392_v34 }
0x1946   :  { %7143 = vmatmul.mubr.msk.f32.vlgmr.msra.gmra.mrb[62].mxu1 %vm312_vm0, %v11120_v0  ;;  %8194 = vmatmul.mubr.msk.f32.vlgmr.msra.gmra.mrb[62].mxu0 %vm312_vm0, %v11120_v0 }
0x1947   :  { %9196 = vmatpush1.bf16.msra.mxu1 %v11068_v54  ;;  %9211 = vmatpush3.bf16.msra.mxu0 %v11071_v28  ;;  %v9351_v54 = vadd.f32 %v6297_v25, %v6112_v23 }
0x1948   :  { %9198 = vmatprep.subr.bf16.mxu1 %v11075_v32  ;;  %9212 = vmatprep.subr.bf16.mxu0 %v11392_v34 }
0x1949   :  { %6571 = vmatprep.mubr.f32.mxu1 %v11391_v47  ;;  %8212 = vmatprep.mubr.msk.f32.mxu0 %vm9798_vm1, %v11391_v47 }
0x194b   :  { %9200 = vmatpush1.bf16.msra.mxu1 %v11078_v17  ;;  %9214 = vmatpush3.bf16.msra.mxu0 %v11081_v4 }
0x194c   :  { %9202 = vmatprep.subr.bf16.mxu1 %v11085_v57  ;;  %9215 = vmatprep.subr.bf16.mxu0 %v11392_v34 }
0x194f   :  { %9204 = vmatpush1.bf16.msra.mxu1 %v11088_v26  ;;  %9217 = vmatpush3.bf16.msra.mxu0 %v11422_v20 }
0x1950   :  { %9206 = vmatprep.subr.bf16.mxu1 %v11423_v58  ;;  %9218 = vmatprep.subr.bf16.mxu0 %v11392_v34 }
0x1953   :  { %9208 = vmatpush1.bf16.msra.mxu1 %v11424_v11  ;;  %9220 = vmatpush3.bf16.msra.mxu0 %v11425_v7 }
0x1954   :  { %9222 = vmatprep.subr.bf16.mxu1 %v11426_v1  ;;  %9237 = vmatprep.subr.bf16.mxu0 %v11392_v34 }
0x1a09   :  { %v6260_v6 = vpop.f32.mrb[60].mxu0 }
0x1a0a   :  { %v8176_v31 = vpop.f32.mrb[61].mxu0  ;;  %v6261_v55 = vadd.f32 %v6260_v6, %v6116_v52 }
0x1a19   :  { %v6371_v46 = vpop.f32.mrb[62].mxu1  ;;  %v6442_v63 = vpop.f32.mrb[62].mxu0 }
0x1a1a   :  { %v9350_v28 = vadd.f32 %v9349_v13, %v6371_v46  ;;  %v6373_v32 = vpop.f32.mrb[63].mxu1  ;;  %v8195_v17 = vpop.f32.mrb[63].mxu0  ;;  %v6443_v48 = vadd.f32 %v6442_v63, %v6301_v43 }
0x1a1b   :  { %v9352_v57 = vadd.f32 %v9351_v54, %v6373_v32 }
0x1a1c   :  { %v6447_v4 = vmul.f32 0.5, %v9350_v28 }
0x1a1d   :  { %v6452_v26 = vmul.f32 0.5, %v9352_v57 }
0x1a1e   :  { %9553 = vtanh.f32 %v6447_v4 }
0x1a1f   :  { %9555 = vtanh.f32 %v6452_v26 }
0x1a28   :  { %v9554_v33 = vpop.eup %9553 }
0x1a29   :  { %v6449_v15 = vmul.f32 0.5, %v9554_v33  ;;  %v9556_v16 = vpop.eup %9555 }
0x1a2a   :  { %v6454_v56 = vmul.f32 0.5, %v9556_v16 }
0x1a2b   :  { %v6450_v10 = vadd.f32 0.5, %v6449_v15 }
0x1a2c   :  { %v6455_v37 = vadd.f32 0.5, %v6454_v56 }
0x1a2d   :  { %v6456_v14 = vmul.f32 %v6450_v10, %v6443_v48 }
0x1a2e   :  { %v6459_v3 = vsub.f32 1.0, %v6455_v37  ;;  %v6461_v40 = vmul.f32 %v6455_v37, %v11120_v0  ;;  %v11429_v0 = vld [vmem:[#allocation49_spill] sm:$0xff] }
0x1a2f   :  { %v6457_v29 = vadd.f32 %v6456_v14, %v6261_v55 }
0x1a31   :  { %9557 = vtanh.f32 %v6457_v29 }
0x1a3b   :  { %v9558_v36 = vpop.eup %9557 }
0x1a3c   :  { %v6460_v35 = vmul.f32 %v9558_v36, %v6459_v3 }
0x1a3e   :  { %v6462_v44 = vadd.f32 %v6461_v40, %v6460_v35 }
0x1a40   :  { %7145 = vmatmul.mubr.msk.f32.vlgmr.msra.gmra.mrb[64].mxu1 %vm312_vm0, %v6462_v44  ;;  %8213 = vmatmul.mubr.msk.f32.vlgmr.msra.gmra.mrb[64].mxu0 %vm312_vm0, %v6462_v44  ;;  %v6938_v59 = vsel %vm312_vm0, %v6462_v44, 0.0 }
0x1a41   :  { %9224 = vmatpush1.bf16.msra.mxu1 %v11116_v21  ;;  %9239 = vmatpush3.bf16.msra.mxu0 %v11118_v27  ;;  %6939 = vst [vmem:[#allocation18] sm:$0xff] %v6938_v59  ;;  %v11427_v21 = vld [vmem:[#allocation47_spill] sm:$0xff]  ;;  %v11428_v27 = vld [vmem:[#allocation48_spill] sm:$0xff] }
0x1a42   :  { %9226 = vmatprep.subr.bf16.mxu1 %v11122_v9  ;;  %9240 = vmatprep.subr.bf16.mxu0 %v11392_v34  ;;  %v11430_v9 = vld [vmem:[#allocation50_spill] sm:$0xff] }
0x1a43   :  { %6753 = vmatprep.mubr.f32.mxu1 %v11391_v47  ;;  %8231 = vmatprep.mubr.msk.f32.mxu0 %vm9798_vm1, %v11391_v47 }
0x1a45   :  { %9228 = vmatpush1.bf16.msra.mxu1 %v11130_v39  ;;  %9242 = vmatpush3.bf16.msra.mxu0 %v11132_v22  ;;  %v11431_v39 = vld [vmem:[#allocation51_spill] sm:$0xff]  ;;  %v11432_v22 = vld [vmem:[#allocation52_spill] sm:$0xff] }
0x1a46   :  { %9230 = vmatprep.subr.bf16.mxu1 %v11136_v53  ;;  %9243 = vmatprep.subr.bf16.mxu0 %v11392_v34 }
0x1a49   :  { %9232 = vmatpush1.bf16.msra.mxu1 %v11143_v5  ;;  %9245 = vmatpush3.bf16.msra.mxu0 %v11145_v41  ;;  %v6672_v41 = vld [vmem:[#allocation5 + $0x3] sm:$0x7] }
0x1a4a   :  { %9234 = vmatprep.subr.bf16.mxu1 %v11149_v12  ;;  %9246 = vmatprep.subr.bf16.mxu0 %v11392_v34  ;;  %v6487_v12 = vld [vmem:[#allocation4 + $0x3] sm:$0x7]  ;;  %v6681_v19 = vrot.slane %v6672_v41, %v10085_v42  ;;  %v6685_v18 = vrot.slane %v6672_v41, %v10064_v24 }
0x1a4b   :  { %v6492_v62 = vrot.slane %v6487_v12, %v10078_v38  ;;  %v6496_v49 = vrot.slane %v6487_v12, %v10085_v42 }
0x1a4d   :  { %9236 = vmatpush1.bf16.msra.mxu1 %v11427_v21  ;;  %9248 = vmatpush3.bf16.msra.mxu0 %v11428_v27  ;;  %v9355_v58 = vadd.f32 %v6681_v19, %v6496_v49 }
0x1a4e   :  { %9249 = vmatprep.subr.bf16.mxu1 %v11392_v34 }
0x1a50   :  { %7147 = vmatmul.mubr.msk.f32.vlgmr.msra.gmra.mrb[64].mxu1 %vm312_vm0, %v11201_v60  ;;  %8232 = vmatmul.mubr.msk.f32.vlgmr.msra.gmra.mrb[66].mxu0 %vm312_vm0, %v11201_v60 }
0x1a51   :  { %9251 = vmatpush3.bf16.msra.mxu1 %v11429_v0  ;;  %8250 = vmatprep.mubr.msk.f32.mxu1 %vm9798_vm1, %v11391_v47  ;;  %v6677_v47 = vrot.slane %v6672_v41, %v10078_v38  ;;  %v6500_v38 = vrot.slane %v6487_v12, %v10064_v24 }
0x1a52   :  { %9252 = vmatprep.subr.bf16.mxu1 %v11392_v34 }
0x1a53   :  { %v9353_v50 = vadd.f32 %v6677_v47, %v6492_v62 }
0x1a55   :  { %9254 = vmatpush3.bf16.msra.mxu1 %v11430_v9 }
0x1a56   :  { %9255 = vmatprep.subr.bf16.mxu1 %v11392_v34 }
0x1a59   :  { %9257 = vmatpush3.bf16.msra.mxu1 %v11431_v39 }
0x1a5a   :  { %9258 = vmatprep.subr.bf16.mxu1 %v11392_v34 }
0x1a5d   :  { %9260 = vmatpush3.bf16.msra.mxu1 %v11432_v22 }
0x1b13   :  { %v6644_v53 = vpop.f32.mrb[64].mxu0 }
0x1b14   :  { %v8214_v5 = vpop.f32.mrb[65].mxu0  ;;  %v6645_v23 = vadd.f32 %v6644_v53, %v6500_v38 }
0x1b23   :  { %v6755_v61 = vpop.f32.mrb[64].mxu1  ;;  %v6826_v20 = vpop.f32.mrb[66].mxu0 }
0x1b24   :  { %v9354_v11 = vadd.f32 %v9353_v50, %v6755_v61  ;;  %v6757_v34 = vpop.f32.mrb[65].mxu1  ;;  %v8233_v7 = vpop.f32.mrb[67].mxu0  ;;  %v6827_v2 = vadd.f32 %v6826_v20, %v6685_v18 }
0x1b25   :  { %v9356_v6 = vadd.f32 %v9355_v58, %v6757_v34 }
0x1b26   :  { %v6831_v1 = vmul.f32 0.5, %v9354_v11 }
0x1b27   :  { %v6836_v31 = vmul.f32 0.5, %v9356_v6 }
0x1b28   :  { %9559 = vtanh.f32 %v6831_v1 }
0x1b29   :  { %9561 = vtanh.f32 %v6836_v31 }
0x1b32   :  { %v9560_v45 = vpop.eup %9559 }
0x1b33   :  { %v6833_v30 = vmul.f32 0.5, %v9560_v45  ;;  %v9562_v13 = vpop.eup %9561 }
0x1b34   :  { %v6838_v63 = vmul.f32 0.5, %v9562_v13 }
0x1b35   :  { %v6834_v42 = vadd.f32 0.5, %v6833_v30 }
0x1b36   :  { %v6839_v54 = vadd.f32 0.5, %v6838_v63 }
0x1b37   :  { %v6840_v25 = vmul.f32 %v6834_v42, %v6827_v2 }
0x1b38   :  { %v6843_v28 = vsub.f32 1.0, %v6839_v54  ;;  %v6845_v4 = vmul.f32 %v6839_v54, %v11201_v60 }
0x1b39   :  { %v6841_v46 = vadd.f32 %v6840_v25, %v6645_v23 }
0x1b3b   :  { %9563 = vtanh.f32 %v6841_v46 }
0x1b45   :  { %v9564_v32 = vpop.eup %9563 }
0x1b46   :  { %v6844_v17 = vmul.f32 %v9564_v32, %v6843_v28 }
0x1b48   :  { %v6846_v57 = vadd.f32 %v6845_v4, %v6844_v17 }
0x1b4a   :  { %8251 = vmatmul.mubr.msk.f32.vlgmr.msra.gmra.mrb[66].mxu1 %vm312_vm0, %v6846_v57  ;;  %v6940_v24 = vsel %vm312_vm0, %v6846_v57, 0.0 }
0x1b4b   :  { %6942 = vst [vmem:[#allocation18 + $0x8] sm:$0xff] %v6940_v24 }
0x1b4c   :  { %9730 = shalt.err (!%p9727_p4)
}
0x1b4d   :  { %s9731_s3 = scalar_lea.hbm %s11363_s13, 256 }
0x1b4e   :  { %p9732_p5 = scmp.ne.s32.totalorder %s11363_s13, %s9731_s3  ;;  %p9735_p6 = scmp.lt.u32.totalorder %s9731_s3, %s11363_s13 }
0x1b50   :  { %p9737_p7 = pnand %p9735_p6, %p9732_p5 }
0x1b52   :  { %9740 = shalt.err (!%p9737_p7)
}
0x1b53   :  { %6966 = dma.vmem_to_hbm [thread:$0]  %s6961_s5, 256, %s11363_s13, [#allocation19], %s9787_s1, %s9787_s1, %s9788_s26  }
0x1b54   :  { %s9800_s21 = smov [#allocation17]  }
0x1b55   :  { %s6948_s22 = sshll.u32 %s9800_s21, 4  ;;  %s6949_s22 = int_to_ptr.vmem [resolvable:$true] %s6948_s22 }
0x1b56   :  { %s9741_s23 = scalar_lea.vmem %s6949_s22, 512  ;;  %p9746_p9 = scmp.lt.s32.totalorder %s6949_s22, %s6949_s22 }
0x1b57   :  { %p9742_p8 = scmp.ne.s32.totalorder %s6949_s22, %s9741_s23  ;;  %p9747_p10 = scmp.lt.s32.totalorder %s9741_s23, %s9741_s23 }
0x1b59   :  { %p9748_p11 = por %p9747_p10, %p9746_p9 }
0x1b5b   :  { %p9749_p12 = pnand %p9748_p11, %p9742_p8 }
0x1c1d   :  { %v6931_v60 = vpop.f32.mrb[66].mxu1 }
0x1c1e   :  { %v6932_v26 = vadd.f32 %v11215_v8, %v6931_v60  ;;  %v8252_v43 = vpop.f32.mrb[67].mxu1 }
0x1c20   :  { %v6935_v33 = vadd.f32 %v6932_v26, %v11219_v51 }
0x1c22   :  { %6937 = vst [vmem:[#allocation17 + $0x18] sm:$0xff] %v6935_v33 }
0x1c23   :  { %9752 = shalt.err (!%p9749_p12)
}
0x1c24   :  { %s9753_s13 = scalar_lea.hbm %s11362_s12, 512 }
0x1c25   :  { %p9754_p13 = scmp.ne.s32.totalorder %s11362_s12, %s9753_s13  ;;  %p9757_p0 = scmp.lt.u32.totalorder %s9753_s13, %s11362_s12 }
0x1c27   :  { %p9759_p1 = pnand %p9757_p0, %p9754_p13 }
0x1c29   :  { %9762 = shalt.err (!%p9759_p1)
}
0x1c2a   :  { %6954 = dma.vmem_to_hbm [thread:$0]  %s6949_s22, 512, %s11362_s12, [#allocation11], %s9787_s1, %s9787_s1, %s9788_s26  }
0x1c2b   :  { %9781 = dma.done.wait [#allocation11], 512  }
0x1c2c   :  { %9782 = vsyncadd [#allocation11], 4294966784 }
0x1c2d   :  { %9783 = dma.done.wait [#allocation19], 256  }
0x1c2e   :  { %9784 = vsyncadd [#allocation19], 4294967040 }
0x1c2f   :  { %6973 = vsyncpa [#allocation10], 1 }
0x1c30   :  { %6974 = vsyncpa [#allocation13], 1 }
0x1c31   :  { %6975 = vsyncpa [#allocation16], 1 }
0x1c32   :  { %6976 = vsyncpa [#allocation11], 1 }
0x1c33   :  { %6977 = vsyncpa [#allocation19], 1 }
0x1c34   :  { %6978 = vsyncmov [#allocation8] }
0x1c37   :  { %s6979_s14 = vpop.sfrf %6978 }
0x1c38   :  { %p7151_p2 = scmp.ne.s32.totalorder %s6979_s14, 0 }
0x1c3a   :  { %6983 = shalt.err (%p7151_p2)  }
0x1c3b   :  { %6985 = vsyncmov [#allocation8 + $0x1] }
0x1c3e   :  { %s6986_s6 = vpop.sfrf %6985 }
0x1c3f   :  { %p7152_p3 = scmp.ne.s32.totalorder %s6986_s6, 0 }
0x1c41   :  { %6990 = shalt.err (%p7152_p3)  }
0x1c42   :  { %6992 = vsyncmov [#allocation8 + $0x2] }
0x1c45   :  { %s6993_s27 = vpop.sfrf %6992 }
0x1c46   :  { %p7153_p4 = scmp.ne.s32.totalorder %s6993_s27, 0 }
0x1c48   :  { %6997 = shalt.err (%p7153_p4)  }
0x1c49   :  { %6999 = vsyncmov [#allocation8 + $0x3] }
0x1c4c   :  { %s7000_s12 = vpop.sfrf %6999 }
0x1c4d   :  { %p7154_p5 = scmp.ne.s32.totalorder %s7000_s12, 0 }
0x1c4f   :  { %7004 = shalt.err (%p7154_p5)  }
0x1c50   :  { %7006 = vsyncmov [#allocation8 + $0x4] }
0x1c53   :  { %s7007_s1 = vpop.sfrf %7006 }
0x1c54   :  { %p7155_p6 = scmp.ne.s32.totalorder %s7007_s1, 0 }
0x1c56   :  { %7011 = shalt.err (%p7155_p6)  }
0x1c57   :  { %7013 = vsyncmov [#allocation8 + $0x5] }
0x1c5a   :  { %s7014_s26 = vpop.sfrf %7013 }
0x1c5b   :  { %p7156_p7 = scmp.ne.s32.totalorder %s7014_s26, 0 }
0x1c5d   :  { %7018 = shalt.err (%p7156_p7)  }

</bundles_post_ra>
